<compile_context>
chip_gen: v7x
topology: tpu7x:2x2x1
jax: 0.10.0
libtpu: 0.0.40
codegen_flags: <defaults>
</compile_context>

<pallas_src>
import jax
import jax.numpy as jnp
from jax.experimental import pallas as pl
from jax.experimental.pallas import tpu as pltpu


def _round_up(x, m):
    return (x + m - 1) // m * m


def _pick_tr(h, w):
    """Row tile TR: divides H, targets M = TR*W in ~[512, 2048]."""
    divs = [d for d in range(1, h + 1) if h % d == 0]
    ok = [d for d in divs if d * w <= 2048] or [1]
    hit = [d for d in ok if d * w >= 512]
    return hit[0] if hit else ok[-1]


def _vmem_estimate(hp, wp, cin, cout, coutp, tr, w, fuse_k):
    """Rough per-step VMEM bytes (lane padding + double buffering included)."""
    lane = lambda c: _round_up(max(c, 1), 128)
    x_b = 2 * hp * wp * lane(cin) * 2                       # padded sample, bf16, x2
    w_k = _round_up(9 * cin, 16) if fuse_k else 9 * _round_up(cin, 16)
    w_b = 2 * w_k * (2 * coutp) * 2                         # weights, bf16, x2
    b_b = 2 * 8 * (2 * coutp) * 4                           # bias, f32, x2
    o_b = 2 * tr * w * lane(cout) * 2                       # out tile, bf16, x2
    col_b = tr * w * _round_up(9 * cin, 128) * 2 if fuse_k else 0
    acc_b = 2 * tr * w * (2 * coutp) * 4                    # f32 acc + epilogue temps
    return x_b + w_b + b_b + o_b + col_b + acc_b


def _make_mfm_kernel(TR, W, Cin, Cout, Coutp, fuse_k):
    """Kernel body for one (sample, row-tile) grid step."""

    def kernel(x_ref, w_ref, b_ref, o_ref, *scratch):
        # x_ref : (Hp, Wp, Cin)   padded bf16 sample, resident across row tiles
        # w_ref : (9*Cin, 2*Coutp) if fuse_k else (9, Cin, 2*Coutp), bf16
        # b_ref : (1, 2*Coutp)    f32 bias (padded lanes are 0)
        # o_ref : (TR, W, Cout)   bf16 MFM output row tile (unpadded channels)
        r0 = pl.multiple_of(pl.program_id(1) * TR, TR)   # first output row of tile

        if fuse_k:
            # Lane-aligned Cin: build im2col once, one fat MXU matmul (K = 9*Cin).
            col_ref = scratch[0]
            for t in range(9):
                dy, dx = divmod(t, 3)
                patch = x_ref[pl.ds(r0 + dy, TR), pl.ds(dx, W), :]       # (TR, W, Cin)
                col_ref[:, t * Cin:(t + 1) * Cin] = patch.reshape(TR * W, Cin)
            acc = jnp.dot(col_ref[...], w_ref[...],
                          preferred_element_type=jnp.float32)            # (TR*W, 2*Coutp)
        else:
            # Small / unaligned Cin: 9 accumulated taps (K = Cin), no scratch.
            acc = None
            for t in range(9):
                dy, dx = divmod(t, 3)
                patch = x_ref[pl.ds(r0 + dy, TR), pl.ds(dx, W), :]       # (TR, W, Cin)
                part = jnp.dot(patch.reshape(TR * W, Cin), w_ref[t],
                               preferred_element_type=jnp.float32)
                acc = part if acc is None else acc + part                # f32 accum

        # Bias + Max-Feature-Map (elementwise max of the two channel halves), f32.
        y = acc + b_ref[...]
        out = jnp.maximum(y[:, :Coutp], y[:, Coutp:])                    # (TR*W, Coutp)
        # bf16, channel-unpadded writeback.
        o_ref[...] = out[:, :Cout].reshape(TR, W, Cout).astype(o_ref.dtype)

    return kernel


def mfm_conv(x_nchw, w_oihw, bias):
    """mfm (type=1) forward: 3x3 conv (stride 1, pad 1) + channel-split max.

    x_nchw : (N, Cin, H, W) f32
    w_oihw : (2*Cout, Cin, 3, 3) f32   (PyTorch Conv2d weight layout)
    bias   : (2*Cout,) f32
    returns (N, Cout, H, W) f32
    """
    N, Cin, H, W = x_nchw.shape
    O2, cin_w, kh, kw = w_oihw.shape
    assert (kh, kw) == (3, 3) and cin_w == Cin and O2 % 2 == 0
    Cout = O2 // 2

    Coutp = _round_up(Cout, 128)        # lane-dense per-half output channels (in-kernel only)
    TR = _pick_tr(H, W)
    R = H // TR
    Hp, Wp = H + 2, W + 2
    fuse_k = (Cin % 128 == 0)           # fat-K im2col only when lane-aligned

    # ---- wrapper layout prep, done in bf16 to halve its HBM traffic ----
    x = x_nchw.astype(jnp.bfloat16)
    x = jnp.transpose(x, (0, 2, 3, 1))                      # NCHW -> NHWC
    x = jnp.pad(x, ((0, 0), (1, 1), (1, 1), (0, 0)))        # 1px halo, channels UNpadded

    # Weights: (2*Cout, Cin, 3, 3) -> tap-major (9, Cin, 2*Cout); pad each MFM
    # half's output channels to Coutp so the in-kernel split is a clean lane slice.
    wt = jnp.transpose(w_oihw.astype(jnp.float32), (2, 3, 1, 0)).reshape(9, Cin, O2)
    w_a = jnp.pad(wt[..., :Cout], ((0, 0), (0, 0), (0, Coutp - Cout)))
    w_b = jnp.pad(wt[..., Cout:], ((0, 0), (0, 0), (0, Coutp - Cout)))
    w_col = jnp.concatenate([w_a, w_b], axis=-1).astype(jnp.bfloat16)   # (9, Cin, 2*Coutp)
    if fuse_k:
        w_col = w_col.reshape(9 * Cin, 2 * Coutp)

    b = bias.astype(jnp.float32)
    b_col = jnp.concatenate([jnp.pad(b[:Cout], (0, Coutp - Cout)),
                             jnp.pad(b[Cout:], (0, Coutp - Cout))]).reshape(1, 2 * Coutp)

    w_spec = (pl.BlockSpec((9 * Cin, 2 * Coutp), lambda n, r: (0, 0)) if fuse_k
              else pl.BlockSpec((9, Cin, 2 * Coutp), lambda n, r: (0, 0, 0)))
    scratch = [pltpu.VMEM((TR * W, 9 * Cin), jnp.bfloat16)] if fuse_k else []

    est = _vmem_estimate(Hp, Wp, Cin, Cout, Coutp, TR, W, fuse_k)
    vmem_limit = int(min(max(2 * est, 32 << 20), 96 << 20))

    # Megacore: shard over samples (n); row tiles of one resident sample stay on
    # one core to avoid duplicating the full-sample input DMA.
    dims = ("parallel", "arbitrary") if N > 1 else ("parallel", "parallel")

    out_nhwc = pl.pallas_call(
        _make_mfm_kernel(TR, W, Cin, Cout, Coutp, fuse_k),
        out_shape=jax.ShapeDtypeStruct((N, H, W, Cout), jnp.bfloat16),
        grid=(N, R),
        in_specs=[
            # Padded sample: block index constant over r -> DMA'd once per sample.
            pl.BlockSpec((None, Hp, Wp, Cin), lambda n, r: (n, 0, 0, 0)),
            # Weights / bias: constant block -> DMA'd once for the whole grid.
            w_spec,
            pl.BlockSpec((1, 2 * Coutp), lambda n, r: (0, 0)),
        ],
        out_specs=pl.BlockSpec((None, TR, W, Cout), lambda n, r: (n, r, 0, 0)),
        scratch_shapes=scratch,
        compiler_params=pltpu.CompilerParams(
            dimension_semantics=dims,
            vmem_limit_bytes=vmem_limit),
    )(x, w_col, b_col)

    # NHWC -> NCHW only at the PyTorch-facing interface; return f32.
    return jnp.transpose(out_nhwc, (0, 3, 1, 2)).astype(jnp.float32)


def _ref_mfm(x, w, b):
    """Pure-JAX reference (same bf16 inputs / f32 accumulation as the kernel)."""
    dn = ("NCHW", "OIHW", "NCHW")
    y = jax.lax.conv_general_dilated(
        x.astype(jnp.bfloat16), w.astype(jnp.bfloat16),
        (1, 1), ((1, 1), (1, 1)), dimension_numbers=dn,
        preferred_element_type=jnp.float32)
    y = y + b.astype(jnp.float32)[None, :, None, None]
    c = w.shape[0] // 2
    return jnp.maximum(y[:, :c], y[:, c:])


if __name__ == "__main__":
    key = jax.random.PRNGKey(0)
    N, Cin, H, W = 2, 4, 16, 16          # mfm(in_channels=4, out_channels=4), type=1
    Cout = 4

    ks = jax.random.split(key, 3)
    x = jax.random.normal(ks[0], (N, Cin, H, W), jnp.float32)
    wgt = jax.random.normal(ks[1], (2 * Cout, Cin, 3, 3), jnp.float32) * 0.1
    bias = jax.random.normal(ks[2], (2 * Cout,), jnp.float32) * 0.1

    out = jax.jit(mfm_conv)(x, wgt, bias)
    out = jax.block_until_ready(out)

    ref = _ref_mfm(x, wgt, bias)
    ref = ref.astype(jnp.bfloat16).astype(jnp.float32)   # kernel writes bf16
    assert out.shape == (N, Cout, H, W)
    assert out.dtype == jnp.float32
    assert jnp.allclose(out, ref, atol=2e-2, rtol=2e-2), "mismatch vs reference"

    print("KERNEL_OK")
</pallas_src>

<mosaic_0001>
module attributes {stable_mosaic.version = 11 : i64} {
  func.func @kernel(%arg0: i32, %arg1: i32, %arg2: memref<1x18x18x4xbf16, #tpu.memory_space<vmem>>, %arg3: memref<9x4x256xbf16, #tpu.memory_space<vmem>>, %arg4: memref<1x256xf32, #tpu.memory_space<vmem>>, %arg5: memref<1x16x16x4xbf16, #tpu.memory_space<vmem>>) attributes {dimension_semantics = [#tpu.dimension_semantics<parallel>, #tpu.dimension_semantics<arbitrary>], iteration_bounds = array<i64: 2, 1>, scalar_prefetch = 0 : i64, scratch_operands = 0 : i64, tpu.core_type = #tpu.core_type<tc>, window_params = [{transform_indices = @transform_0, window_bounds = array<i64: 1, 18, 18, 4>}, {pipeline_mode = #tpu.pipeline_mode<synchronous>, transform_indices = @transform_1, window_bounds = array<i64: 9, 4, 256>}, {pipeline_mode = #tpu.pipeline_mode<synchronous>, transform_indices = @transform_2, window_bounds = array<i64: 1, 256>}, {transform_indices = @transform_3, window_bounds = array<i64: 1, 16, 16, 4>}]} {
    %c16_i32 = arith.constant 16 : i32
    %0 = arith.muli %arg1, %c16_i32 : i32
    %1 = tpu.assume_multiple %0, 16 : i32
    %c0_i32 = arith.constant 0 : i32
    %2 = arith.addi %1, %c0_i32 : i32
    %c0 = arith.constant 0 : index
    %3 = arith.index_cast %2 : i32 to index
    %c0_0 = arith.constant 0 : index
    %c0_1 = arith.constant 0 : index
    %4 = vector.load %arg2[%c0, %3, %c0_0, %c0_1] : memref<1x18x18x4xbf16, #tpu.memory_space<vmem>>, vector<1x16x16x4xbf16>
    %5 = vector.shape_cast %4 : vector<1x16x16x4xbf16> to vector<16x16x4xbf16>
    %6 = vector.shape_cast %5 : vector<16x16x4xbf16> to vector<256x4xbf16>
    %c0_2 = arith.constant 0 : index
    %c0_3 = arith.constant 0 : index
    %c0_4 = arith.constant 0 : index
    %7 = vector.load %arg3[%c0_2, %c0_3, %c0_4] : memref<9x4x256xbf16, #tpu.memory_space<vmem>>, vector<1x4x256xbf16>
    %8 = vector.shape_cast %7 : vector<1x4x256xbf16> to vector<4x256xbf16>
    %cst = arith.constant dense<0.000000e+00> : vector<256x256xf32>
    %9 = tpu.matmul %6, %8, %cst {dimension_numbers = #tpu.dot_dimension_numbers<[1], [0], [0], [1], [0, 0, 1, 1], [], []>} : vector<256x4xbf16>, vector<4x256xbf16>, vector<256x256xf32> -> vector<256x256xf32>
    %c0_i32_5 = arith.constant 0 : i32
    %10 = arith.addi %1, %c0_i32_5 : i32
    %c0_6 = arith.constant 0 : index
    %11 = arith.index_cast %10 : i32 to index
    %c1 = arith.constant 1 : index
    %c0_7 = arith.constant 0 : index
    %12 = vector.load %arg2[%c0_6, %11, %c1, %c0_7] : memref<1x18x18x4xbf16, #tpu.memory_space<vmem>>, vector<1x16x16x4xbf16>
    %13 = vector.shape_cast %12 : vector<1x16x16x4xbf16> to vector<16x16x4xbf16>
    %14 = vector.shape_cast %13 : vector<16x16x4xbf16> to vector<256x4xbf16>
    %c1_8 = arith.constant 1 : index
    %c0_9 = arith.constant 0 : index
    %c0_10 = arith.constant 0 : index
    %15 = vector.load %arg3[%c1_8, %c0_9, %c0_10] : memref<9x4x256xbf16, #tpu.memory_space<vmem>>, vector<1x4x256xbf16>
    %16 = vector.shape_cast %15 : vector<1x4x256xbf16> to vector<4x256xbf16>
    %cst_11 = arith.constant dense<0.000000e+00> : vector<256x256xf32>
    %17 = tpu.matmul %14, %16, %cst_11 {dimension_numbers = #tpu.dot_dimension_numbers<[1], [0], [0], [1], [0, 0, 1, 1], [], []>} : vector<256x4xbf16>, vector<4x256xbf16>, vector<256x256xf32> -> vector<256x256xf32>
    %18 = arith.addf %9, %17 : vector<256x256xf32>
    %c0_i32_12 = arith.constant 0 : i32
    %19 = arith.addi %1, %c0_i32_12 : i32
    %c0_13 = arith.constant 0 : index
    %20 = arith.index_cast %19 : i32 to index
    %c2 = arith.constant 2 : index
    %c0_14 = arith.constant 0 : index
    %21 = vector.load %arg2[%c0_13, %20, %c2, %c0_14] : memref<1x18x18x4xbf16, #tpu.memory_space<vmem>>, vector<1x16x16x4xbf16>
    %22 = vector.shape_cast %21 : vector<1x16x16x4xbf16> to vector<16x16x4xbf16>
    %23 = vector.shape_cast %22 : vector<16x16x4xbf16> to vector<256x4xbf16>
    %c2_15 = arith.constant 2 : index
    %c0_16 = arith.constant 0 : index
    %c0_17 = arith.constant 0 : index
    %24 = vector.load %arg3[%c2_15, %c0_16, %c0_17] : memref<9x4x256xbf16, #tpu.memory_space<vmem>>, vector<1x4x256xbf16>
    %25 = vector.shape_cast %24 : vector<1x4x256xbf16> to vector<4x256xbf16>
    %cst_18 = arith.constant dense<0.000000e+00> : vector<256x256xf32>
    %26 = tpu.matmul %23, %25, %cst_18 {dimension_numbers = #tpu.dot_dimension_numbers<[1], [0], [0], [1], [0, 0, 1, 1], [], []>} : vector<256x4xbf16>, vector<4x256xbf16>, vector<256x256xf32> -> vector<256x256xf32>
    %27 = arith.addf %18, %26 : vector<256x256xf32>
    %c1_i32 = arith.constant 1 : i32
    %28 = arith.addi %1, %c1_i32 : i32
    %c0_19 = arith.constant 0 : index
    %29 = arith.index_cast %28 : i32 to index
    %c0_20 = arith.constant 0 : index
    %c0_21 = arith.constant 0 : index
    %30 = vector.load %arg2[%c0_19, %29, %c0_20, %c0_21] : memref<1x18x18x4xbf16, #tpu.memory_space<vmem>>, vector<1x16x16x4xbf16>
    %31 = vector.shape_cast %30 : vector<1x16x16x4xbf16> to vector<16x16x4xbf16>
    %32 = vector.shape_cast %31 : vector<16x16x4xbf16> to vector<256x4xbf16>
    %c3 = arith.constant 3 : index
    %c0_22 = arith.constant 0 : index
    %c0_23 = arith.constant 0 : index
    %33 = vector.load %arg3[%c3, %c0_22, %c0_23] : memref<9x4x256xbf16, #tpu.memory_space<vmem>>, vector<1x4x256xbf16>
    %34 = vector.shape_cast %33 : vector<1x4x256xbf16> to vector<4x256xbf16>
    %cst_24 = arith.constant dense<0.000000e+00> : vector<256x256xf32>
    %35 = tpu.matmul %32, %34, %cst_24 {dimension_numbers = #tpu.dot_dimension_numbers<[1], [0], [0], [1], [0, 0, 1, 1], [], []>} : vector<256x4xbf16>, vector<4x256xbf16>, vector<256x256xf32> -> vector<256x256xf32>
    %36 = arith.addf %27, %35 : vector<256x256xf32>
    %c1_i32_25 = arith.constant 1 : i32
    %37 = arith.addi %1, %c1_i32_25 : i32
    %c0_26 = arith.constant 0 : index
    %38 = arith.index_cast %37 : i32 to index
    %c1_27 = arith.constant 1 : index
    %c0_28 = arith.constant 0 : index
    %39 = vector.load %arg2[%c0_26, %38, %c1_27, %c0_28] : memref<1x18x18x4xbf16, #tpu.memory_space<vmem>>, vector<1x16x16x4xbf16>
    %40 = vector.shape_cast %39 : vector<1x16x16x4xbf16> to vector<16x16x4xbf16>
    %41 = vector.shape_cast %40 : vector<16x16x4xbf16> to vector<256x4xbf16>
    %c4 = arith.constant 4 : index
    %c0_29 = arith.constant 0 : index
    %c0_30 = arith.constant 0 : index
    %42 = vector.load %arg3[%c4, %c0_29, %c0_30] : memref<9x4x256xbf16, #tpu.memory_space<vmem>>, vector<1x4x256xbf16>
    %43 = vector.shape_cast %42 : vector<1x4x256xbf16> to vector<4x256xbf16>
    %cst_31 = arith.constant dense<0.000000e+00> : vector<256x256xf32>
    %44 = tpu.matmul %41, %43, %cst_31 {dimension_numbers = #tpu.dot_dimension_numbers<[1], [0], [0], [1], [0, 0, 1, 1], [], []>} : vector<256x4xbf16>, vector<4x256xbf16>, vector<256x256xf32> -> vector<256x256xf32>
    %45 = arith.addf %36, %44 : vector<256x256xf32>
    %c1_i32_32 = arith.constant 1 : i32
    %46 = arith.addi %1, %c1_i32_32 : i32
    %c0_33 = arith.constant 0 : index
    %47 = arith.index_cast %46 : i32 to index
    %c2_34 = arith.constant 2 : index
    %c0_35 = arith.constant 0 : index
    %48 = vector.load %arg2[%c0_33, %47, %c2_34, %c0_35] : memref<1x18x18x4xbf16, #tpu.memory_space<vmem>>, vector<1x16x16x4xbf16>
    %49 = vector.shape_cast %48 : vector<1x16x16x4xbf16> to vector<16x16x4xbf16>
    %50 = vector.shape_cast %49 : vector<16x16x4xbf16> to vector<256x4xbf16>
    %c5 = arith.constant 5 : index
    %c0_36 = arith.constant 0 : index
    %c0_37 = arith.constant 0 : index
    %51 = vector.load %arg3[%c5, %c0_36, %c0_37] : memref<9x4x256xbf16, #tpu.memory_space<vmem>>, vector<1x4x256xbf16>
    %52 = vector.shape_cast %51 : vector<1x4x256xbf16> to vector<4x256xbf16>
    %cst_38 = arith.constant dense<0.000000e+00> : vector<256x256xf32>
    %53 = tpu.matmul %50, %52, %cst_38 {dimension_numbers = #tpu.dot_dimension_numbers<[1], [0], [0], [1], [0, 0, 1, 1], [], []>} : vector<256x4xbf16>, vector<4x256xbf16>, vector<256x256xf32> -> vector<256x256xf32>
    %54 = arith.addf %45, %53 : vector<256x256xf32>
    %c2_i32 = arith.constant 2 : i32
    %55 = arith.addi %1, %c2_i32 : i32
    %c0_39 = arith.constant 0 : index
    %56 = arith.index_cast %55 : i32 to index
    %c0_40 = arith.constant 0 : index
    %c0_41 = arith.constant 0 : index
    %57 = vector.load %arg2[%c0_39, %56, %c0_40, %c0_41] : memref<1x18x18x4xbf16, #tpu.memory_space<vmem>>, vector<1x16x16x4xbf16>
    %58 = vector.shape_cast %57 : vector<1x16x16x4xbf16> to vector<16x16x4xbf16>
    %59 = vector.shape_cast %58 : vector<16x16x4xbf16> to vector<256x4xbf16>
    %c6 = arith.constant 6 : index
    %c0_42 = arith.constant 0 : index
    %c0_43 = arith.constant 0 : index
    %60 = vector.load %arg3[%c6, %c0_42, %c0_43] : memref<9x4x256xbf16, #tpu.memory_space<vmem>>, vector<1x4x256xbf16>
    %61 = vector.shape_cast %60 : vector<1x4x256xbf16> to vector<4x256xbf16>
    %cst_44 = arith.constant dense<0.000000e+00> : vector<256x256xf32>
    %62 = tpu.matmul %59, %61, %cst_44 {dimension_numbers = #tpu.dot_dimension_numbers<[1], [0], [0], [1], [0, 0, 1, 1], [], []>} : vector<256x4xbf16>, vector<4x256xbf16>, vector<256x256xf32> -> vector<256x256xf32>
    %63 = arith.addf %54, %62 : vector<256x256xf32>
    %c2_i32_45 = arith.constant 2 : i32
    %64 = arith.addi %1, %c2_i32_45 : i32
    %c0_46 = arith.constant 0 : index
    %65 = arith.index_cast %64 : i32 to index
    %c1_47 = arith.constant 1 : index
    %c0_48 = arith.constant 0 : index
    %66 = vector.load %arg2[%c0_46, %65, %c1_47, %c0_48] : memref<1x18x18x4xbf16, #tpu.memory_space<vmem>>, vector<1x16x16x4xbf16>
    %67 = vector.shape_cast %66 : vector<1x16x16x4xbf16> to vector<16x16x4xbf16>
    %68 = vector.shape_cast %67 : vector<16x16x4xbf16> to vector<256x4xbf16>
    %c7 = arith.constant 7 : index
    %c0_49 = arith.constant 0 : index
    %c0_50 = arith.constant 0 : index
    %69 = vector.load %arg3[%c7, %c0_49, %c0_50] : memref<9x4x256xbf16, #tpu.memory_space<vmem>>, vector<1x4x256xbf16>
    %70 = vector.shape_cast %69 : vector<1x4x256xbf16> to vector<4x256xbf16>
    %cst_51 = arith.constant dense<0.000000e+00> : vector<256x256xf32>
    %71 = tpu.matmul %68, %70, %cst_51 {dimension_numbers = #tpu.dot_dimension_numbers<[1], [0], [0], [1], [0, 0, 1, 1], [], []>} : vector<256x4xbf16>, vector<4x256xbf16>, vector<256x256xf32> -> vector<256x256xf32>
    %72 = arith.addf %63, %71 : vector<256x256xf32>
    %c2_i32_52 = arith.constant 2 : i32
    %73 = arith.addi %1, %c2_i32_52 : i32
    %c0_53 = arith.constant 0 : index
    %74 = arith.index_cast %73 : i32 to index
    %c2_54 = arith.constant 2 : index
    %c0_55 = arith.constant 0 : index
    %75 = vector.load %arg2[%c0_53, %74, %c2_54, %c0_55] : memref<1x18x18x4xbf16, #tpu.memory_space<vmem>>, vector<1x16x16x4xbf16>
    %76 = vector.shape_cast %75 : vector<1x16x16x4xbf16> to vector<16x16x4xbf16>
    %77 = vector.shape_cast %76 : vector<16x16x4xbf16> to vector<256x4xbf16>
    %c8 = arith.constant 8 : index
    %c0_56 = arith.constant 0 : index
    %c0_57 = arith.constant 0 : index
    %78 = vector.load %arg3[%c8, %c0_56, %c0_57] : memref<9x4x256xbf16, #tpu.memory_space<vmem>>, vector<1x4x256xbf16>
    %79 = vector.shape_cast %78 : vector<1x4x256xbf16> to vector<4x256xbf16>
    %cst_58 = arith.constant dense<0.000000e+00> : vector<256x256xf32>
    %80 = tpu.matmul %77, %79, %cst_58 {dimension_numbers = #tpu.dot_dimension_numbers<[1], [0], [0], [1], [0, 0, 1, 1], [], []>} : vector<256x4xbf16>, vector<4x256xbf16>, vector<256x256xf32> -> vector<256x256xf32>
    %81 = arith.addf %72, %80 : vector<256x256xf32>
    %c0_59 = arith.constant 0 : index
    %c0_60 = arith.constant 0 : index
    %82 = vector.load %arg4[%c0_59, %c0_60] : memref<1x256xf32, #tpu.memory_space<vmem>>, vector<1x256xf32>
    %83 = vector.broadcast %82 : vector<1x256xf32> to vector<256x256xf32>
    %84 = arith.addf %81, %83 : vector<256x256xf32>
    %85 = vector.extract_strided_slice %84 {offsets = [0, 0], sizes = [256, 128], strides = [1, 1]} : vector<256x256xf32> to vector<256x128xf32>
    %86 = vector.extract_strided_slice %84 {offsets = [0, 128], sizes = [256, 128], strides = [1, 1]} : vector<256x256xf32> to vector<256x128xf32>
    %87 = arith.maximumf %85, %86 : vector<256x128xf32>
    %88 = vector.extract_strided_slice %87 {offsets = [0, 0], sizes = [256, 4], strides = [1, 1]} : vector<256x128xf32> to vector<256x4xf32>
    %89 = vector.shape_cast %88 : vector<256x4xf32> to vector<16x16x4xf32>
    %90 = arith.truncf %89 : vector<16x16x4xf32> to vector<16x16x4xbf16>
    %c0_61 = arith.constant 0 : index
    %c0_62 = arith.constant 0 : index
    %c0_63 = arith.constant 0 : index
    %c0_64 = arith.constant 0 : index
    %91 = vector.load %arg5[%c0_61, %c0_62, %c0_63, %c0_64] : memref<1x16x16x4xbf16, #tpu.memory_space<vmem>>, vector<1x16x16x4xbf16>
    %92 = vector.shape_cast %91 : vector<1x16x16x4xbf16> to vector<16x16x4xbf16>
    %93 = vector.shape_cast %90 : vector<16x16x4xbf16> to vector<1x16x16x4xbf16>
    tpu.vector_store %arg5[%c0_61, %c0_62, %c0_63, %c0_64], %93 {strides = array<i32>} : memref<1x16x16x4xbf16, #tpu.memory_space<vmem>>, vector<1x16x16x4xbf16>,
    return
  }
  func.func @transform_0(%arg0: i32, %arg1: i32) -> (i32, i32, i32, i32) {
    %c0_i32 = arith.constant 0 : i32
    %c0_i32_0 = arith.constant 0 : i32
    %c0_i32_1 = arith.constant 0 : i32
    %c0_i32_2 = arith.constant 0 : i32
    return %arg0, %c0_i32, %c0_i32_0, %c0_i32_1 : i32, i32, i32, i32
  }
  func.func @transform_1(%arg0: i32, %arg1: i32) -> (i32, i32, i32) {
    %c0_i32 = arith.constant 0 : i32
    %c0_i32_0 = arith.constant 0 : i32
    %c0_i32_1 = arith.constant 0 : i32
    %c0_i32_2 = arith.constant 0 : i32
    return %c0_i32, %c0_i32_0, %c0_i32_1 : i32, i32, i32
  }
  func.func @transform_2(%arg0: i32, %arg1: i32) -> (i32, i32) {
    %c0_i32 = arith.constant 0 : i32
    %c0_i32_0 = arith.constant 0 : i32
    %c0_i32_1 = arith.constant 0 : i32
    return %c0_i32, %c0_i32_0 : i32, i32
  }
  func.func @transform_3(%arg0: i32, %arg1: i32) -> (i32, i32, i32, i32) {
    %c0_i32 = arith.constant 0 : i32
    %c0_i32_0 = arith.constant 0 : i32
    %c0_i32_1 = arith.constant 0 : i32
    return %arg0, %arg1, %c0_i32, %c0_i32_0 : i32, i32, i32, i32
  }
}

</mosaic_0001>

<bundles_post_ra>
// kernel: mfm_conv.1
= control target key start
LH: loop header
LB: loop body
LE: loop exit
PB: predicated region body
PF: predicated region fallthrough
CT: control target
= control target key end

     0   :  { %s7206_s12 = smov 0   ;;  %s7208_s13 = smov 0   ;;  %s8714_s0 = inlined_call_operand.vmem [shape: bf16[2,18,18,4], index: 0, kind: input, shape index: {}]   ;;  %s8715_s1 = inlined_call_operand.vmem [shape: bf16[9,4,256], index: 1, kind: input, shape index: {}]   ;;  %s8716_s2 = inlined_call_operand.vmem [shape: f32[1,256], index: 2, kind: input, shape index: {}]   ;;  %s8717_s3 = inlined_call_operand.vmem [shape: bf16[2,16,16,4], index: 3, kind: output, shape index: {}]  }
   0x1   :  { %s7210_s14 = smov 0  }
   0x2 LB: > { %s25_s15 = sadd.s32 1, %s7179_s13  ;;  %p5868_p0 = scmp.ge.s32.totalorder %s7183_s14, 1  ;;  %s7183_s14 = sphi %s7210_s14, %s13_s14   ;;  %s7179_s13 = sphi %s7208_s13, %s8723_s13   ;;  %s7175_s12 = sphi %s7206_s12, %s8722_s12  }
   0x3   : > { %p27_p1 = scmp.ge.s32.totalorder %s25_s15, 2  ;;  %p151_p2 = scmp.lt.s32.totalorder %s7183_s14, 3 }
   0x5   : > { %s8725_s15 = smov (%p27_p1, %s25_s15), 0  ;;  %p152_p3 = pnand %p5868_p0, %p151_p2 }
   0x6   : > { %v5889_v0 = vld.sshfl [vmem:[%s8715_s1 + $0x4] sm:$0x33 pattern:$0x76325410] (!%p152_p3)  ;;  %vm745_vm0 = vcmask (!%p152_p3), 1041408   ;;  %v7185_v4 = vmov (!%p152_p3), 0  }
   0x7   : > { %155 = sbr.rel (%p152_p3) target bundleno = 829 (0x33d), region = 32  ;;  %v695_v1 = vcombine.high (!%p152_p3), %v5889_v0, %v5889_v0  ;;  %v6124_v2 = vld.sshfl [vmem:[%s8715_s1 + $0x10] sm:$0x33 pattern:$0x76325410] (!%p152_p3)  ;;  %v747_v3 = vsel (!%p152_p3), %vm745_vm0, %v5889_v0, 0  ;;  %784 = vmatprep.mubr.bf16.mxu1 (!%p152_p3), %v7185_v4  ;;  %2877 = vmatprep.mubr.bf16.mxu0 (!%p152_p3), %v7185_v4 }
   0x8   : > { %p180_p4 = scmp.lt.s32.totalorder (!%p152_p3), %s7175_s12, 1  ;;  %v7233_v5 = vcombine.high (!%p152_p3), %v6124_v2, %v6124_v2  ;;  %v7236_v6 = vsel (!%p152_p3), %vm745_vm0, %v6124_v2, 0  ;;  %v5923_v7 = vld.sshfl [vmem:[%s8715_s1] sm:$0x33 pattern:$0x76325410] (!%p152_p3) }
   0x9   : > { %5890 = vmatprep.subr.msk.bf16.mxu1 (!%p152_p3), %vm745_vm0, %v695_v1  ;;  %v1033_v8 = vcombine.high (!%p152_p3), %v5923_v7, %v5923_v7  ;;  %v6223_v9 = vld.sshfl [vmem:[%s8715_s1 + $0x14] sm:$0x33 pattern:$0x76325410] (!%p152_p3)  ;;  %v7254_v11 = vsel (!%p152_p3), %vm745_vm0, %v5923_v7, 0  ;;  %vm696_vm3 = vcmask (!%p152_p3), 31744  }
   0xa   : > { %6125 = vmatprep.subr.msk.bf16.mxu0 (!%p152_p3), %vm745_vm0, %v7233_v5  ;;  %753 = vmatpush1.bf16.msra.mxu1 (!%p152_p3), %v747_v3  ;;  %v3368_v10 = vcombine.high (!%p152_p3), %v6223_v9, %v6223_v9  ;;  %v7259_v12 = vld.sshfl [vmem:[%s8715_s1 + $0x18] sm:$0x33 pattern:$0x76325410] (!%p152_p3)  ;;  %vm250_vm1 = vsmask.f32 (!%p152_p3), 3328 }
   0xb   : > { %2846 = vmatpush1.bf16.msra.mxu0 (!%p152_p3), %v7236_v6  ;;  %5924 = vmatprep.subr.msk.bf16.mxu1 (!%p152_p3), %vm745_vm0, %v1033_v8  ;;  %vm251_vm2 = vsmask.f32 (!%p152_p3), 7440  ;;  %v7267_v13 = vsel (!%p152_p3), %vm745_vm0, %v6223_v9, 0  ;;  %v7271_v14 = vsel (!%p152_p3), %vm745_vm0, %v7259_v12, 0  ;;  %v3806_v27 = vcombine.high (!%p152_p3), %v7259_v12, %v7259_v12 }
   0xc   : > { %6224 = vmatprep.subr.msk.bf16.mxu0 (!%p152_p3), %vm745_vm0, %v3368_v10  ;;  %vm7285_vm4 = vmor (!%p152_p3), %vm250_vm1, %vm251_vm2  ;;  %vm1377_vm5 = vcmask (!%p152_p3), 1042432   ;;  %vm1378_vm6 = vcmask (!%p152_p3), 1046532   ;;  %vm5734_vm8 = vcmask (!%p152_p3), 27648  }
   0xd   : > { %vm7444_vm7 = vmor (!%p152_p3), %vm1377_vm5, %vm1378_vm6 }
   0xe   : > { %s8727_s12 = smov (!%p180_p4, %s7175_s12), 1 }
   0xf   : > { %s7071_s24 = smul.u32 216, %s8727_s12  ;;  %s6524_s17 = sshll.u32 %s8727_s12, 7 }
  0x10   : > { %s8555_s20 = scalar_lea.vmem %s8717_s3, %s6524_s17 }
  0x11   : > { %s7264_s29 = scalar_lea.vmem %s8714_s0, %s7071_s24 }
  0x12   : > { %v201_v15 = vld [vmem:[%s7264_s29] sm:$0xf]  ;;  %v202_v16 = vld [vmem:[%s7264_s29 + $0x4] sm:$0xf]  ;;  %v234_v17 = vld [vmem:[%s7264_s29 + $0x8] sm:$0x1] }
  0x13   : > { %v254_v18 = vshrl.u32 %v201_v15, 16  ;;  %v257_v19 = vshll.u32 %v201_v15, 16  ;;  %v263_v20 = vshll.u32 %v202_v16, 16  ;;  %v267_v21 = vshrl.u32 %v202_v16, 16  ;;  %v6059_v22 = vld [vmem:[%s7264_s29 + $0xc] sm:$0xf] }
  0x14   : > { %v273_v23 = vshll.u32 %v234_v17, 16  ;;  %v6060_v24 = vld [vmem:[%s7264_s29 + $0x10] sm:$0xf]  ;;  %v6061_v25 = vld [vmem:[%s7264_s29 + $0x14] sm:$0x1]  ;;  %v2349_v26 = vshrl.u32 %v6059_v22, 16 }
  0x15   : > { %v256_v28 = vrot.slane %v254_v18, 4  ;;  %v259_v29 = vrot.slane %v257_v19, 5  ;;  %v265_v30 = vrot.slane %v263_v20, 5  ;;  %v269_v31 = vrot.slane %v267_v21, 4  ;;  %v203_v32 = vld [vmem:[%s7264_s29 + $0xc] sm:$0xf] }
  0x16   : > { %v275_v33 = vrot.slane %v273_v23, 5  ;;  %v2351_v34 = vrot.slane %v2349_v26, 4  ;;  %v2352_v35 = vshll.u32 %v6059_v22, 16  ;;  %v2358_v36 = vshll.u32 %v6060_v24, 16  ;;  %v204_v41 = vld [vmem:[%s7264_s29 + $0x10] sm:$0xf] }
  0x17   : > { %v260_v37 = vor.u32 %v259_v29, %v256_v28  ;;  %v270_v38 = vor.u32 %v269_v31, %v265_v30  ;;  %v2362_v39 = vshrl.u32 %v6060_v24, 16  ;;  %v2368_v40 = vshll.u32 %v6061_v25, 16  ;;  %v235_v51 = vld [vmem:[%s7264_s29 + $0x14] sm:$0x1]  ;;  %v6062_v56 = vld [vmem:[%s7264_s29 + $0x18] sm:$0xf] }
  0x18   : > { %v2354_v43 = vrot.slane %v2352_v35, 5  ;;  %v2360_v44 = vrot.slane %v2358_v36, 5  ;;  %v278_v45 = vshrl.u32 %v203_v32, 16  ;;  %v281_v46 = vshll.u32 %v203_v32, 16  ;;  %v6063_v61 = vld [vmem:[%s7264_s29 + $0x1c] sm:$0xf] }
  0x19   : > { %v261_v47 = vrot.slane %v260_v37, 4  ;;  %v271_v48 = vrot.slane %v270_v38, 4  ;;  %v2364_v49 = vrot.slane %v2362_v39, 4  ;;  %v2370_v50 = vrot.slane %v2368_v40, 5  ;;  %v6064_v8 = vld [vmem:[%s7264_s29 + $0x20] sm:$0x1] }
  0x1a   : > { %v2355_v52 = vor.u32 %v2354_v43, %v2351_v34  ;;  %v280_v53 = vrot.slane %v278_v45, 4  ;;  %v283_v54 = vrot.slane %v281_v46, 5  ;;  %v287_v55 = vshll.u32 %v204_v41, 16  ;;  %v205_v18 = vld [vmem:[%s7264_s29 + $0x18] sm:$0xf] }
  0x1b   : > { %v266_v57 = vsel %vm7285_vm4, %v261_v47, %v265_v30  ;;  %v276_v58 = vsel %vm7285_vm4, %v271_v48, %v275_v33  ;;  %v2365_v59 = vor.u32 %v2364_v49, %v2360_v44  ;;  %v291_v60 = vshrl.u32 %v204_v41, 16  ;;  %v206_v23 = vld [vmem:[%s7264_s29 + $0x1c] sm:$0xf]  ;;  %v236_v31 = vld [vmem:[%s7264_s29 + $0x20] sm:$0x1] }
  0x1c   : > { %v5873_v62 = vcombine.low %v266_v57, %v276_v58  ;;  %v2356_v63 = vrot.slane %v2355_v52, 4  ;;  %v284_v0 = vor.u32 %v283_v54, %v280_v53  ;;  %v289_v1 = vrot.slane %v287_v55, 5  ;;  %v6065_v37 = vld [vmem:[%s7264_s29 + $0x24] sm:$0xf]  ;;  %v6066_v43 = vld [vmem:[%s7264_s29 + $0x28] sm:$0xf] }
  0x1d   : > { %v2366_v2 = vrot.slane %v2365_v59, 4  ;;  %v293_v3 = vrot.slane %v291_v60, 4  ;;  %v297_v7 = vshll.u32 %v235_v51, 16  ;;  %v2373_v9 = vshrl.u32 %v6062_v56, 16  ;;  %v6067_v53 = vld [vmem:[%s7264_s29 + $0x2c] sm:$0x1] }
  0x1e   : > { %5891 = vmatmul.mubr.msk.bf16.vlgmr.msra.gmra.mrb[0].mxu1 %vm696_vm3, %v5873_v62  ;;  %v2361_v10 = vsel %vm7285_vm4, %v2356_v63, %v2360_v44  ;;  %v285_v15 = vrot.slane %v284_v0, 4  ;;  %v2376_v16 = vshll.u32 %v6062_v56, 16  ;;  %v2382_v17 = vshll.u32 %v6063_v61, 16  ;;  %v207_v56 = vld [vmem:[%s7264_s29 + $0x24] sm:$0xf] }
  0x1f   : > { %1089 = vmatpush1.bf16.msra.mxu1 %v7254_v11  ;;  %v2371_v19 = vsel %vm7285_vm4, %v2366_v2, %v2370_v50  ;;  %794 = vmatprep.mubr.bf16.mxu1 %v7185_v4  ;;  %v294_v20 = vor.u32 %v293_v3, %v289_v1  ;;  %v299_v21 = vrot.slane %v297_v7, 5  ;;  %v2375_v22 = vrot.slane %v2373_v9, 4  ;;  %v208_v2 = vld [vmem:[%s7264_s29 + $0x28] sm:$0xf] }
  0x20   : > { %v6108_v24 = vcombine.low %v2361_v10, %v2371_v19  ;;  %v290_v25 = vsel %vm7285_vm4, %v285_v15, %v289_v1  ;;  %v2378_v26 = vrot.slane %v2376_v16, 5  ;;  %v2384_v28 = vrot.slane %v2382_v17, 5  ;;  %v237_v15 = vld [vmem:[%s7264_s29 + $0x2c] sm:$0x1]  ;;  %v6068_v16 = vld [vmem:[%s7264_s29 + $0x30] sm:$0xf] }
  0x21   : > { %v295_v29 = vrot.slane %v294_v20, 4  ;;  %v2386_v30 = vshrl.u32 %v6063_v61, 16  ;;  %v2392_v11 = vshll.u32 %v6064_v8, 16  ;;  %v302_v32 = vshrl.u32 %v205_v18, 16 }
  0x22   : > { %6126 = vmatmul.mubr.msk.bf16.vlgmr.msra.gmra.mrb[0].mxu0 %vm696_vm3, %v6108_v24  ;;  %v2379_v33 = vor.u32 %v2378_v26, %v2375_v22  ;;  %v305_v34 = vshll.u32 %v205_v18, 16  ;;  %v311_v35 = vshll.u32 %v206_v23, 16  ;;  %v315_v36 = vshrl.u32 %v206_v23, 16 }
  0x23   : > { %3424 = vmatpush1.bf16.msra.mxu0 %v7267_v13  ;;  %2887 = vmatprep.mubr.bf16.mxu0 %v7185_v4  ;;  %v300_v38 = vsel %vm7285_vm4, %v295_v29, %v299_v21  ;;  %v2388_v39 = vrot.slane %v2386_v30, 4  ;;  %v2394_v40 = vrot.slane %v2392_v11, 5  ;;  %v304_v41 = vrot.slane %v302_v32, 4  ;;  %v6069_v29 = vld [vmem:[%s7264_s29 + $0x34] sm:$0xf] }
  0x24   : > { %v5874_v44 = vcombine.low %v290_v25, %v300_v38  ;;  %v2380_v45 = vrot.slane %v2379_v33, 4  ;;  %v307_v46 = vrot.slane %v305_v34, 5  ;;  %v313_v47 = vrot.slane %v311_v35, 5  ;;  %6291 = vmatprep.subr.msk.bf16.mxu0 %vm745_vm0, %v3806_v27  ;;  %v6070_v33 = vld [vmem:[%s7264_s29 + $0x38] sm:$0x1] }
  0x25   : > { %v2389_v13 = vor.u32 %v2388_v39, %v2384_v28  ;;  %v317_v48 = vrot.slane %v315_v36, 4  ;;  %v321_v49 = vshll.u32 %v236_v31, 16  ;;  %v2397_v50 = vshrl.u32 %v6065_v37, 16  ;;  %v209_v39 = vld [vmem:[%s7264_s29 + $0x30] sm:$0xf] }
  0x26   : > { %5892 = vmatmul.mubr.msk.bf16.gmra.mrb[4].mxu1 %vm696_vm3, %v5874_v44  ;;  %v2385_v51 = vsel %vm7285_vm4, %v2380_v45, %v2384_v28  ;;  %v308_v52 = vor.u32 %v307_v46, %v304_v41  ;;  %v2400_v54 = vshll.u32 %v6065_v37, 16  ;;  %v2406_v55 = vshll.u32 %v6066_v43, 16 }
  0x27   : > { %v2390_v57 = vrot.slane %v2389_v13, 4  ;;  %804 = vmatprep.mubr.bf16.mxu1 %v7185_v4  ;;  %v318_v12 = vor.u32 %v317_v48, %v313_v47  ;;  %v323_v27 = vrot.slane %v321_v49, 5  ;;  %v2399_v58 = vrot.slane %v2397_v50, 4  ;;  %v210_v48 = vld [vmem:[%s7264_s29 + $0x34] sm:$0xf] }
  0x28   : > { %v309_v59 = vrot.slane %v308_v52, 4  ;;  %v2402_v60 = vrot.slane %v2400_v54, 5  ;;  %v2408_v61 = vrot.slane %v2406_v55, 5  ;;  %v2410_v62 = vshrl.u32 %v6066_v43, 16  ;;  %v238_v52 = vld [vmem:[%s7264_s29 + $0x38] sm:$0x1] }
  0x29   : > { %v2395_v63 = vsel %vm7285_vm4, %v2390_v57, %v2394_v40  ;;  %v319_v0 = vrot.slane %v318_v12, 4  ;;  %v2416_v1 = vshll.u32 %v6067_v53, 16  ;;  %v326_v3 = vshrl.u32 %v207_v56, 16 }
  0x2a   : > { %v6109_v7 = vcombine.low %v2385_v51, %v2395_v63  ;;  %v314_v8 = vsel %vm7285_vm4, %v309_v59, %v313_v47  ;;  %v2403_v9 = vor.u32 %v2402_v60, %v2399_v58  ;;  %v2412_v10 = vrot.slane %v2410_v62, 4  ;;  %v6071_v60 = vld [vmem:[%s7264_s29 + $0x3c] sm:$0xf] }
  0x2b   : > { %v324_v17 = vsel %vm7285_vm4, %v319_v0, %v323_v27  ;;  %v2418_v18 = vrot.slane %v2416_v1, 5  ;;  %v328_v19 = vrot.slane %v326_v3, 4  ;;  %v329_v20 = vshll.u32 %v207_v56, 16  ;;  %v6072_v1 = vld [vmem:[%s7264_s29 + $0x40] sm:$0xf] }
  0x2c   : > { %6127 = vmatmul.mubr.msk.bf16.gmra.mrb[4].mxu0 %vm696_vm3, %v6109_v7  ;;  %v5875_v21 = vcombine.low %v314_v8, %v324_v17  ;;  %v2404_v22 = vrot.slane %v2403_v9, 4  ;;  %v2413_v23 = vor.u32 %v2412_v10, %v2408_v61  ;;  %v335_v24 = vshll.u32 %v208_v2, 16 }
  0x2d   : > { %2897 = vmatprep.mubr.bf16.mxu0 %v7185_v4  ;;  %v331_v25 = vrot.slane %v329_v20, 5  ;;  %v339_v26 = vshrl.u32 %v208_v2, 16  ;;  %v345_v28 = vshll.u32 %v237_v15, 16  ;;  %v2421_v30 = vshrl.u32 %v6068_v16, 16 }
  0x2e   : > { %5893 = vmatmul.mubr.msk.bf16.gmra.mrb[8].mxu1 %vm696_vm3, %v5875_v21  ;;  %v2409_v11 = vsel %vm7285_vm4, %v2404_v22, %v2408_v61  ;;  %v2414_v31 = vrot.slane %v2413_v23, 4  ;;  %v337_v32 = vrot.slane %v335_v24, 5  ;;  %v2424_v34 = vshll.u32 %v6068_v16, 16  ;;  %v6073_v16 = vld [vmem:[%s7264_s29 + $0x44] sm:$0x1] }
  0x2f   : > { %814 = vmatprep.mubr.bf16.mxu1 %v7185_v4  ;;  %v332_v35 = vor.u32 %v331_v25, %v328_v19  ;;  %v341_v36 = vrot.slane %v339_v26, 4  ;;  %v347_v37 = vrot.slane %v345_v28, 5  ;;  %v2423_v38 = vrot.slane %v2421_v30, 4  ;;  %v211_v22 = vld [vmem:[%s7264_s29 + $0x3c] sm:$0xf] }
  0x30   : > { %v2419_v40 = vsel %vm7285_vm4, %v2414_v31, %v2418_v18  ;;  %v2426_v41 = vrot.slane %v2424_v34, 5  ;;  %v2430_v43 = vshll.u32 %v6069_v29, 16  ;;  %v2434_v44 = vshrl.u32 %v6069_v29, 16  ;;  %v212_v28 = vld [vmem:[%s7264_s29 + $0x40] sm:$0xf] }
  0x31   : > { %v6110_v45 = vcombine.low %v2409_v11, %v2419_v40  ;;  %v333_v46 = vrot.slane %v332_v35, 4  ;;  %v342_v47 = vor.u32 %v341_v36, %v337_v32  ;;  %v2440_v13 = vshll.u32 %v6070_v33, 16 }
  0x32   : > { %v2427_v49 = vor.u32 %v2426_v41, %v2423_v38  ;;  %v2432_v50 = vrot.slane %v2430_v43, 5  ;;  %v2436_v51 = vrot.slane %v2434_v44, 4  ;;  %v350_v53 = vshrl.u32 %v209_v39, 16  ;;  %v6074_v41 = vld [vmem:[%s7264_s29 + $0x48] sm:$0xf] }
  0x33   : > { %v338_v54 = vsel %vm7285_vm4, %v333_v46, %v337_v32  ;;  %v343_v55 = vrot.slane %v342_v47, 4  ;;  %v2442_v56 = vrot.slane %v2440_v13, 5  ;;  %v353_v57 = vshll.u32 %v209_v39, 16  ;;  %v239_v39 = vld [vmem:[%s7264_s29 + $0x44] sm:$0x1] }
  0x34   : > { %6128 = vmatmul.mubr.msk.bf16.gmra.mrb[8].mxu0 %vm696_vm3, %v6110_v45  ;;  %v2428_v12 = vrot.slane %v2427_v49, 4  ;;  %v2437_v27 = vor.u32 %v2436_v51, %v2432_v50  ;;  %v352_v58 = vrot.slane %v350_v53, 4  ;;  %v359_v59 = vshll.u32 %v210_v48, 16  ;;  %v6075_v47 = vld [vmem:[%s7264_s29 + $0x4c] sm:$0xf] }
  0x35   : > { %2907 = vmatprep.mubr.bf16.mxu0 %v7185_v4  ;;  %v348_v61 = vsel %vm7285_vm4, %v343_v55, %v347_v37  ;;  %v355_v62 = vrot.slane %v353_v57, 5  ;;  %v363_v63 = vshrl.u32 %v210_v48, 16  ;;  %v369_v0 = vshll.u32 %v238_v52, 16  ;;  %v6076_v57 = vld [vmem:[%s7264_s29 + $0x50] sm:$0x1] }
  0x36   : > { %v5876_v2 = vcombine.low %v338_v54, %v348_v61  ;;  %v2433_v3 = vsel %vm7285_vm4, %v2428_v12, %v2432_v50  ;;  %v2438_v7 = vrot.slane %v2437_v27, 4  ;;  %v361_v8 = vrot.slane %v359_v59, 5 }
  0x37   : > { %v356_v9 = vor.u32 %v355_v62, %v352_v58  ;;  %v365_v10 = vrot.slane %v363_v63, 4  ;;  %v371_v15 = vrot.slane %v369_v0, 5  ;;  %v2445_v17 = vshrl.u32 %v6071_v60, 16  ;;  %v213_v58 = vld [vmem:[%s7264_s29 + $0x48] sm:$0xf] }
  0x38   : > { %5894 = vmatmul.mubr.msk.bf16.gmra.mrb[12].mxu1 %vm696_vm3, %v5876_v2  ;;  %v2443_v18 = vsel %vm7285_vm4, %v2438_v7, %v2442_v56  ;;  %v2448_v19 = vshll.u32 %v6071_v60, 16  ;;  %v2454_v20 = vshll.u32 %v6072_v1, 16  ;;  %v2458_v21 = vshrl.u32 %v6072_v1, 16  ;;  %v214_v63 = vld [vmem:[%s7264_s29 + $0x4c] sm:$0xf] }
  0x39   : > { %v6111_v23 = vcombine.low %v2433_v3, %v2443_v18  ;;  %824 = vmatprep.mubr.bf16.mxu1 %v7185_v4  ;;  %v357_v24 = vrot.slane %v356_v9, 4  ;;  %v366_v25 = vor.u32 %v365_v10, %v361_v8  ;;  %v2447_v26 = vrot.slane %v2445_v17, 4  ;;  %v240_v10 = vld [vmem:[%s7264_s29 + $0x50] sm:$0x1] }
  0x3a   : > { %v2450_v29 = vrot.slane %v2448_v19, 5  ;;  %v2456_v30 = vrot.slane %v2454_v20, 5  ;;  %v2460_v11 = vrot.slane %v2458_v21, 4  ;;  %v2464_v31 = vshll.u32 %v6073_v16, 16  ;;  %v6077_v20 = vld [vmem:[%s7264_s29 + $0x54] sm:$0xf] }
  0x3b   : > { %v362_v32 = vsel %vm7285_vm4, %v357_v24, %v361_v8  ;;  %v367_v33 = vrot.slane %v366_v25, 4  ;;  %v374_v34 = vshrl.u32 %v211_v22, 16  ;;  %v377_v35 = vshll.u32 %v211_v22, 16 }
  0x3c   : > { %6129 = vmatmul.mubr.msk.bf16.gmra.mrb[12].mxu0 %vm696_vm3, %v6111_v23  ;;  %v2451_v36 = vor.u32 %v2450_v29, %v2447_v26  ;;  %v2461_v37 = vor.u32 %v2460_v11, %v2456_v30  ;;  %v2466_v38 = vrot.slane %v2464_v31, 5  ;;  %v383_v40 = vshll.u32 %v212_v28, 16 }
  0x3d   : > { %2917 = vmatprep.mubr.bf16.mxu0 %v7185_v4  ;;  %v372_v43 = vsel %vm7285_vm4, %v367_v33, %v371_v15  ;;  %v376_v44 = vrot.slane %v374_v34, 4  ;;  %v379_v45 = vrot.slane %v377_v35, 5  ;;  %v387_v46 = vshrl.u32 %v212_v28, 16 }
  0x3e   : > { %v5877_v13 = vcombine.low %v362_v32, %v372_v43  ;;  %v2452_v48 = vrot.slane %v2451_v36, 4  ;;  %v2462_v49 = vrot.slane %v2461_v37, 4  ;;  %v385_v50 = vrot.slane %v383_v40, 5  ;;  %v6079_v37 = vld [vmem:[%s7264_s29 + $0x5c] sm:$0x1] }
  0x3f   : > { %v380_v51 = vor.u32 %v379_v45, %v376_v44  ;;  %v389_v52 = vrot.slane %v387_v46, 4  ;;  %v393_v53 = vshll.u32 %v239_v39, 16  ;;  %v2469_v54 = vshrl.u32 %v6074_v41, 16  ;;  %v215_v44 = vld [vmem:[%s7264_s29 + $0x54] sm:$0xf] }
  0x40   : > { %5895 = vmatmul.mubr.msk.bf16.gmra.mrb[16].mxu1 %vm696_vm3, %v5877_v13  ;;  %v2457_v55 = vsel %vm7285_vm4, %v2452_v48, %v2456_v30  ;;  %v2467_v56 = vsel %vm7285_vm4, %v2462_v49, %v2466_v38  ;;  %v2472_v12 = vshll.u32 %v6074_v41, 16  ;;  %v2478_v27 = vshll.u32 %v6075_v47, 16  ;;  %v6078_v30 = vld [vmem:[%s7264_s29 + $0x58] sm:$0xf] }
  0x41   : > { %v6112_v59 = vcombine.low %v2457_v55, %v2467_v56  ;;  %834 = vmatprep.mubr.bf16.mxu1 %v7185_v4  ;;  %v381_v60 = vrot.slane %v380_v51, 4  ;;  %v390_v61 = vor.u32 %v389_v52, %v385_v50  ;;  %v395_v62 = vrot.slane %v393_v53, 5  ;;  %v216_v48 = vld [vmem:[%s7264_s29 + $0x58] sm:$0xf]  ;;  %v241_v56 = vld [vmem:[%s7264_s29 + $0x5c] sm:$0x1] }
  0x42   : > { %v2471_v0 = vrot.slane %v2469_v54, 4  ;;  %v2474_v1 = vrot.slane %v2472_v12, 5  ;;  %v2480_v2 = vrot.slane %v2478_v27, 5  ;;  %v2482_v3 = vshrl.u32 %v6075_v47, 16 }
  0x43   : > { %v386_v7 = vsel %vm7285_vm4, %v381_v60, %v385_v50  ;;  %v391_v8 = vrot.slane %v390_v61, 4  ;;  %v2488_v9 = vshll.u32 %v6076_v57, 16  ;;  %v398_v15 = vshrl.u32 %v213_v58, 16  ;;  %v6080_v60 = vld [vmem:[%s7264_s29 + $0x60] sm:$0xf] }
  0x44   : > { %6130 = vmatmul.mubr.msk.bf16.gmra.mrb[16].mxu0 %vm696_vm3, %v6112_v59  ;;  %v2475_v16 = vor.u32 %v2474_v1, %v2471_v0  ;;  %v2484_v17 = vrot.slane %v2482_v3, 4  ;;  %v401_v18 = vshll.u32 %v213_v58, 16  ;;  %v407_v19 = vshll.u32 %v214_v63, 16  ;;  %v6081_v1 = vld [vmem:[%s7264_s29 + $0x64] sm:$0xf] }
  0x45   : > { %2927 = vmatprep.mubr.bf16.mxu0 %v7185_v4  ;;  %v396_v21 = vsel %vm7285_vm4, %v391_v8, %v395_v62  ;;  %v2490_v22 = vrot.slane %v2488_v9, 5  ;;  %v400_v23 = vrot.slane %v398_v15, 4  ;;  %v411_v24 = vshrl.u32 %v214_v63, 16  ;;  %v6082_v15 = vld [vmem:[%s7264_s29 + $0x68] sm:$0x1] }
  0x46   : > { %v5878_v25 = vcombine.low %v386_v7, %v396_v21  ;;  %v2476_v26 = vrot.slane %v2475_v16, 4  ;;  %v2485_v28 = vor.u32 %v2484_v17, %v2480_v2  ;;  %v403_v29 = vrot.slane %v401_v18, 5 }
  0x47   : > { %v409_v11 = vrot.slane %v407_v19, 5  ;;  %v413_v31 = vrot.slane %v411_v24, 4  ;;  %v417_v32 = vshll.u32 %v240_v10, 16  ;;  %v2493_v33 = vshrl.u32 %v6077_v20, 16 }
  0x48   : > { %5896 = vmatmul.mubr.msk.bf16.gmra.mrb[20].mxu1 %vm696_vm3, %v5878_v25  ;;  %v2481_v34 = vsel %vm7285_vm4, %v2476_v26, %v2480_v2  ;;  %v2486_v35 = vrot.slane %v2485_v28, 4  ;;  %v404_v36 = vor.u32 %v403_v29, %v400_v23  ;;  %v2496_v38 = vshll.u32 %v6077_v20, 16  ;;  %v7421_v28 = vld [vmem:[%s7264_s29 + $0x64] sm:$0xf] }
  0x49   : > { %844 = vmatprep.mubr.bf16.mxu1 %v7185_v4  ;;  %v414_v39 = vor.u32 %v413_v31, %v409_v11  ;;  %v419_v40 = vrot.slane %v417_v32, 5  ;;  %v2495_v41 = vrot.slane %v2493_v33, 4  ;;  %v2502_v43 = vshll.u32 %v6078_v30, 16  ;;  %v242_v32 = vld [vmem:[%s7264_s29 + $0x68] sm:$0x1] }
  0x4a   : > { %v2491_v45 = vsel %vm7285_vm4, %v2486_v35, %v2490_v22  ;;  %v405_v46 = vrot.slane %v404_v36, 4  ;;  %v2498_v47 = vrot.slane %v2496_v38, 5  ;;  %v2506_v13 = vshrl.u32 %v6078_v30, 16  ;;  %v7416_v22 = vld [vmem:[%s7264_s29 + $0x60] sm:$0xf] }
  0x4b   : > { %v6113_v49 = vcombine.low %v2481_v34, %v2491_v45  ;;  %v415_v50 = vrot.slane %v414_v39, 4  ;;  %v2504_v51 = vrot.slane %v2502_v43, 5  ;;  %v2512_v52 = vshll.u32 %v6079_v37, 16  ;;  %v6142_v37 = vld [vmem:[%s7264_s29 + $0xc] sm:$0xe] }
  0x4c   : > { %v410_v53 = vsel %vm7285_vm4, %v405_v46, %v409_v11  ;;  %v2499_v54 = vor.u32 %v2498_v47, %v2495_v41  ;;  %v2508_v55 = vrot.slane %v2506_v13, 4  ;;  %v422_v57 = vshrl.u32 %v215_v44, 16  ;;  %v6143_v43 = vld [vmem:[%s7264_s29 + $0x10] sm:$0xf]  ;;  %v6144_v13 = vld [vmem:[%s7264_s29 + $0x14] sm:$0x1] }
  0x4d   : > { %6131 = vmatmul.mubr.msk.bf16.gmra.mrb[20].mxu0 %vm696_vm3, %v6113_v49  ;;  %v420_v12 = vsel %vm7285_vm4, %v415_v50, %v419_v40  ;;  %v2514_v27 = vrot.slane %v2512_v52, 5  ;;  %v425_v58 = vshll.u32 %v215_v44, 16  ;;  %v431_v59 = vshll.u32 %v216_v48, 16  ;;  %v7438_v52 = vld [vmem:[%s7264_s29 + $0x6c] sm:$0xf] }
  0x4e   : > { %2937 = vmatprep.mubr.bf16.mxu0 %v7185_v4  ;;  %v5879_v61 = vcombine.low %v410_v53, %v420_v12  ;;  %v2500_v62 = vrot.slane %v2499_v54, 4  ;;  %v2509_v63 = vor.u32 %v2508_v55, %v2504_v51  ;;  %v424_v0 = vrot.slane %v422_v57, 4 }
  0x4f   : > { %v427_v2 = vrot.slane %v425_v58, 5  ;;  %v433_v3 = vrot.slane %v431_v59, 5  ;;  %v435_v7 = vshrl.u32 %v216_v48, 16  ;;  %v441_v8 = vshll.u32 %v241_v56, 16 }
  0x50   : > { %5897 = vmatmul.mubr.msk.bf16.gmra.mrb[24].mxu1 %vm696_vm3, %v5879_v61  ;;  %v2505_v9 = vsel %vm7285_vm4, %v2500_v62, %v2504_v51  ;;  %v2510_v10 = vrot.slane %v2509_v63, 4  ;;  %v2517_v16 = vshrl.u32 %v6080_v60, 16  ;;  %v2520_v17 = vshll.u32 %v6080_v60, 16  ;;  %v7449_v60 = vld [vmem:[%s7264_s29 + $0x70] sm:$0xf] }
  0x51   : > { %854 = vmatprep.mubr.bf16.mxu1 %v7185_v4  ;;  %v428_v18 = vor.u32 %v427_v2, %v424_v0  ;;  %v437_v19 = vrot.slane %v435_v7, 4  ;;  %v443_v20 = vrot.slane %v441_v8, 5  ;;  %v2526_v21 = vshll.u32 %v6081_v1, 16  ;;  %v243_v0 = vld [vmem:[%s7264_s29 + $0x74] sm:$0x1] }
  0x52   : > { %v2515_v23 = vsel %vm7285_vm4, %v2510_v10, %v2514_v27  ;;  %v2519_v24 = vrot.slane %v2517_v16, 4  ;;  %v2522_v25 = vrot.slane %v2520_v17, 5  ;;  %v2530_v26 = vshrl.u32 %v6081_v1, 16  ;;  %v6146_v10 = vld [vmem:[%s7264_s29 + $0x1c] sm:$0xf] }
  0x53   : > { %v6114_v29 = vcombine.low %v2505_v9, %v2515_v23  ;;  %v429_v30 = vrot.slane %v428_v18, 4  ;;  %v438_v11 = vor.u32 %v437_v19, %v433_v3  ;;  %v2528_v31 = vrot.slane %v2526_v21, 5  ;;  %v6145_v9 = vld [vmem:[%s7264_s29 + $0x18] sm:$0xe]  ;;  %v6147_v19 = vld [vmem:[%s7264_s29 + $0x20] sm:$0x1] }
  0x54   : > { %v2523_v33 = vor.u32 %v2522_v25, %v2519_v24  ;;  %v2532_v34 = vrot.slane %v2530_v26, 4  ;;  %v2536_v35 = vshll.u32 %v6082_v15, 16  ;;  %v446_v36 = vshrl.u32 %v7416_v22, 16  ;;  %v7469_v25 = vld [vmem:[%s7264_s29 + $0x78] sm:$0xf] }
  0x55   : > { %6132 = vmatmul.mubr.msk.bf16.gmra.mrb[24].mxu0 %vm696_vm3, %v6114_v29  ;;  %v434_v38 = vsel %vm7285_vm4, %v429_v30, %v433_v3  ;;  %v439_v39 = vrot.slane %v438_v11, 4  ;;  %v449_v40 = vshll.u32 %v7416_v22, 16  ;;  %v455_v41 = vshll.u32 %v7421_v28, 16 }
  0x56   : > { %2947 = vmatprep.mubr.bf16.mxu0 %v7185_v4  ;;  %v2524_v44 = vrot.slane %v2523_v33, 4  ;;  %v2533_v45 = vor.u32 %v2532_v34, %v2528_v31  ;;  %v2538_v46 = vrot.slane %v2536_v35, 5  ;;  %v448_v47 = vrot.slane %v446_v36, 4 }
  0x57   : > { %v444_v48 = vsel %vm7285_vm4, %v439_v39, %v443_v20  ;;  %v451_v49 = vrot.slane %v449_v40, 5  ;;  %v457_v50 = vrot.slane %v455_v41, 5  ;;  %v459_v51 = vshrl.u32 %v7421_v28, 16  ;;  %v244_v41 = vld [vmem:[%s7264_s29 + $0x80] sm:$0x1] }
  0x58   : > { %v5880_v53 = vcombine.low %v434_v38, %v444_v48  ;;  %v2529_v54 = vsel %vm7285_vm4, %v2524_v44, %v2528_v31  ;;  %v2534_v55 = vrot.slane %v2533_v45, 4  ;;  %v465_v56 = vshll.u32 %v242_v32, 16  ;;  %v7475_v31 = vld [vmem:[%s7264_s29 + $0x7c] sm:$0xf] }
  0x59   : > { %v452_v12 = vor.u32 %v451_v49, %v448_v47  ;;  %v461_v27 = vrot.slane %v459_v51, 4  ;;  %v6190_v58 = vrot.slane %v6142_v37, 9  ;;  %v3200_v59 = vrot.slane %v6143_v43, 5 }
  0x5a   : > { %5898 = vmatmul.mubr.msk.bf16.gmra.mrb[28].mxu1 %vm696_vm3, %v5880_v53  ;;  %v2539_v61 = vsel %vm7285_vm4, %v2534_v55, %v2538_v46  ;;  %v467_v62 = vrot.slane %v465_v56, 5  ;;  %v3203_v63 = vrot.slane %v6144_v13, 5  ;;  %v470_v1 = vshrl.u32 %v7438_v52, 16 }
  0x5b   : > { %v6115_v2 = vcombine.low %v2529_v54, %v2539_v61  ;;  %864 = vmatprep.mubr.bf16.mxu1 %v7185_v4  ;;  %v453_v3 = vrot.slane %v452_v12, 4  ;;  %v462_v7 = vor.u32 %v461_v27, %v457_v50  ;;  %v3201_v8 = vsel %vm7444_vm7, %v6190_v58, %v3200_v59  ;;  %v6149_v54 = vld [vmem:[%s7264_s29 + $0x28] sm:$0xf]  ;;  %v6148_v58 = vld [vmem:[%s7264_s29 + $0x24] sm:$0xe] }
  0x5c   : > { %v3202_v15 = vrot.slane %v3200_v59, 4  ;;  %v472_v16 = vrot.slane %v470_v1, 4  ;;  %v473_v17 = vshll.u32 %v7438_v52, 16  ;;  %v479_v18 = vshll.u32 %v7449_v60, 16  ;;  %v7495_v59 = vld [vmem:[%s7264_s29 + $0x84] sm:$0xf] }
  0x5d   : > { %6133 = vmatmul.mubr.msk.bf16.gmra.mrb[28].mxu0 %vm696_vm3, %v6115_v2  ;;  %v458_v20 = vsel %vm7285_vm4, %v453_v3, %v457_v50  ;;  %v463_v21 = vrot.slane %v462_v7, 4  ;;  %v483_v23 = vshrl.u32 %v7449_v60, 16  ;;  %v489_v24 = vshll.u32 %v243_v0, 16  ;;  %v6150_v0 = vld [vmem:[%s7264_s29 + $0x2c] sm:$0x1] }
  0x5e   : > { %3455 = vmatprep.mubr.bf16.mxu0 %v7185_v4  ;;  %v3204_v26 = vsel %vm7444_vm7, %v3202_v15, %v3203_v63  ;;  %v475_v29 = vrot.slane %v473_v17, 5  ;;  %v481_v30 = vrot.slane %v479_v18, 5  ;;  %v6191_v11 = vrot.slane %v6145_v9, 9  ;;  %v7502_v1 = vld [vmem:[%s7264_s29 + $0x88] sm:$0xf] }
  0x5f   : > { %v468_v32 = vsel %vm7285_vm4, %v463_v21, %v467_v62  ;;  %v6207_v33 = vcombine.low %v3201_v8, %v3204_v26  ;;  %v485_v34 = vrot.slane %v483_v23, 4  ;;  %v491_v35 = vrot.slane %v489_v24, 5  ;;  %v245_v15 = vld [vmem:[%s7264_s29 + $0x8c] sm:$0x1] }
  0x60   : > { %v5881_v36 = vcombine.low %v458_v20, %v468_v32  ;;  %v476_v37 = vor.u32 %v475_v29, %v472_v16  ;;  %v3207_v38 = vrot.slane %v6146_v10, 5  ;;  %v3210_v39 = vrot.slane %v6147_v19, 5  ;;  %v6152_v29 = vld [vmem:[%s7264_s29 + $0x34] sm:$0xf] }
  0x61   : > { %v486_v40 = vor.u32 %v485_v34, %v481_v30  ;;  %v494_v43 = vshrl.u32 %v7469_v25, 16  ;;  %v497_v44 = vshll.u32 %v7469_v25, 16  ;;  %v503_v45 = vshll.u32 %v7475_v31, 16 }
  0x62   : > { %5899 = vmatmul.mubr.msk.bf16.gmra.mrb[32].mxu1 %vm696_vm3, %v5881_v36  ;;  %v477_v46 = vrot.slane %v476_v37, 4  ;;  %v3208_v47 = vsel %vm7444_vm7, %v6191_v11, %v3207_v38  ;;  %v3209_v13 = vrot.slane %v3207_v38, 4  ;;  %v507_v48 = vshrl.u32 %v7475_v31, 16  ;;  %v6151_v36 = vld [vmem:[%s7264_s29 + $0x30] sm:$0xe] }
  0x63   : > { %874 = vmatprep.mubr.bf16.mxu1 %v7185_v4  ;;  %v487_v49 = vrot.slane %v486_v40, 4  ;;  %v496_v50 = vrot.slane %v494_v43, 4  ;;  %v499_v51 = vrot.slane %v497_v44, 5  ;;  %v505_v53 = vrot.slane %v503_v45, 5  ;;  %v7523_v37 = vld [vmem:[%s7264_s29 + $0x94] sm:$0xf] }
  0x64   : > { %v482_v55 = vsel %vm7285_vm4, %v477_v46, %v481_v30  ;;  %v3211_v56 = vsel %vm7444_vm7, %v3209_v13, %v3210_v39  ;;  %v509_v12 = vrot.slane %v507_v48, 4  ;;  %v513_v27 = vshll.u32 %v244_v41, 16  ;;  %v6153_v41 = vld [vmem:[%s7264_s29 + $0x38] sm:$0x1] }
  0x65   : > { %6225 = vmatmul.mubr.msk.bf16.vlgmr.msra.gmra.mrb[0].mxu0 %vm696_vm3, %v6207_v33  ;;  %v492_v61 = vsel %vm7285_vm4, %v487_v49, %v491_v35  ;;  %v6208_v62 = vcombine.low %v3208_v47, %v3211_v56  ;;  %v500_v63 = vor.u32 %v499_v51, %v496_v50  ;;  %v3214_v8 = vrot.slane %v6149_v54, 5  ;;  %v7518_v33 = vld [vmem:[%s7264_s29 + $0x90] sm:$0xf]  ;;  %v246_v44 = vld [vmem:[%s7264_s29 + $0x98] sm:$0x1] }
  0x66   : > { %3862 = vmatpush1.bf16.msra.mxu0 %v7271_v14  ;;  %3465 = vmatprep.mubr.bf16.mxu0 %v7185_v4  ;;  %v5882_v2 = vcombine.low %v482_v55, %v492_v61  ;;  %v510_v3 = vor.u32 %v509_v12, %v505_v53  ;;  %v515_v7 = vrot.slane %v513_v27, 5  ;;  %v6192_v10 = vrot.slane %v6148_v58, 9 }
  0x67   : > { %v501_v9 = vrot.slane %v500_v63, 4  ;;  %v518_v16 = vshrl.u32 %v7495_v59, 16  ;;  %v521_v17 = vshll.u32 %v7495_v59, 16  ;;  %v3216_v19 = vrot.slane %v3214_v8, 4 }
  0x68   : > { %v511_v18 = vrot.slane %v510_v3, 4  ;;  %v3217_v20 = vrot.slane %v6150_v0, 5  ;;  %v527_v14 = vshll.u32 %v7502_v1, 16  ;;  %v531_v26 = vshrl.u32 %v7502_v1, 16  ;;  %v7543_v0 = vld [vmem:[%s7264_s29 + $0xa0] sm:$0xf] }
  0x69   : > { %v506_v21 = vsel %vm7285_vm4, %v501_v9, %v505_v53  ;;  %v520_v23 = vrot.slane %v518_v16, 4  ;;  %v523_v24 = vrot.slane %v521_v17, 5  ;;  %v537_v32 = vshll.u32 %v245_v15, 16  ;;  %v7538_v53 = vld [vmem:[%s7264_s29 + $0x9c] sm:$0xf] }
  0x6a   : > { %5900 = vmatmul.mubr.msk.bf16.gmra.mrb[36].mxu1 %vm696_vm3, %v5882_v2  ;;  %v516_v30 = vsel %vm7285_vm4, %v511_v18, %v515_v7  ;;  %v529_v11 = vrot.slane %v527_v14, 5  ;;  %v533_v35 = vrot.slane %v531_v26, 4  ;;  %v3215_v39 = vsel %vm7444_vm7, %v6192_v10, %v3214_v8  ;;  %v6155_v7 = vld [vmem:[%s7264_s29 + $0x40] sm:$0xf]  ;;  %v6154_v10 = vld [vmem:[%s7264_s29 + $0x3c] sm:$0xe] }
  0x6b   : > { %884 = vmatprep.mubr.bf16.mxu1 %v7185_v4  ;;  %v524_v34 = vor.u32 %v523_v24, %v520_v23  ;;  %v5883_v38 = vcombine.low %v506_v21, %v516_v30  ;;  %v3218_v40 = vsel %vm7444_vm7, %v3216_v19, %v3217_v20  ;;  %v3221_v43 = vrot.slane %v6152_v29, 5  ;;  %v6156_v15 = vld [vmem:[%s7264_s29 + $0x44] sm:$0x1]  ;;  %v7564_v23 = vld [vmem:[%s7264_s29 + $0xa8] sm:$0xf] }
  0x6c   : > { %v534_v45 = vor.u32 %v533_v35, %v529_v11  ;;  %v539_v46 = vrot.slane %v537_v32, 5  ;;  %v542_v47 = vshrl.u32 %v7518_v33, 16  ;;  %v545_v13 = vshll.u32 %v7518_v33, 16  ;;  %v247_v16 = vld [vmem:[%s7264_s29 + $0xa4] sm:$0x1] }
  0x6d   : > { %6226 = vmatmul.mubr.msk.bf16.gmra.mrb[4].mxu0 %vm696_vm3, %v6208_v62  ;;  %v525_v48 = vrot.slane %v524_v34, 4  ;;  %v6193_v49 = vrot.slane %v6151_v36, 9  ;;  %v551_v50 = vshll.u32 %v7523_v37, 16  ;;  %v555_v51 = vshrl.u32 %v7523_v37, 16 }
  0x6e   : > { %3475 = vmatprep.mubr.bf16.mxu0 %v7185_v4  ;;  %v535_v54 = vrot.slane %v534_v45, 4  ;;  %v3224_v55 = vrot.slane %v6153_v41, 5  ;;  %v544_v56 = vrot.slane %v542_v47, 4  ;;  %v547_v12 = vrot.slane %v545_v13, 5 }
  0x6f   : > { %v3223_v27 = vrot.slane %v3221_v43, 4  ;;  %v7540_v58 = vrot.slane %v551_v50, 5  ;;  %v557_v61 = vrot.slane %v555_v51, 4  ;;  %v561_v62 = vshll.u32 %v246_v44, 16 }
  0x70   : > { %v6209_v63 = vcombine.low %v3215_v39, %v3218_v40  ;;  %v530_v2 = vsel %vm7285_vm4, %v525_v48, %v529_v11  ;;  %v548_v3 = vor.u32 %v547_v12, %v544_v56  ;;  %v540_v8 = vsel %vm7285_vm4, %v535_v54, %v539_v46  ;;  %v7569_v11 = vld [vmem:[%s7264_s29 + $0xac] sm:$0xf]  ;;  %v6159_v56 = vld [vmem:[%s7264_s29 + $0x50] sm:$0x1] }
  0x71   : > { %v558_v9 = vor.u32 %v557_v61, %v7540_v58  ;;  %v566_v17 = vshrl.u32 %v7538_v53, 16  ;;  %v569_v18 = vshll.u32 %v7538_v53, 16  ;;  %v3222_v19 = vsel %vm7444_vm7, %v6193_v49, %v3221_v43  ;;  %v6158_v40 = vld [vmem:[%s7264_s29 + $0x4c] sm:$0xf] }
  0x72   : > { %5901 = vmatmul.mubr.msk.bf16.gmra.mrb[40].mxu1 %vm696_vm3, %v5883_v38  ;;  %v3225_v20 = vsel %vm7444_vm7, %v3223_v27, %v3224_v55  ;;  %v563_v14 = vrot.slane %v561_v62, 5  ;;  %v575_v21 = vshll.u32 %v7543_v0, 16  ;;  %v3228_v24 = vrot.slane %v6155_v7, 5  ;;  %v6157_v55 = vld [vmem:[%s7264_s29 + $0x48] sm:$0xe] }
  0x73   : > { %894 = vmatprep.mubr.bf16.mxu1 %v7185_v4  ;;  %v568_v26 = vrot.slane %v566_v17, 4  ;;  %v571_v29 = vrot.slane %v569_v18, 5  ;;  %v579_v30 = vshrl.u32 %v7543_v0, 16  ;;  %v5884_v32 = vcombine.low %v530_v2, %v540_v8 }
  0x74   : > { %v549_v34 = vrot.slane %v548_v3, 4  ;;  %v577_v35 = vrot.slane %v575_v21, 5  ;;  %v6210_v36 = vcombine.low %v3222_v19, %v3225_v20  ;;  %v559_v38 = vrot.slane %v558_v9, 4  ;;  %v7597_v19 = vld [vmem:[%s7264_s29 + $0xb8] sm:$0xf] }
  0x75   : > { %6227 = vmatmul.mubr.msk.bf16.gmra.mrb[8].mxu0 %vm696_vm3, %v6209_v63  ;;  %v581_v39 = vrot.slane %v579_v30, 4  ;;  %v6194_v41 = vrot.slane %v6154_v10, 9  ;;  %v3231_v43 = vrot.slane %v6156_v15, 5  ;;  %v572_v44 = vor.u32 %v571_v29, %v568_v26  ;;  %v248_v63 = vld [vmem:[%s7264_s29 + $0xb0] sm:$0x1] }
  0x76   : > { %3485 = vmatprep.mubr.bf16.mxu0 %v7185_v4  ;;  %v585_v45 = vshll.u32 %v247_v16, 16  ;;  %v3230_v46 = vrot.slane %v3228_v24, 4  ;;  %v590_v13 = vshrl.u32 %v7564_v23, 16  ;;  %v593_v48 = vshll.u32 %v7564_v23, 16  ;;  %v7594_v15 = vld [vmem:[%s7264_s29 + $0xb4] sm:$0xf] }
  0x77   : > { %v582_v47 = vor.u32 %v581_v39, %v577_v35  ;;  %v599_v49 = vshll.u32 %v7569_v11, 16  ;;  %v603_v50 = vshrl.u32 %v7569_v11, 16  ;;  %v554_v51 = vsel %vm7285_vm4, %v549_v34, %v7540_v58  ;;  %v7602_v20 = vld.sshfl [vmem:[%s8715_s1 + $0x8] sm:$0x33 pattern:$0x76325410] }
  0x78   : > { %v564_v54 = vsel %vm7285_vm4, %v559_v38, %v563_v14  ;;  %v573_v12 = vrot.slane %v572_v44, 4  ;;  %v587_v61 = vrot.slane %v585_v45, 5  ;;  %v3235_v62 = vrot.slane %v6158_v40, 5  ;;  %v6160_v39 = vld [vmem:[%s7264_s29 + $0x54] sm:$0xe] }
  0x79   : > { %v583_v27 = vrot.slane %v582_v47, 4  ;;  %v3229_v2 = vsel %vm7444_vm7, %v6194_v41, %v3228_v24  ;;  %v3232_v58 = vsel %vm7444_vm7, %v3230_v46, %v3231_v43  ;;  %v592_v3 = vrot.slane %v590_v13, 4  ;;  %v6162_v44 = vld [vmem:[%s7264_s29 + $0x5c] sm:$0x1] }
  0x7a   : > { %5902 = vmatmul.mubr.msk.bf16.gmra.mrb[44].mxu1 %vm696_vm3, %v5884_v32  ;;  %v595_v7 = vrot.slane %v593_v48, 5  ;;  %v5885_v8 = vcombine.low %v554_v51, %v564_v54  ;;  %v601_v9 = vrot.slane %v599_v49, 5  ;;  %v605_v10 = vrot.slane %v603_v50, 4  ;;  %v6161_v32 = vld [vmem:[%s7264_s29 + $0x58] sm:$0xf] }
  0x7b   : > { %904 = vmatprep.mubr.bf16.mxu1 %v7185_v4  ;;  %v6211_v16 = vcombine.low %v3229_v2, %v3232_v58  ;;  %v6195_v17 = vrot.slane %v6157_v55, 9  ;;  %v3238_v18 = vrot.slane %v6159_v56, 5  ;;  %v578_v14 = vsel %vm7285_vm4, %v573_v12, %v577_v35  ;;  %v249_v45 = vld [vmem:[%s7264_s29 + $0xbc] sm:$0x1] }
  0x7c   : > { %v588_v21 = vsel %vm7285_vm4, %v583_v27, %v587_v61  ;;  %v3237_v24 = vrot.slane %v3235_v62, 4  ;;  %v609_v26 = vshll.u32 %v248_v63, 16  ;;  %v596_v29 = vor.u32 %v595_v7, %v592_v3  ;;  %v6164_v7 = vld [vmem:[%s7264_s29 + $0x64] sm:$0xf] }
  0x7d   : > { %6228 = vmatmul.mubr.msk.bf16.gmra.mrb[12].mxu0 %vm696_vm3, %v6210_v36  ;;  %v606_v30 = vor.u32 %v605_v10, %v601_v9  ;;  %v614_v34 = vshrl.u32 %v7594_v15, 16  ;;  %v617_v36 = vshll.u32 %v7594_v15, 16  ;;  %v623_v35 = vshll.u32 %v7597_v19, 16  ;;  %v6163_v10 = vld [vmem:[%s7264_s29 + $0x60] sm:$0xe] }
  0x7e   : > { %3495 = vmatprep.mubr.bf16.mxu0 %v7185_v4  ;;  %v627_v38 = vshrl.u32 %v7597_v19, 16  ;;  %v5886_v40 = vcombine.low %v578_v14, %v588_v21  ;;  %v3236_v41 = vsel %vm7444_vm7, %v6195_v17, %v3235_v62  ;;  %v3239_v43 = vsel %vm7444_vm7, %v3237_v24, %v3238_v18  ;;  %v6165_v18 = vld [vmem:[%s7264_s29 + $0x68] sm:$0x1] }
  0x7f   : > { %v1550_v46 = vcombine.high %v7602_v20, %v7602_v20  ;;  %v597_v47 = vrot.slane %v596_v29, 4  ;;  %v607_v13 = vrot.slane %v606_v30, 4  ;;  %v611_v48 = vrot.slane %v609_v26, 5 }
  0x80   : > { %v3242_v49 = vrot.slane %v6161_v32, 5  ;;  %v616_v50 = vrot.slane %v614_v34, 4  ;;  %v619_v51 = vrot.slane %v617_v36, 5  ;;  %v625_v54 = vrot.slane %v623_v35, 5 }
  0x81   : > { %v629_v55 = vrot.slane %v627_v38, 4  ;;  %5975 = vmatprep.subr.msk.bf16.mxu1 %vm745_vm0, %v1550_v46  ;;  %v6212_v56 = vcombine.low %v3236_v41, %v3239_v43  ;;  %v6196_v12 = vrot.slane %v6160_v39, 9  ;;  %v3245_v61 = vrot.slane %v6162_v44, 5  ;;  %v6167_v38 = vld [vmem:[%s7264_s29 + $0x70] sm:$0xf] }
  0x82   : > { %5903 = vmatmul.mubr.msk.bf16.gmra.mrb[48].mxu1 %vm696_vm3, %v5885_v8  ;;  %v3244_v27 = vrot.slane %v3242_v49, 4  ;;  %v633_v62 = vshll.u32 %v249_v45, 16  ;;  %v602_v63 = vsel %vm7285_vm4, %v597_v47, %v601_v9  ;;  %v612_v2 = vsel %vm7285_vm4, %v607_v13, %v611_v48  ;;  %v7645_v30 = vld.sshfl [vmem:[%s8715_s1 + $0x1c] sm:$0x33 pattern:$0x76325410] }
  0x83   : > { %914 = vmatprep.mubr.bf16.mxu1 %v7185_v4  ;;  %v620_v58 = vor.u32 %v619_v51, %v616_v50  ;;  %v630_v3 = vor.u32 %v629_v55, %v625_v54  ;;  %v3243_v8 = vsel %vm7444_vm7, %v6196_v12, %v3242_v49  ;;  %v3249_v14 = vrot.slane %v6164_v7, 5  ;;  %v6168_v46 = vld [vmem:[%s7264_s29 + $0x74] sm:$0x1] }
  0x84   : > { %v3246_v17 = vsel %vm7444_vm7, %v3244_v27, %v3245_v61  ;;  %v635_v9 = vrot.slane %v633_v62, 5  ;;  %v6197_v29 = vrot.slane %v6163_v10, 9  ;;  %v3252_v34 = vrot.slane %v6165_v18, 5  ;;  %v6170_v61 = vld [vmem:[%s7264_s29 + $0x7c] sm:$0xf] }
  0x85   : > { %6229 = vmatmul.mubr.msk.bf16.gmra.mrb[16].mxu0 %vm696_vm3, %v6211_v16  ;;  %v5887_v16 = vcombine.low %v602_v63, %v612_v2  ;;  %v621_v21 = vrot.slane %v620_v58, 4  ;;  %v631_v24 = vrot.slane %v630_v3, 4  ;;  %v6213_v26 = vcombine.low %v3243_v8, %v3246_v17  ;;  %v7686_v62 = vld.sshfl [vmem:[%s8715_s1 + $0xc] sm:$0x33 pattern:$0x76325410] }
  0x86   : > { %3505 = vmatprep.mubr.bf16.mxu0 %v7185_v4  ;;  %v3251_v32 = vrot.slane %v3249_v14, 4  ;;  %v3250_v39 = vsel %vm7444_vm7, %v6197_v29, %v3249_v14  ;;  %v3256_v44 = vrot.slane %v6167_v38, 5  ;;  %v4608_v45 = vcombine.high %v7645_v30, %v7645_v30  ;;  %v7145_v63 = vld [vmem:[%s7264_s29] sm:$0xf]  ;;  %v7146_v2 = vld [vmem:[%s7264_s29 + $0x4] sm:$0xf] }
  0x87   : > { %v626_v36 = vsel %vm7285_vm4, %v621_v21, %v625_v54  ;;  %v636_v35 = vsel %vm7285_vm4, %v631_v24, %v635_v9  ;;  %v5916_v47 = vcombine.low %v7438_v52, %v7449_v60  ;;  %v5917_v13 = vcombine.low %v7469_v25, %v7475_v31  ;;  %v6169_v10 = vld [vmem:[%s7264_s29 + $0x78] sm:$0xe]  ;;  %v7148_v29 = vld [vmem:[%s7264_s29 + $0x10] sm:$0xf]  ;;  %v6172_v38 = vld [vmem:[%s7264_s29 + $0x84] sm:$0xe] }
  0x88   : > { %v5888_v41 = vcombine.low %v626_v36, %v636_v35  ;;  %v3253_v43 = vsel %vm7444_vm7, %v3251_v32, %v3252_v34  ;;  %6374 = vmatprep.subr.msk.bf16.mxu0 %vm745_vm0, %v4608_v45  ;;  %v5918_v48 = vcombine.low %v7495_v59, %v7502_v1  ;;  %v5919_v50 = vcombine.low %v7518_v33, %v7523_v37  ;;  %v6176_v45 = vld [vmem:[%s7264_s29 + $0x94] sm:$0xf]  ;;  %v7112_v52 = vld [vmem:[%s7264_s29 + $0x3c] sm:$0xff]   ;;  %v7114_v60 = vld [vmem:[%s7264_s29 + $0x48] sm:$0xff]  }
  0x89   : > { %v6214_v49 = vcombine.low %v3250_v39, %v3253_v43  ;;  %v5920_v51 = vcombine.low %v7538_v53, %v7543_v0  ;;  %v5921_v54 = vcombine.low %v7564_v23, %v7569_v11  ;;  %v3259_v12 = vrot.slane %v6168_v46, 5  ;;  %v6174_v39 = vld [vmem:[%s7264_s29 + $0x8c] sm:$0x1]  ;;  %v7149_v46 = vld [vmem:[%s7264_s29 + $0x18] sm:$0xf]  ;;  %v7118_v59 = vld [vmem:[%s7264_s29 + $0x60] sm:$0xff]  }
  0x8a   : > { %5904 = vmatmul.mubr.msk.bf16.gmra.mrb[52].mxu1 %vm696_vm3, %v5886_v40  ;;  %v6166_v40 = vld [vmem:[%s7264_s29 + $0x6c] sm:$0xe]  ;;  %v5922_v27 = vcombine.low %v7594_v15, %v7597_v19  ;;  %v5907_v58 = vcombine.low %v7145_v63, %v7146_v2  ;;  %v3263_v8 = vrot.slane %v6170_v61, 5  ;;  %v1600_v17 = vsel %vm745_vm0, %v7602_v20, 0  ;;  %v6175_v63 = vld [vmem:[%s7264_s29 + $0x90] sm:$0xe] }
  0x8b   : > { %924 = vmatprep.mubr.bf16.mxu1 %v7185_v4  ;;  %v6198_v55 = vrot.slane %v6166_v40, 9  ;;  %v1988_v9 = vcombine.high %v7686_v62, %v7686_v62  ;;  %v6199_v14 = vrot.slane %v6169_v10, 9  ;;  %v7147_v20 = vld [vmem:[%s7264_s29 + $0xc] sm:$0xf]  ;;  %v3277_v61 = vrot.slane %v6176_v45, 5  ;;  %v7116_v25 = vld [vmem:[%s7264_s29 + $0x54] sm:$0xff]  }
  0x8c   : > { %v3265_v21 = vrot.slane %v3263_v8, 4  ;;  %v5908_v32 = vcombine.low %v7147_v20, %v7148_v29  ;;  %v6177_v2 = vld [vmem:[%s7264_s29 + $0x98] sm:$0x1]  ;;  %v6179_v10 = vld [vmem:[%s7264_s29 + $0xa0] sm:$0xf] }
  0x8d   : > { %6230 = vmatmul.mubr.msk.bf16.gmra.mrb[20].mxu0 %vm696_vm3, %v6212_v56  ;;  %v3258_v56 = vrot.slane %v3256_v44, 4  ;;  %v3257_v3 = vsel %vm7444_vm7, %v6198_v55, %v3256_v44  ;;  %v3264_v34 = vsel %vm7444_vm7, %v6199_v14, %v3263_v8  ;;  %v3273_v44 = vrot.slane %v6174_v39, 5  ;;  %v6183_v45 = vld [vmem:[%s7264_s29 + $0xb0] sm:$0x1]  ;;  %v1282_v31 = vld [vmem:[%s7264_s29 + $0x4] sm:$0xf] }
  0x8e   : > { %3515 = vmatprep.mubr.bf16.mxu0 %v7185_v4  ;;  %v3280_v8 = vrot.slane %v6177_v2, 5  ;;  %v1382_v1 = vrot.slane %v1282_v31, 5  ;;  %v1281_v33 = vld [vmem:[%s7264_s29] sm:$0xe]  ;;  %v1283_v37 = vld [vmem:[%s7264_s29 + $0x8] sm:$0x1] }
  0x8f   : > { %v3260_v7 = vsel %vm7444_vm7, %v3258_v56, %v3259_v12  ;;  %v5941_v53 = vrot.slane %v1281_v33, 9  ;;  %v1298_v31 = vld [vmem:[%s7264_s29 + $0x44] sm:$0x1] }
  0x90   : > { %v6215_v18 = vcombine.low %v3257_v3, %v3260_v7  ;;  %v6201_v3 = vrot.slane %v6175_v63, 9  ;;  %v3279_v7 = vrot.slane %v3277_v61, 4  ;;  %v7156_v63 = vld [vmem:[%s7264_s29 + $0x40] sm:$0xf]  ;;  %v1384_v0 = vrot.slane %v1382_v1, 4 }
  0x91   : > { %v1383_v23 = vsel %vm7444_vm7, %v5941_v53, %v1382_v1  ;;  %v1300_v53 = vld [vmem:[%s7264_s29 + $0x4c] sm:$0xf] }
  0x92   : > { %5905 = vmatmul.mubr.msk.bf16.gmra.mrb[56].mxu1 %vm696_vm3, %v5887_v16  ;;  %v6171_v16 = vld [vmem:[%s7264_s29 + $0x80] sm:$0x1]  ;;  %v3281_v14 = vsel %vm7444_vm7, %v3279_v7, %v3280_v8  ;;  %v6184_v8 = vld [vmem:[%s7264_s29 + $0xb4] sm:$0xe] }
  0x93   : > { %934 = vmatprep.mubr.bf16.mxu1 %v7185_v4  ;;  %v3266_v24 = vrot.slane %v6171_v16, 5  ;;  %v7151_v16 = vld [vmem:[%s7264_s29 + $0x24] sm:$0xf] }
  0x95   : > { %6231 = vmatmul.mubr.msk.bf16.gmra.mrb[24].mxu0 %vm696_vm3, %v6213_v26  ;;  %v6173_v26 = vld [vmem:[%s7264_s29 + $0x88] sm:$0xf]  ;;  %v3267_v36 = vsel %vm7444_vm7, %v3265_v21, %v3266_v24  ;;  %v3284_v21 = vrot.slane %v6179_v10, 5  ;;  %v6178_v24 = vld [vmem:[%s7264_s29 + $0x9c] sm:$0xe] }
  0x96   : > { %3525 = vmatprep.mubr.bf16.mxu0 %v7185_v4  ;;  %v3270_v35 = vrot.slane %v6173_v26, 5  ;;  %v6216_v40 = vcombine.low %v3264_v34, %v3267_v36  ;;  %v6180_v26 = vld [vmem:[%s7264_s29 + $0xa4] sm:$0x1]  ;;  %v6202_v29 = vrot.slane %v6178_v24, 9  ;;  %v6182_v36 = vld [vmem:[%s7264_s29 + $0xac] sm:$0xf] }
  0x97   : > { %v3287_v34 = vrot.slane %v6180_v26, 5  ;;  %v6186_v10 = vld [vmem:[%s7264_s29 + $0xbc] sm:$0x1]  ;;  %v7158_v24 = vld [vmem:[%s7264_s29 + $0x4c] sm:$0xf] }
  0x98   : > { %v3272_v43 = vrot.slane %v3270_v35, 4 }
  0x9a   : > { %5906 = vmatmul.mubr.msk.bf16.gmra.mrb[60].mxu1 %vm696_vm3, %v5888_v41  ;;  %v6200_v41 = vrot.slane %v6172_v38, 9  ;;  %v3274_v12 = vsel %vm7444_vm7, %v3272_v43, %v3273_v44  ;;  %v7154_v38 = vld [vmem:[%s7264_s29 + $0x34] sm:$0xf]  ;;  %v3291_v43 = vrot.slane %v6182_v36, 5  ;;  %v6181_v44 = vld [vmem:[%s7264_s29 + $0xa8] sm:$0xe] }
  0x9b   : > { %1120 = vmatprep.mubr.bf16.mxu1 %v7185_v4  ;;  %v6189_v36 = vld [vmem:[%s7264_s29 + $0xc8] sm:$0x1] }
  0x9c   : > { %v3271_v56 = vsel %vm7444_vm7, %v6200_v41, %v3270_v35  ;;  %v7153_v35 = vld [vmem:[%s7264_s29 + $0x30] sm:$0xf] }
  0x9d   : > { %6232 = vmatmul.mubr.msk.bf16.gmra.mrb[28].mxu0 %vm696_vm3, %v6214_v49  ;;  %v7150_v49 = vld [vmem:[%s7264_s29 + $0x1c] sm:$0xf]  ;;  %v5911_v39 = vcombine.low %v7153_v35, %v7154_v38 }
  0x9e   : > { %3535 = vmatprep.mubr.bf16.mxu0 %v7185_v4  ;;  %v5909_v55 = vcombine.low %v7149_v46, %v7150_v49  ;;  %v6203_v49 = vrot.slane %v6181_v44, 9 }
  0xa2   : > { %5925 = vmatmul.mubr.msk.bf16.vlgmr.msra.gmra.mrb[0].mxu1 %vm696_vm3, %v5907_v58  ;;  %v6217_v58 = vcombine.low %v3271_v56, %v3274_v12  ;;  %v3294_v56 = vrot.slane %v6183_v45, 5  ;;  %v6185_v12 = vld [vmem:[%s7264_s29 + $0xb8] sm:$0xf] }
  0xa3   : > { %1606 = vmatpush1.bf16.msra.mxu1 %v1600_v17  ;;  %1130 = vmatprep.mubr.bf16.mxu1 %v7185_v4  ;;  %v7152_v17 = vld [vmem:[%s7264_s29 + $0x28] sm:$0xf]  ;;  %v3298_v7 = vrot.slane %v6185_v12, 5  ;;  %v7106_v12 = vld [vmem:[%s7264_s29 + $0x18] sm:$0xff]  }
  0xa4   : > { %6042 = vmatprep.subr.msk.bf16.mxu1 %vm745_vm0, %v1988_v9  ;;  %v5910_v9 = vcombine.low %v7151_v16, %v7152_v17  ;;  %v6204_v17 = vrot.slane %v6184_v8, 9 }
  0xa5   : > { %6233 = vmatmul.mubr.msk.bf16.gmra.mrb[32].mxu0 %vm696_vm3, %v6215_v18  ;;  %v3278_v18 = vsel %vm7444_vm7, %v6201_v3, %v3277_v61  ;;  %v7155_v61 = vld [vmem:[%s7264_s29 + $0x3c] sm:$0xf] }
  0xa6   : > { %3545 = vmatprep.mubr.bf16.mxu0 %v7185_v4  ;;  %v6218_v20 = vcombine.low %v3278_v18, %v3281_v14  ;;  %v5912_v2 = vcombine.low %v7155_v61, %v7156_v63  ;;  %v3301_v18 = vrot.slane %v6186_v10, 5  ;;  %v6188_v14 = vld [vmem:[%s7264_s29 + $0xc4] sm:$0xf]  ;;  %v4658_v61 = vsel %vm745_vm0, %v7645_v30, 0 }
  0xa7   : > { %v1385_v30 = vrot.slane %v1283_v37, 5  ;;  %v1420_v37 = vrot.slane %v1298_v31, 5 }
  0xa9   : > { %v1386_v11 = vsel %vm7444_vm7, %v1384_v0, %v1385_v30  ;;  %v7125_v0 = vld [vmem:[%s7264_s29 + $0xa8] sm:$0xff]  }
  0xaa   : > { %5926 = vmatmul.mubr.msk.bf16.gmra.mrb[4].mxu1 %vm696_vm3, %v5908_v32  ;;  %v3286_v32 = vrot.slane %v3284_v21, 4  ;;  %v5958_v15 = vcombine.low %v1383_v23, %v1386_v11  ;;  %v1299_v23 = vld [vmem:[%s7264_s29 + $0x48] sm:$0xe]  ;;  %v1301_v11 = vld [vmem:[%s7264_s29 + $0x50] sm:$0x1] }
  0xab   : > { %1140 = vmatprep.mubr.bf16.mxu1 %v7185_v4 }
  0xac   : > { %v3288_v41 = vsel %vm7444_vm7, %v3286_v32, %v3287_v34  ;;  %v3305_v32 = vrot.slane %v6188_v14, 5  ;;  %v6187_v34 = vld [vmem:[%s7264_s29 + $0xc0] sm:$0xe] }
  0xad   : > { %6234 = vmatmul.mubr.msk.bf16.gmra.mrb[36].mxu0 %vm696_vm3, %v6216_v40  ;;  %v3285_v40 = vsel %vm7444_vm7, %v6202_v29, %v3284_v21  ;;  %v7157_v21 = vld [vmem:[%s7264_s29 + $0x48] sm:$0xf]  ;;  %v6205_v38 = vrot.slane %v6187_v34, 9 }
  0xae   : > { %3555 = vmatprep.mubr.bf16.mxu0 %v7185_v4  ;;  %v6219_v46 = vcombine.low %v3285_v40, %v3288_v41  ;;  %v5913_v26 = vcombine.low %v7157_v21, %v7158_v24  ;;  %v3308_v40 = vrot.slane %v6189_v36, 5  ;;  %v7159_v41 = vld [vmem:[%s7264_s29 + $0x54] sm:$0xf]  ;;  %v1291_v21 = vld [vmem:[%s7264_s29 + $0x28] sm:$0xf] }
  0xaf   : > { %v3306_v45 = vsel %vm7444_vm7, %v6205_v38, %v3305_v32  ;;  %v7122_v24 = vld [vmem:[%s7264_s29 + $0x84] sm:$0xff]  }
  0xb2   : > { %5927 = vmatmul.mubr.msk.bf16.gmra.mrb[8].mxu1 %vm696_vm3, %v5909_v55  ;;  %v3293_v55 = vrot.slane %v3291_v43, 4 }
  0xb3   : > { %1150 = vmatprep.mubr.bf16.mxu1 %v7185_v4 }
  0xb4   : > { %v3295_v3 = vsel %vm7444_vm7, %v3293_v55, %v3294_v56  ;;  %v5915_v55 = vcombine.low %v7416_v22, %v7421_v28  ;;  %v7799_v56 = vld.sshfl [vmem:[%s8715_s1 + $0x20] sm:$0x33 pattern:$0x76325410]  ;;  %v7108_v22 = vld [vmem:[%s7264_s29 + $0x24] sm:$0xff]   ;;  %v7110_v28 = vld [vmem:[%s7264_s29 + $0x30] sm:$0xff]  }
  0xb5   : > { %6235 = vmatmul.mubr.msk.bf16.gmra.mrb[40].mxu0 %vm696_vm3, %v6217_v58  ;;  %v3292_v58 = vsel %vm7444_vm7, %v6203_v49, %v3291_v43  ;;  %v7160_v43 = vld [vmem:[%s7264_s29 + $0x58] sm:$0xf]  ;;  %v5186_v63 = vcombine.high %v7799_v56, %v7799_v56 }
  0xb6   : > { %3565 = vmatprep.mubr.bf16.mxu0 %v7185_v4  ;;  %v6220_v16 = vcombine.low %v3292_v58, %v3295_v3  ;;  %v5914_v44 = vcombine.low %v7159_v41, %v7160_v43  ;;  %v1288_v58 = vld [vmem:[%s7264_s29 + $0x1c] sm:$0xf] }
  0xb7   : > { %v7121_v3 = vld [vmem:[%s7264_s29 + $0x78] sm:$0xff]   ;;  %v1396_v10 = vrot.slane %v1288_v58, 5 }
  0xb8   : > { %v1304_v58 = vld [vmem:[%s7264_s29 + $0x5c] sm:$0x1] }
  0xba   : > { %5928 = vmatmul.mubr.msk.bf16.gmra.mrb[12].mxu1 %vm696_vm3, %v5910_v9  ;;  %v3300_v9 = vrot.slane %v3298_v7, 4 }
  0xbb   : > { %1160 = vmatprep.mubr.bf16.mxu1 %v7185_v4 }
  0xbc   : > { %v3302_v29 = vsel %vm7444_vm7, %v3300_v9, %v3301_v18  ;;  %v1398_v18 = vrot.slane %v1396_v10, 4 }
  0xbd   : > { %6236 = vmatmul.mubr.msk.bf16.gmra.mrb[44].mxu0 %vm696_vm3, %v6218_v20  ;;  %v3299_v20 = vsel %vm7444_vm7, %v6204_v17, %v3298_v7  ;;  %v1289_v17 = vld [vmem:[%s7264_s29 + $0x20] sm:$0x1] }
  0xbe   : > { %3575 = vmatprep.mubr.bf16.mxu0 %v7185_v4  ;;  %v6221_v35 = vcombine.low %v3299_v20, %v3302_v29  ;;  %v1399_v14 = vrot.slane %v1289_v17, 5  ;;  %v1403_v20 = vrot.slane %v1291_v21, 5  ;;  %v1290_v29 = vld [vmem:[%s7264_s29 + $0x24] sm:$0xe] }
  0xbf   : > { %v5944_v36 = vrot.slane %v1290_v29, 9 }
  0xc1   : > { %v1404_v41 = vsel %vm7444_vm7, %v5944_v36, %v1403_v20  ;;  %v6310_v36 = vld [vmem:[%s7264_s29 + $0x20] sm:$0x1] }
  0xc2   : > { %5929 = vmatmul.mubr.msk.bf16.gmra.mrb[16].mxu1 %vm696_vm3, %v5911_v39  ;;  %v3307_v39 = vrot.slane %v3305_v32, 4  ;;  %v1292_v32 = vld [vmem:[%s7264_s29 + $0x2c] sm:$0x1] }
  0xc3   : > { %1170 = vmatprep.mubr.bf16.mxu1 %v7185_v4  ;;  %v1406_v38 = vrot.slane %v1292_v32, 5 }
  0xc5   : > { %6237 = vmatmul.mubr.msk.bf16.gmra.mrb[48].mxu0 %vm696_vm3, %v6219_v46  ;;  %v3309_v46 = vsel %vm7444_vm7, %v3307_v39, %v3308_v40  ;;  %v1294_v39 = vld [vmem:[%s7264_s29 + $0x34] sm:$0xf] }
  0xc6   : > { %3585 = vmatprep.mubr.bf16.mxu0 %v7185_v4  ;;  %v6222_v49 = vcombine.low %v3306_v45, %v3309_v46  ;;  %v7123_v40 = vld [vmem:[%s7264_s29 + $0x90] sm:$0xff]   ;;  %v1295_v46 = vld [vmem:[%s7264_s29 + $0x38] sm:$0x1] }
  0xc7   : > { %v1293_v45 = vld [vmem:[%s7264_s29 + $0x30] sm:$0xe] }
  0xca   : > { %5930 = vmatmul.mubr.msk.bf16.gmra.mrb[20].mxu1 %vm696_vm3, %v5912_v2  ;;  %v2038_v2 = vsel %vm745_vm0, %v7686_v62, 0 }
  0xcb   : > { %1180 = vmatprep.mubr.bf16.mxu1 %v7185_v4 }
  0xcd   : > { %6238 = vmatmul.mubr.msk.bf16.gmra.mrb[52].mxu0 %vm696_vm3, %v6220_v16  ;;  %v1287_v16 = vld [vmem:[%s7264_s29 + $0x18] sm:$0xe] }
  0xce   : > { %3595 = vmatprep.mubr.bf16.mxu0 %v7185_v4  ;;  %v5943_v9 = vrot.slane %v1287_v16, 9 }
  0xd2   : > { %5931 = vmatmul.mubr.msk.bf16.gmra.mrb[24].mxu1 %vm696_vm3, %v5913_v26  ;;  %v1397_v26 = vsel %vm7444_vm7, %v5943_v9, %v1396_v10 }
  0xd3   : > { %1190 = vmatprep.mubr.bf16.mxu1 %v7185_v4 }
  0xd5   : > { %6239 = vmatmul.mubr.msk.bf16.gmra.mrb[56].mxu0 %vm696_vm3, %v6221_v35  ;;  %v1405_v35 = vrot.slane %v1403_v20, 4  ;;  %v7127_v20 = vld [vmem:[%s7264_s29 + $0xc0] sm:$0xff]  }
  0xd6   : > { %3605 = vmatprep.mubr.bf16.mxu0 %v7185_v4 }
  0xd7   : > { %v1407_v43 = vsel %vm7444_vm7, %v1405_v35, %v1406_v38 }
  0xda   : > { %5932 = vmatmul.mubr.msk.bf16.gmra.mrb[28].mxu1 %vm696_vm3, %v5914_v44  ;;  %v1410_v44 = vrot.slane %v1294_v39, 5 }
  0xdb   : > { %1200 = vmatprep.mubr.bf16.mxu1 %v7185_v4 }
  0xdd   : > { %6240 = vmatmul.mubr.msk.bf16.gmra.mrb[60].mxu0 %vm696_vm3, %v6222_v49  ;;  %v5961_v49 = vcombine.low %v1404_v41, %v1407_v43  ;;  %v1305_v41 = vld [vmem:[%s7264_s29 + $0x60] sm:$0xe] }
  0xde   : > { %3893 = vmatprep.mubr.bf16.mxu0 %v7185_v4 }
  0xe2   : > { %5933 = vmatmul.mubr.msk.bf16.gmra.mrb[32].mxu1 %vm696_vm3, %v5915_v55  ;;  %v5945_v55 = vrot.slane %v1293_v45, 9 }
  0xe3   : > { %1210 = vmatprep.mubr.bf16.mxu1 %v7185_v4 }
  0xe5   : > { %6292 = vmatmul.mubr.msk.bf16.vlgmr.msra.gmra.mrb[0].mxu0 %vm696_vm3, %v7106_v12  ;;  %v1412_v12 = vrot.slane %v1410_v44, 4 }
  0xe6   : > { %4664 = vmatpush1.bf16.msra.mxu0 %v4658_v61  ;;  %3903 = vmatprep.mubr.bf16.mxu0 %v7185_v4  ;;  %v1413_v61 = vrot.slane %v1295_v46, 5  ;;  %v1307_v46 = vld [vmem:[%s7264_s29 + $0x68] sm:$0x1] }
  0xe7   : > { %6473 = vmatprep.subr.msk.bf16.mxu0 %vm745_vm0, %v5186_v63  ;;  %v1297_v63 = vld [vmem:[%s7264_s29 + $0x40] sm:$0xf] }
  0xea   : > { %5934 = vmatmul.mubr.msk.bf16.gmra.mrb[36].mxu1 %vm696_vm3, %v5916_v47  ;;  %v1285_v47 = vld [vmem:[%s7264_s29 + $0x10] sm:$0xf] }
  0xeb   : > { %1220 = vmatprep.mubr.bf16.mxu1 %v7185_v4 }
  0xed   : > { %6293 = vmatmul.mubr.msk.bf16.gmra.mrb[4].mxu0 %vm696_vm3, %v7108_v22  ;;  %v7124_v22 = vld [vmem:[%s7264_s29 + $0x9c] sm:$0xff]  }
  0xee   : > { %3913 = vmatprep.mubr.bf16.mxu0 %v7185_v4 }
  0xf2   : > { %5935 = vmatmul.mubr.msk.bf16.gmra.mrb[40].mxu1 %vm696_vm3, %v5917_v13  ;;  %v7120_v13 = vld [vmem:[%s7264_s29 + $0x6c] sm:$0xff]  }
  0xf3   : > { %1230 = vmatprep.mubr.bf16.mxu1 %v7185_v4 }
  0xf5   : > { %6294 = vmatmul.mubr.msk.bf16.gmra.mrb[8].mxu0 %vm696_vm3, %v7110_v28  ;;  %v1411_v28 = vsel %vm7444_vm7, %v5945_v55, %v1410_v44 }
  0xf6   : > { %3923 = vmatprep.mubr.bf16.mxu0 %v7185_v4 }
  0xfa   : > { %5936 = vmatmul.mubr.msk.bf16.gmra.mrb[44].mxu1 %vm696_vm3, %v5918_v48  ;;  %v1389_v48 = vrot.slane %v1285_v47, 5 }
  0xfb   : > { %1240 = vmatprep.mubr.bf16.mxu1 %v7185_v4 }
  0xfd   : > { %6295 = vmatmul.mubr.msk.bf16.gmra.mrb[12].mxu0 %vm696_vm3, %v7112_v52  ;;  %v1414_v52 = vsel %vm7444_vm7, %v1412_v12, %v1413_v61  ;;  %v5949_v61 = vrot.slane %v1305_v41, 9 }
  0xfe   : > { %3933 = vmatprep.mubr.bf16.mxu0 %v7185_v4 }
 0x102   : > { %5937 = vmatmul.mubr.msk.bf16.gmra.mrb[48].mxu1 %vm696_vm3, %v5919_v50  ;;  %v1284_v50 = vld [vmem:[%s7264_s29 + $0xc] sm:$0xe] }
 0x103   : > { %1250 = vmatprep.mubr.bf16.mxu1 %v7185_v4  ;;  %v5942_v19 = vrot.slane %v1284_v50, 9 }
 0x105   : > { %6296 = vmatmul.mubr.msk.bf16.gmra.mrb[16].mxu0 %vm696_vm3, %v7114_v60  ;;  %v1390_v7 = vsel %vm7444_vm7, %v5942_v19, %v1389_v48  ;;  %v1417_v60 = vrot.slane %v1297_v63, 5  ;;  %v1427_v19 = vrot.slane %v1301_v11, 5 }
 0x106   : > { %3943 = vmatprep.mubr.bf16.mxu0 %v7185_v4 }
 0x107   : > { %v1419_v33 = vrot.slane %v1417_v60, 4 }
 0x109   : > { %v1421_v47 = vsel %vm7444_vm7, %v1419_v33, %v1420_v37 }
 0x10a   : > { %5938 = vmatmul.mubr.msk.bf16.gmra.mrb[52].mxu1 %vm696_vm3, %v5920_v51  ;;  %v1286_v51 = vld [vmem:[%s7264_s29 + $0x14] sm:$0x1] }
 0x10b   : > { %1260 = vmatprep.mubr.bf16.mxu1 %v7185_v4 }
 0x10d   : > { %6297 = vmatmul.mubr.msk.bf16.gmra.mrb[20].mxu0 %vm696_vm3, %v7116_v25  ;;  %v1296_v25 = vld [vmem:[%s7264_s29 + $0x3c] sm:$0xe] }
 0x10e   : > { %3953 = vmatprep.mubr.bf16.mxu0 %v7185_v4  ;;  %v5946_v1 = vrot.slane %v1296_v25, 9 }
 0x110   : > { %v1418_v30 = vsel %vm7444_vm7, %v5946_v1, %v1417_v60  ;;  %v1441_v60 = vrot.slane %v1307_v46, 5  ;;  %v6313_v1 = vld [vmem:[%s7264_s29 + $0x2c] sm:$0x1] }
 0x111   : > { %v5963_v50 = vcombine.low %v1418_v30, %v1421_v47  ;;  %v7128_v30 = vld [vmem:[%s7264_s29 + $0xcc] sm:$0xff]  }
 0x112   : > { %5939 = vmatmul.mubr.msk.bf16.gmra.mrb[56].mxu1 %vm696_vm3, %v5921_v54  ;;  %v1391_v54 = vrot.slane %v1389_v48, 4  ;;  %v1303_v48 = vld [vmem:[%s7264_s29 + $0x58] sm:$0xf] }
 0x113   : > { %1270 = vmatprep.mubr.bf16.mxu1 %v7185_v4 }
 0x115   : > { %6298 = vmatmul.mubr.msk.bf16.gmra.mrb[24].mxu0 %vm696_vm3, %v7118_v59  ;;  %v5962_v59 = vcombine.low %v1411_v28, %v1414_v52  ;;  %v4186_v28 = vshll.u32 %v6310_v36, 16 }
 0x116   : > { %3963 = vmatprep.mubr.bf16.mxu0 %v7185_v4 }
 0x117   : > { %v4188_v11 = vrot.slane %v4186_v28, 5 }
 0x11a   : > { %5940 = vmatmul.mubr.msk.bf16.gmra.mrb[60].mxu1 %vm696_vm3, %v5922_v27  ;;  %v1392_v27 = vrot.slane %v1286_v51, 5  ;;  %v5947_v51 = vrot.slane %v1299_v23, 9 }
 0x11b   : > { %1637 = vmatprep.mubr.bf16.mxu1 %v7185_v4 }
 0x11c   : > { %v1393_v8 = vsel %vm7444_vm7, %v1391_v54, %v1392_v27  ;;  %v1431_v54 = vrot.slane %v1303_v48, 5  ;;  %v7126_v27 = vld [vmem:[%s7264_s29 + $0xb4] sm:$0xff]  }
 0x11d   : > { %6299 = vmatmul.mubr.msk.bf16.gmra.mrb[28].mxu0 %vm696_vm3, %v7120_v13  ;;  %v5959_v62 = vcombine.low %v1390_v7, %v1393_v8  ;;  %v1424_v13 = vrot.slane %v1300_v53, 5  ;;  %v6309_v7 = vld [vmem:[%s7264_s29 + $0x1c] sm:$0xf]  ;;  %v6314_v53 = vld [vmem:[%s7264_s29 + $0x30] sm:$0xf] }
 0x11e   : > { %3973 = vmatprep.mubr.bf16.mxu0 %v7185_v4  ;;  %v1433_v17 = vrot.slane %v1431_v54, 4  ;;  %v4180_v21 = vshrl.u32 %v6309_v7, 16 }
 0x11f   : > { %v1425_v8 = vsel %vm7444_vm7, %v5947_v51, %v1424_v13 }
 0x122   : > { %5976 = vmatmul.mubr.msk.bf16.vlgmr.msra.gmra.mrb[0].mxu1 %vm696_vm3, %v5958_v15  ;;  %v1426_v15 = vrot.slane %v1424_v13, 4 }
 0x123   : > { %2044 = vmatpush1.bf16.msra.mxu1 %v2038_v2  ;;  %1647 = vmatprep.mubr.bf16.mxu1 %v7185_v4  ;;  %v1302_v2 = vld [vmem:[%s7264_s29 + $0x54] sm:$0xe] }
 0x124   : > { %6557 = vmatprep.subr.msk.bf16.mxu1 %vm745_vm0, %v7233_v5  ;;  %v1400_v5 = vsel %vm7444_vm7, %v1398_v18, %v1399_v14  ;;  %v1428_v10 = vsel %vm7444_vm7, %v1426_v15, %v1427_v19  ;;  %v5948_v16 = vrot.slane %v1302_v2, 9  ;;  %v4176_v14 = vshll.u32 %v6309_v7, 16 }
 0x125   : > { %6300 = vmatmul.mubr.msk.bf16.gmra.mrb[32].mxu0 %vm696_vm3, %v7121_v3  ;;  %v5960_v34 = vcombine.low %v1397_v26, %v1400_v5  ;;  %v6308_v3 = vld [vmem:[%s7264_s29 + $0x18] sm:$0xf]  ;;  %v1306_v26 = vld [vmem:[%s7264_s29 + $0x64] sm:$0xf]  ;;  %v4210_v19 = vshll.u32 %v6313_v1, 16  ;;  %v4215_v2 = vshrl.u32 %v6314_v53, 16 }
 0x126   : > { %3983 = vmatprep.mubr.bf16.mxu0 %v7185_v4  ;;  %v4167_v9 = vshrl.u32 %v6308_v3, 16  ;;  %v4170_v18 = vshll.u32 %v6308_v3, 16  ;;  %v6311_v5 = vld [vmem:[%s7264_s29 + $0x24] sm:$0xf]  ;;  %v1432_v29 = vsel %vm7444_vm7, %v5948_v16, %v1431_v54  ;;  %v7964_v39 = vrot.slane %v4176_v14, 5 }
 0x127   : > { %v1438_v43 = vrot.slane %v1306_v26, 5  ;;  %v4191_v44 = vshrl.u32 %v6311_v5, 16  ;;  %v4194_v45 = vshll.u32 %v6311_v5, 16  ;;  %v1310_v54 = vld [vmem:[%s7264_s29 + $0x74] sm:$0x1]  ;;  %v4217_v26 = vrot.slane %v4215_v2, 4 }
 0x128   : > { %v4169_v35 = vrot.slane %v4167_v9, 4  ;;  %v4172_v38 = vrot.slane %v4170_v18, 5  ;;  %v1448_v18 = vrot.slane %v1310_v54, 5  ;;  %v1315_v1 = vld [vmem:[%s7264_s29 + $0x88] sm:$0xf] }
 0x129   : > { %v1440_v52 = vrot.slane %v1438_v43, 4  ;;  %v4193_v25 = vrot.slane %v4191_v44, 4  ;;  %v4196_v31 = vrot.slane %v4194_v45, 5  ;;  %v1439_v47 = vsel %vm7444_vm7, %v5949_v61, %v1438_v43  ;;  %v6317_v43 = vld [vmem:[%s7264_s29 + $0x3c] sm:$0xf] }
 0x12a   : > { %5977 = vmatmul.mubr.msk.bf16.gmra.mrb[4].mxu1 %vm696_vm3, %v5959_v62  ;;  %v1434_v62 = vrot.slane %v1304_v58, 5  ;;  %v4173_v63 = vor.u32 %v4172_v38, %v4169_v35  ;;  %v4218_v58 = vshll.u32 %v6314_v53, 16  ;;  %v6316_v38 = vld [vmem:[%s7264_s29 + $0x38] sm:$0x1]  ;;  %v6318_v44 = vld [vmem:[%s7264_s29 + $0x40] sm:$0xf] }
 0x12b   : > { %1657 = vmatprep.mubr.bf16.mxu1 %v7185_v4  ;;  %v1442_v48 = vsel %vm7444_vm7, %v1440_v52, %v1441_v60  ;;  %v4197_v15 = vor.u32 %v4196_v31, %v4193_v25  ;;  %v4242_v28 = vshll.u32 %v6317_v43, 16  ;;  %v4248_v52 = vshll.u32 %v6318_v44, 16 }
 0x12c   : > { %v1435_v32 = vsel %vm7444_vm7, %v1433_v17, %v1434_v62  ;;  %v4174_v13 = vrot.slane %v4173_v63, 4  ;;  %v1312_v62 = vld [vmem:[%s7264_s29 + $0x7c] sm:$0xf]  ;;  %v4220_v5 = vrot.slane %v4218_v58, 5  ;;  %v4234_v63 = vshll.u32 %v6316_v38, 16 }
 0x12d   : > { %6301 = vmatmul.mubr.msk.bf16.gmra.mrb[36].mxu0 %vm696_vm3, %v7122_v24  ;;  %v5964_v24 = vcombine.low %v1425_v8, %v1428_v10  ;;  %v5965_v12 = vcombine.low %v1432_v29, %v1435_v32  ;;  %v5966_v8 = vcombine.low %v1439_v47, %v1442_v48  ;;  %v4198_v14 = vrot.slane %v4197_v15, 4  ;;  %v1311_v29 = vld [vmem:[%s7264_s29 + $0x78] sm:$0xe]  ;;  %v1313_v32 = vld [vmem:[%s7264_s29 + $0x80] sm:$0x1] }
 0x12e   : > { %3993 = vmatprep.mubr.bf16.mxu0 %v7185_v4  ;;  %v4179_v10 = vsel %vm7285_vm4, %v4174_v13, %v7964_v39  ;;  %v4252_v60 = vshrl.u32 %v6318_v44, 16  ;;  %v6321_v47 = vld [vmem:[%s7264_s29 + $0x4c] sm:$0xf]  ;;  %v6319_v13 = vld [vmem:[%s7264_s29 + $0x44] sm:$0x1]  ;;  %v8028_v48 = vrot.slane %v4248_v52, 5 }
 0x12f   : > { %v1459_v15 = vrot.slane %v1315_v1, 5  ;;  %v4272_v2 = vshll.u32 %v6321_v47, 16  ;;  %v4276_v58 = vshrl.u32 %v6321_v47, 16  ;;  %v6324_v38 = vld [vmem:[%s7264_s29 + $0x58] sm:$0xf] }
 0x132   : > { %5978 = vmatmul.mubr.msk.bf16.gmra.mrb[8].mxu1 %vm696_vm3, %v5960_v34  ;;  %v6312_v34 = vld [vmem:[%s7264_s29 + $0x28] sm:$0xf] }
 0x133   : > { %1667 = vmatprep.mubr.bf16.mxu1 %v7185_v4  ;;  %v4204_v55 = vshrl.u32 %v6312_v34, 16 }
 0x135   : > { %6302 = vmatmul.mubr.msk.bf16.gmra.mrb[40].mxu0 %vm696_vm3, %v7123_v40  ;;  %v4182_v40 = vrot.slane %v4180_v21, 4  ;;  %v4206_v37 = vrot.slane %v4204_v55, 4  ;;  %v4212_v21 = vrot.slane %v4210_v19, 5 }
 0x136   : > { %4003 = vmatprep.mubr.bf16.mxu0 %v7185_v4 }
 0x13a   : > { %5979 = vmatmul.mubr.msk.bf16.gmra.mrb[12].mxu1 %vm696_vm3, %v5961_v49  ;;  %v4200_v49 = vshll.u32 %v6312_v34, 16  ;;  %v1452_v34 = vrot.slane %v1312_v62, 5  ;;  %v4258_v62 = vshll.u32 %v6319_v13, 16 }
 0x13b   : > { %1677 = vmatprep.mubr.bf16.mxu1 %v7185_v4 }
 0x13c   : > { %v7975_v33 = vrot.slane %v4200_v49, 5  ;;  %v5951_v49 = vrot.slane %v1311_v29, 9  ;;  %v1454_v55 = vrot.slane %v1452_v34, 4  ;;  %v6323_v29 = vld [vmem:[%s7264_s29 + $0x54] sm:$0xf] }
 0x13d   : > { %6303 = vmatmul.mubr.msk.bf16.gmra.mrb[44].mxu0 %vm696_vm3, %v7124_v22  ;;  %v4183_v22 = vor.u32 %v4182_v40, %v7964_v39  ;;  %v5236_v39 = vsel %vm745_vm0, %v7799_v56, 0  ;;  %v1455_v56 = vrot.slane %v1313_v32, 5 }
 0x13e   : > { %4013 = vmatprep.mubr.bf16.mxu0 %v7185_v4  ;;  %v4203_v45 = vsel %vm7285_vm4, %v4198_v14, %v7975_v33 }
 0x13f   : > { %v4184_v23 = vrot.slane %v4183_v22, 4  ;;  %v4239_v22 = vshrl.u32 %v6317_v43, 16 }
 0x141   : > { %v4189_v16 = vsel %vm7285_vm4, %v4184_v23, %v4188_v11  ;;  %v4241_v23 = vrot.slane %v4239_v22, 4  ;;  %v4244_v11 = vrot.slane %v4242_v28, 5 }
 0x142   : > { %5980 = vmatmul.mubr.msk.bf16.gmra.mrb[16].mxu1 %vm696_vm3, %v5962_v59  ;;  %v1309_v59 = vld [vmem:[%s7264_s29 + $0x70] sm:$0xf]  ;;  %v6357_v35 = vcombine.low %v4179_v10, %v4189_v16 }
 0x143   : > { %1687 = vmatprep.mubr.bf16.mxu1 %v7185_v4  ;;  %v1445_v51 = vrot.slane %v1309_v59, 5  ;;  %v1453_v59 = vsel %vm7444_vm7, %v5951_v49, %v1452_v34  ;;  %v4245_v16 = vor.u32 %v4244_v11, %v4241_v23  ;;  %v1320_v23 = vld [vmem:[%s7264_s29 + $0x9c] sm:$0xe] }
 0x145   : > { %6304 = vmatmul.mubr.msk.bf16.gmra.mrb[48].mxu0 %vm696_vm3, %v7125_v0  ;;  %v6315_v0 = vld [vmem:[%s7264_s29 + $0x34] sm:$0xf]  ;;  %v1447_v9 = vrot.slane %v1445_v51, 4  ;;  %v4246_v34 = vrot.slane %v4245_v16, 4 }
 0x146   : > { %4023 = vmatprep.mubr.bf16.mxu0 %v7185_v4  ;;  %v4224_v3 = vshll.u32 %v6315_v0, 16  ;;  %v4228_v7 = vshrl.u32 %v6315_v0, 16 }
 0x147   : > { %v1449_v41 = vsel %vm7444_vm7, %v1447_v9, %v1448_v18  ;;  %v1461_v9 = vrot.slane %v1459_v15, 4  ;;  %v4251_v22 = vsel %vm7285_vm4, %v4246_v34, %v8028_v48 }
 0x148   : > { %v4230_v36 = vrot.slane %v4228_v7, 4 }
 0x14a   : > { %5981 = vmatmul.mubr.msk.bf16.gmra.mrb[20].mxu1 %vm696_vm3, %v5963_v50  ;;  %v1308_v50 = vld [vmem:[%s7264_s29 + $0x6c] sm:$0xe] }
 0x14b   : > { %1697 = vmatprep.mubr.bf16.mxu1 %v7185_v4  ;;  %v5950_v17 = vrot.slane %v1308_v50, 9  ;;  %v4254_v50 = vrot.slane %v4252_v60, 4 }
 0x14d   : > { %6305 = vmatmul.mubr.msk.bf16.gmra.mrb[52].mxu0 %vm696_vm3, %v7126_v27  ;;  %v4207_v27 = vor.u32 %v4206_v37, %v7975_v33  ;;  %v1446_v40 = vsel %vm7444_vm7, %v5950_v17, %v1445_v51  ;;  %v6320_v33 = vld [vmem:[%s7264_s29 + $0x48] sm:$0xf]  ;;  %v1456_v37 = vsel %vm7444_vm7, %v1454_v55, %v1455_v56  ;;  %v1314_v51 = vld [vmem:[%s7264_s29 + $0x84] sm:$0xe]  ;;  %v4255_v17 = vor.u32 %v4254_v50, %v8028_v48  ;;  %v6326_v48 = vld [vmem:[%s7264_s29 + $0x60] sm:$0xf] }
 0x14e   : > { %4033 = vmatprep.mubr.bf16.mxu0 %v7185_v4  ;;  %v5967_v25 = vcombine.low %v1446_v40, %v1449_v41  ;;  %v4263_v19 = vshrl.u32 %v6320_v33, 16  ;;  %v4266_v54 = vshll.u32 %v6320_v33, 16  ;;  %v5952_v10 = vrot.slane %v1314_v51, 9  ;;  %v1317_v41 = vld [vmem:[%s7264_s29 + $0x90] sm:$0xe] }
 0x14f   : > { %v4287_v56 = vshrl.u32 %v6323_v29, 16  ;;  %v4290_v55 = vshll.u32 %v6323_v29, 16  ;;  %v5953_v52 = vrot.slane %v1317_v41, 9  ;;  %v6329_v41 = vld [vmem:[%s7264_s29 + $0x6c] sm:$0xf] }
 0x150   : > { %v4265_v14 = vrot.slane %v4263_v19, 4  ;;  %v6327_v19 = vld [vmem:[%s7264_s29 + $0x64] sm:$0xf] }
 0x152   : > { %5982 = vmatmul.mubr.msk.bf16.gmra.mrb[24].mxu1 %vm696_vm3, %v5964_v24  ;;  %v4208_v24 = vrot.slane %v4207_v27, 4  ;;  %v1316_v27 = vld [vmem:[%s7264_s29 + $0x8c] sm:$0x1] }
 0x153   : > { %1707 = vmatprep.mubr.bf16.mxu1 %v7185_v4  ;;  %v1462_v18 = vrot.slane %v1316_v27, 5 }
 0x154   : > { %v4213_v46 = vsel %vm7285_vm4, %v4208_v24, %v4212_v21  ;;  %v4268_v21 = vrot.slane %v4266_v54, 5  ;;  %v1318_v24 = vld [vmem:[%s7264_s29 + $0x94] sm:$0xf] }
 0x155   : > { %6306 = vmatmul.mubr.msk.bf16.gmra.mrb[56].mxu0 %vm696_vm3, %v7127_v20  ;;  %v7997_v20 = vrot.slane %v4224_v3, 5  ;;  %v6358_v31 = vcombine.low %v4203_v45, %v4213_v46  ;;  %v5968_v3 = vcombine.low %v1453_v59, %v1456_v37  ;;  %v1463_v40 = vsel %vm7444_vm7, %v1461_v9, %v1462_v18  ;;  %v1319_v45 = vld [vmem:[%s7264_s29 + $0x98] sm:$0x1]  ;;  %v1321_v59 = vld [vmem:[%s7264_s29 + $0xa0] sm:$0xf] }
 0x156   : > { %4043 = vmatprep.mubr.bf16.mxu0 %v7185_v4  ;;  %v1466_v43 = vrot.slane %v1318_v24, 5  ;;  %v4269_v44 = vor.u32 %v4268_v21, %v4265_v14  ;;  %v4289_v37 = vrot.slane %v4287_v56, 4  ;;  %v1473_v11 = vrot.slane %v1321_v59, 5  ;;  %v1324_v24 = vld [vmem:[%s7264_s29 + $0xac] sm:$0xf] }
 0x157   : > { %v4231_v61 = vor.u32 %v4230_v36, %v7997_v20  ;;  %v4256_v36 = vrot.slane %v4255_v17, 4  ;;  %v4324_v9 = vshrl.u32 %v6327_v19, 16 }
 0x158   : > { %v1468_v60 = vrot.slane %v1466_v43, 4  ;;  %v1467_v50 = vsel %vm7444_vm7, %v5953_v52, %v1466_v43  ;;  %v1475_v16 = vrot.slane %v1473_v11, 4 }
 0x159   : > { %v4232_v0 = vrot.slane %v4231_v61, 4  ;;  %v4300_v61 = vshrl.u32 %v6324_v38, 16 }
 0x15a   : > { %5983 = vmatmul.mubr.msk.bf16.gmra.mrb[28].mxu1 %vm696_vm3, %v5965_v12  ;;  %v4221_v12 = vor.u32 %v4220_v5, %v4217_v26  ;;  %v8043_v26 = vrot.slane %v4272_v2, 5  ;;  %v4278_v5 = vrot.slane %v4276_v58, 4 }
 0x15b   : > { %1717 = vmatprep.mubr.bf16.mxu1 %v7185_v4  ;;  %v4302_v47 = vrot.slane %v4300_v61, 4 }
 0x15c   : > { %v4222_v53 = vrot.slane %v4221_v12, 4  ;;  %v4279_v46 = vor.u32 %v4278_v5, %v8043_v26  ;;  %v4296_v12 = vshll.u32 %v6324_v38, 16  ;;  %v4326_v38 = vrot.slane %v4324_v9, 4 }
 0x15d   : > { %6307 = vmatmul.mubr.msk.bf16.gmra.mrb[60].mxu0 %vm696_vm3, %v7128_v30  ;;  %v4236_v30 = vrot.slane %v4234_v63, 5 }
 0x15e   : > { %4695 = vmatprep.mubr.bf16.mxu0 %v7185_v4  ;;  %v4227_v7 = vsel %vm7285_vm4, %v4222_v53, %v7997_v20  ;;  %v6322_v20 = vld [vmem:[%s7264_s29 + $0x50] sm:$0x1]  ;;  %v4280_v1 = vrot.slane %v4279_v46, 4  ;;  %v4292_v53 = vrot.slane %v4290_v55, 5 }
 0x15f   : > { %v4282_v49 = vshll.u32 %v6322_v20, 16 }
 0x160   : > { %v4293_v2 = vor.u32 %v4292_v53, %v4289_v37  ;;  %v6332_v37 = vld [vmem:[%s7264_s29 + $0x78] sm:$0xf]  ;;  %v6333_v53 = vld [vmem:[%s7264_s29 + $0x7c] sm:$0xf] }
 0x161   : > { %v4284_v33 = vrot.slane %v4282_v49, 5 }
 0x162   : > { %5984 = vmatmul.mubr.msk.bf16.gmra.mrb[32].mxu1 %vm696_vm3, %v5966_v8  ;;  %v4237_v8 = vsel %vm7285_vm4, %v4232_v0, %v4236_v30  ;;  %v6325_v0 = vld [vmem:[%s7264_s29 + $0x5c] sm:$0x1]  ;;  %v8066_v30 = vrot.slane %v4296_v12, 5  ;;  %v4294_v21 = vrot.slane %v4293_v2, 4  ;;  %v4368_v2 = vshll.u32 %v6333_v53, 16 }
 0x163   : > { %1727 = vmatprep.mubr.bf16.mxu1 %v7185_v4  ;;  %v6359_v32 = vcombine.low %v4227_v7, %v4237_v8  ;;  %v4285_v27 = vsel %vm7285_vm4, %v4280_v1, %v4284_v33  ;;  %v4306_v58 = vshll.u32 %v6325_v0, 16  ;;  %v4311_v8 = vshrl.u32 %v6326_v48, 16 }
 0x164   : > { %v4303_v7 = vor.u32 %v4302_v47, %v8066_v30  ;;  %v4299_v43 = vsel %vm7285_vm4, %v4294_v21, %v8066_v30  ;;  %v6331_v47 = vld [vmem:[%s7264_s29 + $0x74] sm:$0x1] }
 0x165   : > { %6375 = vmatmul.mubr.msk.bf16.vlgmr.msra.gmra.mrb[0].mxu0 %vm696_vm3, %v6357_v35  ;;  %v4260_v35 = vrot.slane %v4258_v62, 5  ;;  %v4320_v62 = vshll.u32 %v6327_v19, 16  ;;  %v4308_v5 = vrot.slane %v4306_v58, 5  ;;  %v4313_v20 = vrot.slane %v4311_v8, 4  ;;  %v1328_v19 = vld [vmem:[%s7264_s29 + $0xbc] sm:$0x1] }
 0x166   : > { %5242 = vmatpush1.bf16.msra.mxu0 %v5236_v39  ;;  %4705 = vmatprep.mubr.bf16.mxu0 %v7185_v4  ;;  %v1460_v39 = vsel %vm7444_vm7, %v5952_v10, %v1459_v15  ;;  %v1322_v15 = vld [vmem:[%s7264_s29 + $0xa4] sm:$0x1]  ;;  %v4314_v10 = vshll.u32 %v6326_v48, 16  ;;  %v1326_v48 = vld [vmem:[%s7264_s29 + $0xb4] sm:$0xe]  ;;  %v4372_v58 = vshrl.u32 %v6333_v53, 16 }
 0x167   : > { %v5969_v63 = vcombine.low %v1460_v39, %v1463_v40  ;;  %v4261_v28 = vsel %vm7285_vm4, %v4256_v36, %v4260_v35  ;;  %v1476_v17 = vrot.slane %v1322_v15, 5  ;;  %v6328_v36 = vld [vmem:[%s7264_s29 + $0x68] sm:$0x1]  ;;  %v8092_v35 = vrot.slane %v4320_v62, 5  ;;  %v1323_v39 = vld [vmem:[%s7264_s29 + $0xa8] sm:$0xe] }
 0x168   : > { %v6360_v13 = vcombine.low %v4251_v22, %v4261_v28  ;;  %v4316_v29 = vrot.slane %v4314_v10, 5  ;;  %v1480_v40 = vrot.slane %v1324_v24, 5  ;;  %v4330_v55 = vshll.u32 %v6328_v36, 16 }
 0x169   : > { %v1477_v34 = vsel %vm7444_vm7, %v1475_v16, %v1476_v17  ;;  %v5955_v12 = vrot.slane %v1323_v39, 9  ;;  %v4327_v61 = vor.u32 %v4326_v38, %v8092_v35  ;;  %v4338_v22 = vshll.u32 %v6329_v41, 16 }
 0x16a   : > { %5985 = vmatmul.mubr.msk.bf16.gmra.mrb[36].mxu1 %vm696_vm3, %v5967_v25  ;;  %v1469_v25 = vrot.slane %v1319_v45, 5  ;;  %v6330_v45 = vld [vmem:[%s7264_s29 + $0x70] sm:$0xf]  ;;  %v4317_v56 = vor.u32 %v4316_v29, %v4313_v20  ;;  %v1482_v28 = vrot.slane %v1480_v40, 4  ;;  %v4332_v33 = vrot.slane %v4330_v55, 5 }
 0x16b   : > { %1737 = vmatprep.mubr.bf16.mxu1 %v7185_v4  ;;  %v1481_v0 = vsel %vm7444_vm7, %v5955_v12, %v1480_v40  ;;  %v4328_v30 = vrot.slane %v4327_v61, 4  ;;  %v4354_v16 = vshll.u32 %v6331_v47, 16  ;;  %v5956_v17 = vrot.slane %v1326_v48, 9  ;;  %v6335_v29 = vld [vmem:[%s7264_s29 + $0x84] sm:$0xf] }
 0x16c   : > { %v1470_v51 = vsel %vm7444_vm7, %v1468_v60, %v1469_v25  ;;  %v4344_v60 = vshll.u32 %v6330_v45, 16  ;;  %v4348_v25 = vshrl.u32 %v6330_v45, 16  ;;  %v4318_v1 = vrot.slane %v4317_v56, 4 }
 0x16d   : > { %6376 = vmatmul.mubr.msk.bf16.gmra.mrb[4].mxu0 %vm696_vm3, %v6358_v31  ;;  %v4270_v31 = vrot.slane %v4269_v44, 4  ;;  %v5970_v18 = vcombine.low %v1467_v50, %v1470_v51  ;;  %v1325_v44 = vld [vmem:[%s7264_s29 + $0xb0] sm:$0x1]  ;;  %v4333_v8 = vsel %vm7285_vm4, %v4328_v30, %v4332_v33  ;;  %v1490_v9 = vrot.slane %v1328_v19, 5  ;;  %v6339_v33 = vld [vmem:[%s7264_s29 + $0x94] sm:$0xf] }
 0x16e   : > { %4715 = vmatprep.mubr.bf16.mxu0 %v7185_v4  ;;  %v1483_v52 = vrot.slane %v1325_v44, 5  ;;  %v4346_v51 = vrot.slane %v4344_v60, 5  ;;  %v4350_v15 = vrot.slane %v4348_v25, 4  ;;  %v4370_v24 = vrot.slane %v4368_v2, 5 }
 0x16f   : > { %v4275_v54 = vsel %vm7285_vm4, %v4270_v31, %v8043_v26  ;;  %v4304_v26 = vrot.slane %v4303_v7, 4  ;;  %v1327_v31 = vld [vmem:[%s7264_s29 + $0xb8] sm:$0xf]  ;;  %v4356_v38 = vrot.slane %v4354_v16, 5  ;;  %v4383_v44 = vshrl.u32 %v6335_v29, 16 }
 0x170   : > { %v6361_v14 = vcombine.low %v4275_v54, %v4285_v27  ;;  %v1487_v50 = vrot.slane %v1327_v31, 5  ;;  %v4359_v54 = vshrl.u32 %v6332_v37, 16  ;;  %v4362_v27 = vshll.u32 %v6332_v37, 16 }
 0x171   : > { %v4309_v49 = vsel %vm7285_vm4, %v4304_v26, %v4308_v5  ;;  %v4374_v26 = vrot.slane %v4372_v58, 4  ;;  %v6334_v5 = vld [vmem:[%s7264_s29 + $0x80] sm:$0x1]  ;;  %v4386_v45 = vshll.u32 %v6335_v29, 16  ;;  %v4420_v48 = vshrl.u32 %v6339_v33, 16 }
 0x172   : > { %5986 = vmatmul.mubr.msk.bf16.gmra.mrb[40].mxu1 %vm696_vm3, %v5968_v3  ;;  %v5954_v3 = vrot.slane %v1320_v23, 9  ;;  %v6362_v59 = vcombine.low %v4299_v43, %v4309_v49  ;;  %v4340_v23 = vrot.slane %v4338_v22, 5  ;;  %v1489_v62 = vrot.slane %v1487_v50, 4 }
 0x173   : > { %1747 = vmatprep.mubr.bf16.mxu1 %v7185_v4  ;;  %v4364_v21 = vrot.slane %v4362_v27, 5  ;;  %v4378_v43 = vshll.u32 %v6334_v5, 16  ;;  %v6344_v5 = vld [vmem:[%s7264_s29 + $0xa8] sm:$0xf] }
 0x174   : > { %v1491_v39 = vsel %vm7444_vm7, %v1489_v62, %v1490_v9 }
 0x175   : > { %6377 = vmatmul.mubr.msk.bf16.gmra.mrb[8].mxu0 %vm696_vm3, %v6359_v32  ;;  %v1474_v32 = vsel %vm7444_vm7, %v5954_v3, %v1473_v11  ;;  %v1484_v11 = vsel %vm7444_vm7, %v1482_v28, %v1483_v52  ;;  %v4323_v3 = vsel %vm7285_vm4, %v4318_v1, %v8092_v35  ;;  %v4380_v22 = vrot.slane %v4378_v43, 5  ;;  %v6338_v1 = vld [vmem:[%s7264_s29 + $0x90] sm:$0xf] }
 0x176   : > { %4725 = vmatprep.mubr.bf16.mxu0 %v7185_v4  ;;  %v5971_v46 = vcombine.low %v1474_v32, %v1477_v34  ;;  %v5972_v7 = vcombine.low %v1481_v0, %v1484_v11  ;;  %v6363_v20 = vcombine.low %v4323_v3, %v4333_v8  ;;  %v6336_v32 = vld [vmem:[%s7264_s29 + $0x88] sm:$0xf]  ;;  %v1488_v34 = vsel %vm7444_vm7, %v5956_v17, %v1487_v50  ;;  %v7129_v50 = vld [vmem:[%s7264_s29 + $0xc] sm:$0xff]   ;;  %v6341_v8 = vld [vmem:[%s7264_s29 + $0x9c] sm:$0xf] }
 0x177   : > { %v4396_v49 = vshrl.u32 %v6336_v32, 16  ;;  %v5973_v56 = vcombine.low %v1488_v34, %v1491_v39  ;;  %v4385_v28 = vrot.slane %v4383_v44, 4  ;;  %v4388_v52 = vrot.slane %v4386_v45, 5 }
 0x178   : > { %v4416_v11 = vshll.u32 %v6339_v33, 16  ;;  %v4422_v3 = vrot.slane %v4420_v48, 4  ;;  %v4455_v43 = vshrl.u32 %v6344_v5, 16  ;;  %v4458_v44 = vshll.u32 %v6344_v5, 16 }
 0x179   : > { %v4398_v25 = vrot.slane %v4396_v49, 4  ;;  %v4389_v0 = vor.u32 %v4388_v52, %v4385_v28 }
 0x17a   : > { %5987 = vmatmul.mubr.msk.bf16.gmra.mrb[44].mxu1 %vm696_vm3, %v5969_v63  ;;  %v4335_v63 = vshrl.u32 %v6329_v41, 16  ;;  %v4375_v41 = vor.u32 %v4374_v26, %v4370_v24  ;;  %v4418_v58 = vrot.slane %v4416_v11, 5  ;;  %v4460_v28 = vrot.slane %v4458_v44, 5  ;;  %v6354_v44 = vld [vmem:[%s7264_s29 + $0xd0] sm:$0xf] }
 0x17b   : > { %1757 = vmatprep.mubr.bf16.mxu1 %v7185_v4 }
 0x17c   : > { %v4423_v9 = vor.u32 %v4422_v3, %v4418_v58 }
 0x17d   : > { %6378 = vmatmul.mubr.msk.bf16.gmra.mrb[12].mxu0 %vm696_vm3, %v6360_v13  ;;  %v4337_v13 = vrot.slane %v4335_v63, 4  ;;  %v4376_v63 = vrot.slane %v4375_v41, 4  ;;  %v6343_v41 = vld [vmem:[%s7264_s29 + $0xa4] sm:$0x1] }
 0x17e   : > { %4735 = vmatprep.mubr.bf16.mxu0 %v7185_v4  ;;  %v4424_v34 = vrot.slane %v4423_v9, 4 }
 0x17f   : > { %v4341_v10 = vor.u32 %v4340_v23, %v4337_v13  ;;  %v4381_v53 = vsel %vm7285_vm4, %v4376_v63, %v4380_v22  ;;  %v4407_v13 = vshrl.u32 %v6338_v1, 16  ;;  %v4410_v23 = vshll.u32 %v6338_v1, 16  ;;  %v6348_v1 = vld [vmem:[%s7264_s29 + $0xb8] sm:$0xf] }
 0x180   : > { %v4450_v63 = vshll.u32 %v6343_v41, 16  ;;  %v4457_v22 = vrot.slane %v4455_v43, 4  ;;  %v4488_v11 = vshll.u32 %v6348_v1, 16  ;;  %v4492_v48 = vshrl.u32 %v6348_v1, 16  ;;  %v6352_v41 = vld [vmem:[%s7264_s29 + $0xc8] sm:$0x1] }
 0x181   : > { %v4342_v36 = vrot.slane %v4341_v10, 4  ;;  %v4409_v27 = vrot.slane %v4407_v13, 4  ;;  %v4412_v2 = vrot.slane %v4410_v23, 5  ;;  %v6342_v10 = vld [vmem:[%s7264_s29 + $0xa0] sm:$0xf] }
 0x182   : > { %5988 = vmatmul.mubr.msk.bf16.gmra.mrb[48].mxu1 %vm696_vm3, %v5970_v18  ;;  %v4351_v18 = vor.u32 %v4350_v15, %v4346_v51  ;;  %v4390_v15 = vrot.slane %v4389_v0, 4  ;;  %v4444_v26 = vshrl.u32 %v6342_v10, 16  ;;  %v4461_v0 = vor.u32 %v4460_v28, %v4457_v22  ;;  %v6353_v43 = vld [vmem:[%s7264_s29 + $0xcc] sm:$0xf] }
 0x183   : > { %1767 = vmatprep.mubr.bf16.mxu1 %v7185_v4  ;;  %v4347_v55 = vsel %vm7285_vm4, %v4342_v36, %v4346_v51  ;;  %v4413_v62 = vor.u32 %v4412_v2, %v4409_v27  ;;  %v4490_v3 = vrot.slane %v4488_v11, 5  ;;  %v4536_v22 = vshll.u32 %v6354_v44, 16 }
 0x184   : > { %v4352_v35 = vrot.slane %v4351_v18, 4  ;;  %v4540_v28 = vshrl.u32 %v6354_v44, 16 }
 0x185   : > { %6379 = vmatmul.mubr.msk.bf16.gmra.mrb[16].mxu0 %vm696_vm3, %v6361_v14  ;;  %v4361_v14 = vrot.slane %v4359_v54, 4 }
 0x186   : > { %4745 = vmatprep.mubr.bf16.mxu0 %v7185_v4  ;;  %v4357_v12 = vsel %vm7285_vm4, %v4352_v35, %v4356_v38 }
 0x187   : > { %v4365_v40 = vor.u32 %v4364_v21, %v4361_v14  ;;  %v6364_v31 = vcombine.low %v4347_v55, %v4357_v12  ;;  %v4431_v14 = vshrl.u32 %v6341_v8, 16  ;;  %v4434_v21 = vshll.u32 %v6341_v8, 16 }
 0x189   : > { %v4366_v61 = vrot.slane %v4365_v40, 4  ;;  %v4433_v35 = vrot.slane %v4431_v14, 4  ;;  %v4436_v38 = vrot.slane %v4434_v21, 5  ;;  %v4446_v40 = vrot.slane %v4444_v26, 4 }
 0x18a   : > { %5989 = vmatmul.mubr.msk.bf16.gmra.mrb[52].mxu1 %vm696_vm3, %v5971_v46  ;;  %v4392_v46 = vshll.u32 %v6336_v32, 16  ;;  %v4414_v32 = vrot.slane %v4413_v62, 4 }
 0x18b   : > { %1777 = vmatprep.mubr.bf16.mxu1 %v7185_v4  ;;  %v4371_v37 = vsel %vm7285_vm4, %v4366_v61, %v4370_v24  ;;  %v4440_v24 = vshll.u32 %v6342_v10, 16  ;;  %v4437_v12 = vor.u32 %v4436_v38, %v4433_v35  ;;  %v6349_v10 = vld [vmem:[%s7264_s29 + $0xbc] sm:$0x1] }
 0x18c   : > { %v4394_v60 = vrot.slane %v4392_v46, 5  ;;  %v6365_v51 = vcombine.low %v4371_v37, %v4381_v53  ;;  %v4419_v49 = vsel %vm7285_vm4, %v4414_v32, %v4418_v58  ;;  %v4452_v53 = vrot.slane %v4450_v63, 5 }
 0x18d   : > { %6380 = vmatmul.mubr.msk.bf16.gmra.mrb[20].mxu0 %vm696_vm3, %v6362_v59  ;;  %v6337_v59 = vld [vmem:[%s7264_s29 + $0x8c] sm:$0x1]  ;;  %v4442_v39 = vrot.slane %v4440_v24, 5  ;;  %v4438_v33 = vrot.slane %v4437_v12, 4  ;;  %v4498_v14 = vshll.u32 %v6349_v10, 16  ;;  %v4530_v63 = vshll.u32 %v6353_v43, 16 }
 0x18e   : > { %4755 = vmatprep.mubr.bf16.mxu0 %v7185_v4  ;;  %v4399_v30 = vor.u32 %v4398_v25, %v4394_v60  ;;  %v4402_v47 = vshll.u32 %v6337_v59, 16  ;;  %v4395_v16 = vsel %vm7285_vm4, %v4390_v15, %v4394_v60  ;;  %v6346_v25 = vld [vmem:[%s7264_s29 + $0xb0] sm:$0x1]  ;;  %v6347_v59 = vld [vmem:[%s7264_s29 + $0xb4] sm:$0xf]  ;;  %v7134_v12 = vld [vmem:[%s7264_s29 + $0x48] sm:$0xff]  }
 0x18f   : > { %v4447_v61 = vor.u32 %v4446_v40, %v4442_v39  ;;  %v4479_v13 = vshrl.u32 %v6347_v59, 16  ;;  %v4482_v23 = vshll.u32 %v6347_v59, 16  ;;  %v4532_v1 = vrot.slane %v4530_v63, 5  ;;  %v6402_v63 = vld [vmem:[%s7264_s29 + $0x44] sm:$0x1] }
 0x190   : > { %v4400_v19 = vrot.slane %v4399_v30, 4  ;;  %v4404_v54 = vrot.slane %v4402_v47, 5  ;;  %v4474_v47 = vshll.u32 %v6346_v25, 16 }
 0x191   : > { %v4448_v37 = vrot.slane %v4447_v61, 4  ;;  %v4481_v2 = vrot.slane %v4479_v13, 4  ;;  %v4484_v58 = vrot.slane %v4482_v23, 5  ;;  %v4527_v61 = vshrl.u32 %v6353_v43, 16 }
 0x192   : > { %5990 = vmatmul.mubr.msk.bf16.gmra.mrb[56].mxu1 %vm696_vm3, %v5972_v7  ;;  %v6340_v7 = vld [vmem:[%s7264_s29 + $0x98] sm:$0x1]  ;;  %v4405_v17 = vsel %vm7285_vm4, %v4400_v19, %v4404_v54  ;;  %v4462_v19 = vrot.slane %v4461_v0, 4  ;;  %v4476_v27 = vrot.slane %v4474_v47, 5 }
 0x193   : > { %1787 = vmatprep.mubr.bf16.mxu1 %v7185_v4  ;;  %v4426_v18 = vshll.u32 %v6340_v7, 16  ;;  %v6366_v29 = vcombine.low %v4395_v16, %v4405_v17  ;;  %v4453_v15 = vsel %vm7285_vm4, %v4448_v37, %v4452_v53  ;;  %v4494_v7 = vrot.slane %v4492_v48, 4  ;;  %v6350_v16 = vld [vmem:[%s7264_s29 + $0xc0] sm:$0xf]  ;;  %v6351_v17 = vld [vmem:[%s7264_s29 + $0xc4] sm:$0xf] }
 0x194   : > { %v4503_v21 = vshrl.u32 %v6350_v16, 16  ;;  %v4506_v24 = vshll.u32 %v6350_v16, 16  ;;  %v4512_v26 = vshll.u32 %v6351_v17, 16  ;;  %v4516_v5 = vshrl.u32 %v6351_v17, 16  ;;  %v6355_v53 = vld [vmem:[%s7264_s29 + $0xd4] sm:$0x1] }
 0x195   : > { %6381 = vmatmul.mubr.msk.bf16.gmra.mrb[24].mxu0 %vm696_vm3, %v6363_v20  ;;  %v6345_v20 = vld [vmem:[%s7264_s29 + $0xac] sm:$0xf]  ;;  %v4428_v36 = vrot.slane %v4426_v18, 5  ;;  %v4485_v18 = vor.u32 %v4484_v58, %v4481_v2  ;;  %v4529_v59 = vrot.slane %v4527_v61, 4  ;;  %v4542_v37 = vrot.slane %v4540_v28, 4 }
 0x196   : > { %4765 = vmatprep.mubr.bf16.mxu0 %v7185_v4  ;;  %v4464_v45 = vshll.u32 %v6345_v20, 16  ;;  %v4468_v46 = vshrl.u32 %v6345_v20, 16  ;;  %v7133_v20 = vld [vmem:[%s7264_s29 + $0x3c] sm:$0xff]   ;;  %v4505_v35 = vrot.slane %v4503_v21, 4  ;;  %v4508_v38 = vrot.slane %v4506_v24, 5 }
 0x197   : > { %v4429_v55 = vsel %vm7285_vm4, %v4424_v34, %v4428_v36  ;;  %v4486_v32 = vrot.slane %v4485_v18, 4  ;;  %v4500_v36 = vrot.slane %v4498_v14, 5  ;;  %v4518_v40 = vrot.slane %v4516_v5, 4  ;;  %v6394_v21 = vld [vmem:[%s7264_s29 + $0x24] sm:$0xe] }
 0x198   : > { %v4466_v52 = vrot.slane %v4464_v45, 5  ;;  %v4470_v60 = vrot.slane %v4468_v46, 4  ;;  %v4533_v13 = vor.u32 %v4532_v1, %v4529_v59  ;;  %v4546_v11 = vshll.u32 %v6355_v53, 16  ;;  %v6396_v24 = vld [vmem:[%s7264_s29 + $0x2c] sm:$0x1] }
 0x199   : > { %v4491_v45 = vsel %vm7285_vm4, %v4486_v32, %v4490_v3  ;;  %v6440_v5 = vrot.slane %v6394_v21, 9  ;;  %v6398_v32 = vld [vmem:[%s7264_s29 + $0x34] sm:$0xf]  ;;  %v6400_v61 = vld [vmem:[%s7264_s29 + $0x3c] sm:$0xe] }
 0x19a   : > { %5991 = vmatmul.mubr.msk.bf16.gmra.mrb[60].mxu1 %vm696_vm3, %v5973_v56  ;;  %v7131_v56 = vld [vmem:[%s7264_s29 + $0x24] sm:$0xff]   ;;  %v4471_v30 = vor.u32 %v4470_v60, %v4466_v52  ;;  %v4467_v62 = vsel %vm7285_vm4, %v4462_v19, %v4466_v52  ;;  %v6392_v19 = vld [vmem:[%s7264_s29 + $0x1c] sm:$0xf]  ;;  %v6442_v28 = vrot.slane %v6400_v61, 9  ;;  %v6405_v53 = vld [vmem:[%s7264_s29 + $0x50] sm:$0x1] }
 0x19b   : > { %2075 = vmatprep.mubr.bf16.mxu1 %v7185_v4  ;;  %v5018_v58 = vrot.slane %v6392_v19, 5  ;;  %v6408_v19 = vld [vmem:[%s7264_s29 + $0x5c] sm:$0x1] }
 0x19c   : > { %v4472_v54 = vrot.slane %v4471_v30, 4  ;;  %v7135_v30 = vld [vmem:[%s7264_s29 + $0x54] sm:$0xff]  }
 0x19d   : > { %6382 = vmatmul.mubr.msk.bf16.gmra.mrb[28].mxu0 %vm696_vm3, %v6364_v31  ;;  %v6367_v31 = vcombine.low %v4419_v49, %v4429_v55  ;;  %v4509_v49 = vor.u32 %v4508_v38, %v4505_v35  ;;  %v4522_v55 = vshll.u32 %v6352_v41, 16  ;;  %v5020_v16 = vrot.slane %v5018_v58, 4 }
 0x19e   : > { %4775 = vmatprep.mubr.bf16.mxu0 %v7185_v4  ;;  %v4477_v9 = vsel %vm7285_vm4, %v4472_v54, %v4476_v27  ;;  %v7136_v54 = vld [vmem:[%s7264_s29 + $0x60] sm:$0xff]   ;;  %v5032_v38 = vrot.slane %v6398_v32, 5 }
 0x19f   : > { %v4510_v60 = vrot.slane %v4509_v49, 4  ;;  %v7139_v49 = vld [vmem:[%s7264_s29 + $0x84] sm:$0xff]  }
 0x1a0   : > { %v5034_v44 = vrot.slane %v5032_v38, 4 }
 0x1a2   : > { %6043 = vmatmul.mubr.msk.bf16.vlgmr.msra.gmra.mrb[0].mxu1 %vm696_vm3, %v7129_v50  ;;  %v7132_v50 = vld [vmem:[%s7264_s29 + $0x30] sm:$0xff]  }
 0x1a3   : > { %6558 = vmatpush1.bf16.msra.mxu1 %v7236_v6  ;;  %2085 = vmatprep.mubr.bf16.mxu1 %v7185_v4  ;;  %v7130_v6 = vld [vmem:[%s7264_s29 + $0x18] sm:$0xff]  }
 0x1a5   : > { %6383 = vmatmul.mubr.msk.bf16.gmra.mrb[32].mxu0 %vm696_vm3, %v6365_v51  ;;  %v4443_v51 = vsel %vm7285_vm4, %v4438_v33, %v4442_v39  ;;  %v4514_v39 = vrot.slane %v4512_v26, 5  ;;  %v4538_v33 = vrot.slane %v4536_v22, 5 }
 0x1a6   : > { %4785 = vmatprep.mubr.bf16.mxu0 %v7185_v4  ;;  %v6368_v8 = vcombine.low %v4443_v51, %v4453_v15  ;;  %v4548_v15 = vrot.slane %v4546_v11, 5  ;;  %v7141_v11 = vld [vmem:[%s7264_s29 + $0x9c] sm:$0xff]  }
 0x1a7   : > { %v4515_v0 = vsel %vm7285_vm4, %v4510_v60, %v4514_v39  ;;  %v4543_v23 = vor.u32 %v4542_v37, %v4538_v33  ;;  %v5042_v60 = vrot.slane %v6402_v63, 5  ;;  %v6403_v37 = vld [vmem:[%s7264_s29 + $0x48] sm:$0xe] }
 0x1a9   : > { %v4544_v51 = vrot.slane %v4543_v23, 4  ;;  %v6407_v23 = vld [vmem:[%s7264_s29 + $0x58] sm:$0xf] }
 0x1aa   : > { %6044 = vmatmul.mubr.msk.bf16.gmra.mrb[4].mxu1 %vm696_vm3, %v7130_v6  ;;  %v4495_v6 = vor.u32 %v4494_v7, %v4490_v3  ;;  %v6391_v3 = vld [vmem:[%s7264_s29 + $0x18] sm:$0xe]  ;;  %v6393_v7 = vld [vmem:[%s7264_s29 + $0x20] sm:$0x1] }
 0x1ab   : > { %2095 = vmatprep.mubr.bf16.mxu1 %v7185_v4  ;;  %v4549_v2 = vsel %vm7285_vm4, %v4544_v51, %v4548_v15  ;;  %v6439_v10 = vrot.slane %v6391_v3, 9  ;;  %v5021_v17 = vrot.slane %v6393_v7, 5  ;;  %v5053_v51 = vrot.slane %v6407_v23, 5  ;;  %v6406_v15 = vld [vmem:[%s7264_s29 + $0x54] sm:$0xe] }
 0x1ac   : > { %v4496_v34 = vrot.slane %v4495_v6, 4  ;;  %v5056_v3 = vrot.slane %v6408_v19, 5  ;;  %v6409_v7 = vld [vmem:[%s7264_s29 + $0x60] sm:$0xe]  ;;  %v6088_v19 = vld [vmem:[%s7264_s29 + $0x80] sm:$0x1] }
 0x1ad   : > { %6384 = vmatmul.mubr.msk.bf16.gmra.mrb[36].mxu0 %vm696_vm3, %v6366_v29  ;;  %v6369_v29 = vcombine.low %v4467_v62, %v4477_v9  ;;  %v6395_v62 = vld [vmem:[%s7264_s29 + $0x28] sm:$0xf]  ;;  %v7137_v9 = vld [vmem:[%s7264_s29 + $0x6c] sm:$0xff]   ;;  %v5019_v18 = vsel %vm7444_vm7, %v6439_v10, %v5018_v58  ;;  %v5022_v6 = vsel %vm7444_vm7, %v5020_v16, %v5021_v17  ;;  %v5055_v58 = vrot.slane %v5053_v51, 4 }
 0x1ae   : > { %4795 = vmatprep.mubr.bf16.mxu0 %v7185_v4  ;;  %v4501_v46 = vsel %vm7285_vm4, %v4496_v34, %v4500_v36  ;;  %v5025_v14 = vrot.slane %v6395_v62, 5  ;;  %v6456_v26 = vcombine.low %v5019_v18, %v5022_v6  ;;  %v7138_v34 = vld [vmem:[%s7264_s29 + $0x78] sm:$0xff]   ;;  %v6411_v10 = vld [vmem:[%s7264_s29 + $0x68] sm:$0x1]  ;;  %v6083_v16 = vld [vmem:[%s7264_s29 + $0x6c] sm:$0xf] }
 0x1af   : > { %v6370_v52 = vcombine.low %v4491_v45, %v4501_v46  ;;  %v6401_v46 = vld [vmem:[%s7264_s29 + $0x40] sm:$0xf]  ;;  %v7142_v17 = vld [vmem:[%s7264_s29 + $0xa8] sm:$0xff]   ;;  %v6084_v18 = vld [vmem:[%s7264_s29 + $0x70] sm:$0xf]  ;;  %v6445_v6 = vrot.slane %v6409_v7, 9 }
 0x1b0   : > { %v5026_v36 = vsel %vm7444_vm7, %v6440_v5, %v5025_v14  ;;  %v5063_v21 = vrot.slane %v6411_v10, 5  ;;  %v2554_v32 = vshrl.u32 %v6084_v18, 16 }
 0x1b2   : > { %6045 = vmatmul.mubr.msk.bf16.gmra.mrb[8].mxu1 %vm696_vm3, %v7131_v56  ;;  %v4519_v56 = vor.u32 %v4518_v40, %v4514_v39  ;;  %v6397_v39 = vld [vmem:[%s7264_s29 + $0x30] sm:$0xe]  ;;  %v6399_v40 = vld [vmem:[%s7264_s29 + $0x38] sm:$0x1] }
 0x1b3   : > { %2105 = vmatprep.mubr.bf16.mxu1 %v7185_v4  ;;  %v6441_v43 = vrot.slane %v6397_v39, 9  ;;  %v5035_v45 = vrot.slane %v6399_v40, 5  ;;  %v6412_v40 = vld [vmem:[%s7264_s29 + $0x6c] sm:$0xe] }
 0x1b4   : > { %v4520_v25 = vrot.slane %v4519_v56, 4 }
 0x1b5   : > { %6385 = vmatmul.mubr.msk.bf16.gmra.mrb[40].mxu0 %vm696_vm3, %v6367_v31  ;;  %v4524_v31 = vrot.slane %v4522_v55, 5  ;;  %v5033_v56 = vsel %vm7444_vm7, %v6441_v43, %v5032_v38  ;;  %v5036_v55 = vsel %vm7444_vm7, %v5034_v44, %v5035_v45  ;;  %v2556_v44 = vrot.slane %v2554_v32, 4  ;;  %v7143_v45 = vld [vmem:[%s7264_s29 + $0xb4] sm:$0xff]  }
 0x1b6   : > { %4805 = vmatprep.mubr.bf16.mxu0 %v7185_v4  ;;  %v6458_v22 = vcombine.low %v5033_v56, %v5036_v55  ;;  %v6087_v55 = vld [vmem:[%s7264_s29 + $0x7c] sm:$0xf] }
 0x1b7   : > { %v4525_v47 = vsel %vm7285_vm4, %v4520_v25, %v4524_v31  ;;  %v6404_v25 = vld [vmem:[%s7264_s29 + $0x4c] sm:$0xf]  ;;  %v7140_v31 = vld [vmem:[%s7264_s29 + $0x90] sm:$0xff]  }
 0x1b8   : > { %v6371_v48 = vcombine.low %v4515_v0, %v4525_v47 }
 0x1ba   : > { %6046 = vmatmul.mubr.msk.bf16.gmra.mrb[12].mxu1 %vm696_vm3, %v7132_v50  ;;  %v4534_v50 = vrot.slane %v4533_v13, 4  ;;  %v5049_v13 = vrot.slane %v6405_v53, 5 }
 0x1bb   : > { %2115 = vmatprep.mubr.bf16.mxu1 %v7185_v4 }
 0x1bc   : > { %v4539_v27 = vsel %vm7285_vm4, %v4534_v50, %v4538_v33  ;;  %v5046_v33 = vrot.slane %v6404_v25, 5 }
 0x1bd   : > { %6386 = vmatmul.mubr.msk.bf16.gmra.mrb[44].mxu0 %vm696_vm3, %v6368_v8  ;;  %v6372_v8 = vcombine.low %v4539_v27, %v4549_v2  ;;  %v6410_v27 = vld [vmem:[%s7264_s29 + $0x64] sm:$0xf]  ;;  %v6444_v2 = vrot.slane %v6406_v15, 9 }
 0x1be   : > { %4815 = vmatprep.mubr.bf16.mxu0 %v7185_v4  ;;  %v5048_v47 = vrot.slane %v5046_v33, 4 }
 0x1bf   : > { %v5054_v62 = vsel %vm7444_vm7, %v6444_v2, %v5053_v51 }
 0x1c0   : > { %v5050_v50 = vsel %vm7444_vm7, %v5048_v47, %v5049_v13  ;;  %v6415_v13 = vld [vmem:[%s7264_s29 + $0x78] sm:$0xe] }
 0x1c1   : > { %v6447_v2 = vrot.slane %v6415_v13, 9 }
 0x1c2   : > { %6047 = vmatmul.mubr.msk.bf16.gmra.mrb[16].mxu1 %vm696_vm3, %v7133_v20  ;;  %v5027_v20 = vrot.slane %v5025_v14, 4 }
 0x1c3   : > { %2125 = vmatprep.mubr.bf16.mxu1 %v7185_v4 }
 0x1c5   : > { %6387 = vmatmul.mubr.msk.bf16.gmra.mrb[48].mxu0 %vm696_vm3, %v6369_v29  ;;  %v5028_v29 = vrot.slane %v6396_v24, 5  ;;  %v2541_v24 = vshrl.u32 %v6083_v16, 16 }
 0x1c6   : > { %4825 = vmatprep.mubr.bf16.mxu0 %v7185_v4 }
 0x1c7   : > { %v5029_v35 = vsel %vm7444_vm7, %v5027_v20, %v5028_v29  ;;  %v6413_v20 = vld [vmem:[%s7264_s29 + $0x70] sm:$0xf]  ;;  %v2550_v29 = vshll.u32 %v6084_v18, 16  ;;  %v2543_v38 = vrot.slane %v2541_v24, 4 }
 0x1c8   : > { %v6457_v41 = vcombine.low %v5026_v36, %v5029_v35  ;;  %v5067_v35 = vrot.slane %v6413_v20, 5 }
 0x1c9   : > { %v2552_v43 = vrot.slane %v2550_v29, 5  ;;  %v6418_v29 = vld [vmem:[%s7264_s29 + $0x84] sm:$0xe] }
 0x1ca   : > { %6048 = vmatmul.mubr.msk.bf16.gmra.mrb[20].mxu1 %vm696_vm3, %v7134_v12  ;;  %v5039_v12 = vrot.slane %v6401_v46, 5  ;;  %v6085_v46 = vld [vmem:[%s7264_s29 + $0x74] sm:$0x1]  ;;  %v5069_v61 = vrot.slane %v5067_v35, 4 }
 0x1cb   : > { %2135 = vmatprep.mubr.bf16.mxu1 %v7185_v4 }
 0x1cc   : > { %v5040_v59 = vsel %vm7444_vm7, %v6442_v28, %v5039_v12  ;;  %v2557_v28 = vor.u32 %v2556_v44, %v2552_v43 }
 0x1cd   : > { %6388 = vmatmul.mubr.msk.bf16.gmra.mrb[52].mxu0 %vm696_vm3, %v6370_v52  ;;  %v5041_v52 = vrot.slane %v5039_v12, 4  ;;  %v6446_v12 = vrot.slane %v6412_v40, 9 }
 0x1ce   : > { %4835 = vmatprep.mubr.bf16.mxu0 %v7185_v4 }
 0x1cf   : > { %v5043_v1 = vsel %vm7444_vm7, %v5041_v52, %v5042_v60  ;;  %v2560_v52 = vshll.u32 %v6085_v46, 16  ;;  %v6416_v60 = vld [vmem:[%s7264_s29 + $0x7c] sm:$0xf]  ;;  %v6093_v46 = vld [vmem:[%s7264_s29 + $0x94] sm:$0xf] }
 0x1d0   : > { %v6459_v0 = vcombine.low %v5040_v59, %v5043_v1  ;;  %v2574_v59 = vshll.u32 %v6087_v55, 16  ;;  %v2578_v1 = vshrl.u32 %v6087_v55, 16 }
 0x1d1   : > { %v2562_v47 = vrot.slane %v2560_v52, 5 }
 0x1d2   : > { %6049 = vmatmul.mubr.msk.bf16.gmra.mrb[24].mxu1 %vm696_vm3, %v7135_v30  ;;  %v6443_v30 = vrot.slane %v6403_v37, 9  ;;  %v8338_v51 = vrot.slane %v2574_v59, 5  ;;  %v2580_v15 = vrot.slane %v2578_v1, 4  ;;  %v2626_v59 = vshrl.u32 %v6093_v46, 16 }
 0x1d3   : > { %2145 = vmatprep.mubr.bf16.mxu1 %v7185_v4 }
 0x1d5   : > { %6389 = vmatmul.mubr.msk.bf16.gmra.mrb[56].mxu0 %vm696_vm3, %v6371_v48  ;;  %v5047_v48 = vsel %vm7444_vm7, %v6443_v30, %v5046_v33  ;;  %v5068_v33 = vsel %vm7444_vm7, %v6446_v12, %v5067_v35  ;;  %v2558_v30 = vrot.slane %v2557_v28, 4  ;;  %v6420_v35 = vld [vmem:[%s7264_s29 + $0x8c] sm:$0x1] }
 0x1d6   : > { %4845 = vmatprep.mubr.bf16.mxu0 %v7185_v4  ;;  %v5084_v12 = vrot.slane %v6420_v35, 5  ;;  %v6097_v35 = vld [vmem:[%s7264_s29 + $0xa4] sm:$0x1] }
 0x1da   : > { %6050 = vmatmul.mubr.msk.bf16.gmra.mrb[28].mxu1 %vm696_vm3, %v7136_v54  ;;  %v6460_v54 = vcombine.low %v5047_v48, %v5050_v50  ;;  %v7144_v48 = vld [vmem:[%s7264_s29 + $0xc0] sm:$0xff]  }
 0x1db   : > { %2155 = vmatprep.mubr.bf16.mxu1 %v7185_v4  ;;  %v6417_v50 = vld [vmem:[%s7264_s29 + $0x80] sm:$0x1] }
 0x1dc   : > { %v5077_v10 = vrot.slane %v6417_v50, 5 }
 0x1dd   : > { %6390 = vmatmul.mubr.msk.bf16.gmra.mrb[60].mxu0 %vm696_vm3, %v6372_v8  ;;  %v5060_v8 = vrot.slane %v6410_v27, 5 }
 0x1de   : > { %5273 = vmatprep.mubr.bf16.mxu0 %v7185_v4 }
 0x1df   : > { %v5062_v14 = vrot.slane %v5060_v8, 4 }
 0x1e1   : > { %v5064_v36 = vsel %vm7444_vm7, %v5062_v14, %v5063_v21 }
 0x1e2   : > { %6051 = vmatmul.mubr.msk.bf16.gmra.mrb[32].mxu1 %vm696_vm3, %v7137_v9  ;;  %v5057_v9 = vsel %vm7444_vm7, %v5055_v58, %v5056_v3  ;;  %v6090_v3 = vld [vmem:[%s7264_s29 + $0x88] sm:$0xf] }
 0x1e3   : > { %2165 = vmatprep.mubr.bf16.mxu1 %v7185_v4  ;;  %v6461_v5 = vcombine.low %v5054_v62, %v5057_v9  ;;  %v2584_v62 = vshll.u32 %v6088_v19, 16  ;;  %v6419_v9 = vld [vmem:[%s7264_s29 + $0x88] sm:$0xf]  ;;  %v2598_v14 = vshll.u32 %v6090_v3, 16  ;;  %v2602_v21 = vshrl.u32 %v6090_v3, 16 }
 0x1e4   : > { %v5081_v32 = vrot.slane %v6419_v9, 5 }
 0x1e5   : > { %6474 = vmatmul.mubr.msk.bf16.vlgmr.msra.gmra.mrb[0].mxu0 %vm696_vm3, %v6456_v26  ;;  %v2544_v26 = vshll.u32 %v6083_v16, 16  ;;  %v8359_v40 = vrot.slane %v2598_v14, 5 }
 0x1e6   : > { %5283 = vmatprep.mubr.bf16.mxu0 %v7185_v4  ;;  %v5083_v55 = vrot.slane %v5081_v32, 4 }
 0x1e7   : > { %v2546_v39 = vrot.slane %v2544_v26, 5 }
 0x1ea   : > { %6052 = vmatmul.mubr.msk.bf16.gmra.mrb[36].mxu1 %vm696_vm3, %v7138_v34  ;;  %v5061_v34 = vsel %vm7444_vm7, %v6445_v6, %v5060_v8  ;;  %v2563_v8 = vsel %vm7285_vm4, %v2558_v30, %v2562_v47  ;;  %v6096_v30 = vld [vmem:[%s7264_s29 + $0xa0] sm:$0xf] }
 0x1eb   : > { %2175 = vmatprep.mubr.bf16.mxu1 %v7185_v4  ;;  %v6462_v56 = vcombine.low %v5061_v34, %v5064_v36  ;;  %v2586_v36 = vrot.slane %v2584_v62, 5  ;;  %v2646_v3 = vshll.u32 %v6096_v30, 16 }
 0x1ed   : > { %6475 = vmatmul.mubr.msk.bf16.gmra.mrb[4].mxu0 %vm696_vm3, %v6457_v41  ;;  %v6414_v41 = vld [vmem:[%s7264_s29 + $0x74] sm:$0x1] }
 0x1ee   : > { %5293 = vmatprep.mubr.bf16.mxu0 %v7185_v4  ;;  %v5070_v63 = vrot.slane %v6414_v41, 5  ;;  %v2604_v41 = vrot.slane %v2602_v21, 4  ;;  %v6424_v21 = vld [vmem:[%s7264_s29 + $0x9c] sm:$0xe] }
 0x1f0   : > { %v5071_v37 = vsel %vm7444_vm7, %v5069_v61, %v5070_v63  ;;  %v6422_v61 = vld [vmem:[%s7264_s29 + $0x94] sm:$0xf] }
 0x1f1   : > { %v6463_v27 = vcombine.low %v5068_v33, %v5071_v37  ;;  %v5088_v1 = vrot.slane %v6422_v61, 5  ;;  %v5085_v37 = vsel %vm7444_vm7, %v5083_v55, %v5084_v12  ;;  %v2656_v61 = vshll.u32 %v6097_v35, 16 }
 0x1f2   : > { %6053 = vmatmul.mubr.msk.bf16.gmra.mrb[40].mxu1 %vm696_vm3, %v7139_v49  ;;  %v6086_v49 = vld [vmem:[%s7264_s29 + $0x78] sm:$0xf] }
 0x1f3   : > { %2185 = vmatprep.mubr.bf16.mxu1 %v7185_v4  ;;  %v2565_v25 = vshrl.u32 %v6086_v49, 16 }
 0x1f5   : > { %6476 = vmatmul.mubr.msk.bf16.gmra.mrb[8].mxu0 %vm696_vm3, %v6458_v22  ;;  %v2547_v22 = vor.u32 %v2546_v39, %v2543_v38  ;;  %v2567_v23 = vrot.slane %v2565_v25, 4 }
 0x1f6   : > { %5303 = vmatprep.mubr.bf16.mxu0 %v7185_v4 }
 0x1f7   : > { %v2548_v53 = vrot.slane %v2547_v22, 4 }
 0x1f9   : > { %v2553_v7 = vsel %vm7285_vm4, %v2548_v53, %v2552_v43  ;;  %v6092_v43 = vld [vmem:[%s7264_s29 + $0x90] sm:$0xf] }
 0x1fa   : > { %6054 = vmatmul.mubr.msk.bf16.gmra.mrb[44].mxu1 %vm696_vm3, %v7140_v31  ;;  %v2568_v31 = vshll.u32 %v6086_v49, 16  ;;  %v6116_v26 = vcombine.low %v2553_v7, %v2563_v8  ;;  %v2613_v28 = vshrl.u32 %v6092_v43, 16  ;;  %v2616_v52 = vshll.u32 %v6092_v43, 16  ;;  %v6421_v53 = vld [vmem:[%s7264_s29 + $0x90] sm:$0xe] }
 0x1fb   : > { %2195 = vmatprep.mubr.bf16.mxu1 %v7185_v4  ;;  %v2650_v7 = vshrl.u32 %v6096_v30, 16  ;;  %v6099_v43 = vld [vmem:[%s7264_s29 + $0xac] sm:$0xf] }
 0x1fd   : > { %6477 = vmatmul.mubr.msk.bf16.gmra.mrb[12].mxu0 %vm696_vm3, %v6459_v0  ;;  %v5074_v0 = vrot.slane %v6416_v60, 5  ;;  %v2605_v60 = vor.u32 %v2604_v41, %v8359_v40  ;;  %v6098_v41 = vld [vmem:[%s7264_s29 + $0xa8] sm:$0xf] }
 0x1fe   : > { %5313 = vmatprep.mubr.bf16.mxu0 %v7185_v4 }
 0x1ff   : > { %v5076_v58 = vrot.slane %v5074_v0, 4  ;;  %v5075_v24 = vsel %vm7444_vm7, %v6447_v2, %v5074_v0  ;;  %v6095_v0 = vld [vmem:[%s7264_s29 + $0x9c] sm:$0xf]  ;;  %v2606_v50 = vrot.slane %v2605_v60, 4  ;;  %v2674_v60 = vshrl.u32 %v6099_v43, 16 }
 0x200   : > { %v2637_v2 = vshrl.u32 %v6095_v0, 16 }
 0x202   : > { %6055 = vmatmul.mubr.msk.bf16.gmra.mrb[48].mxu1 %vm696_vm3, %v7141_v11  ;;  %v2570_v11 = vrot.slane %v2568_v31, 5  ;;  %v2622_v31 = vshll.u32 %v6093_v46, 16 }
 0x203   : > { %2205 = vmatprep.mubr.bf16.mxu1 %v7185_v4 }
 0x204   : > { %v2571_v16 = vor.u32 %v2570_v11, %v2567_v23  ;;  %v6423_v23 = vld [vmem:[%s7264_s29 + $0x98] sm:$0x1]  ;;  %v2615_v11 = vrot.slane %v2613_v28, 4  ;;  %v8384_v19 = vrot.slane %v2622_v31, 5  ;;  %v2664_v28 = vshll.u32 %v6098_v41, 16 }
 0x205   : > { %6478 = vmatmul.mubr.msk.bf16.gmra.mrb[16].mxu0 %vm696_vm3, %v6460_v54  ;;  %v6089_v54 = vld [vmem:[%s7264_s29 + $0x84] sm:$0xf] }
 0x206   : > { %5323 = vmatprep.mubr.bf16.mxu0 %v7185_v4  ;;  %v2589_v18 = vshrl.u32 %v6089_v54, 16  ;;  %v2592_v6 = vshll.u32 %v6089_v54, 16  ;;  %v2572_v20 = vrot.slane %v2571_v16, 4  ;;  %v2628_v54 = vrot.slane %v2626_v59, 4 }
 0x207   : > { %v5090_v16 = vrot.slane %v5088_v1, 4 }
 0x208   : > { %v2591_v38 = vrot.slane %v2589_v18, 4  ;;  %v2594_v39 = vrot.slane %v2592_v6, 5  ;;  %v2577_v49 = vsel %vm7285_vm4, %v2572_v20, %v8338_v51  ;;  %v2629_v14 = vor.u32 %v2628_v54, %v8384_v19  ;;  %v6102_v54 = vld [vmem:[%s7264_s29 + $0xb8] sm:$0xf] }
 0x20a   : > { %6056 = vmatmul.mubr.msk.bf16.gmra.mrb[52].mxu1 %vm696_vm3, %v7142_v17  ;;  %v2581_v17 = vor.u32 %v2580_v15, %v8338_v51  ;;  %v2595_v22 = vor.u32 %v2594_v39, %v2591_v38  ;;  %v6094_v15 = vld [vmem:[%s7264_s29 + $0x98] sm:$0x1] }
 0x20b   : > { %2215 = vmatprep.mubr.bf16.mxu1 %v7185_v4  ;;  %v2632_v9 = vshll.u32 %v6094_v15, 16 }
 0x20c   : > { %v2582_v34 = vrot.slane %v2581_v17, 4  ;;  %v2596_v13 = vrot.slane %v2595_v22, 4  ;;  %v5091_v17 = vrot.slane %v6423_v23, 5  ;;  %v2661_v22 = vshrl.u32 %v6098_v41, 16 }
 0x20d   : > { %6479 = vmatmul.mubr.msk.bf16.gmra.mrb[20].mxu0 %vm696_vm3, %v6461_v5  ;;  %v5078_v5 = vsel %vm7444_vm7, %v5076_v58, %v5077_v10  ;;  %v2640_v58 = vshll.u32 %v6095_v0, 16  ;;  %v6449_v10 = vrot.slane %v6421_v53, 9  ;;  %v2658_v53 = vrot.slane %v2656_v61, 5  ;;  %v6427_v0 = vld [vmem:[%s7264_s29 + $0xa8] sm:$0xe] }
 0x20e   : > { %5333 = vmatprep.mubr.bf16.mxu0 %v7185_v4  ;;  %v6464_v44 = vcombine.low %v5075_v24, %v5078_v5  ;;  %v2587_v63 = vsel %vm7285_vm4, %v2582_v34, %v2586_v36  ;;  %v2601_v18 = vsel %vm7285_vm4, %v2596_v13, %v8359_v40  ;;  %v2639_v5 = vrot.slane %v2637_v2, 4 }
 0x20f   : > { %v6117_v47 = vcombine.low %v2577_v49, %v2587_v63  ;;  %v2642_v20 = vrot.slane %v2640_v58, 5  ;;  %v5089_v34 = vsel %vm7444_vm7, %v6449_v10, %v5088_v1  ;;  %v5092_v36 = vsel %vm7444_vm7, %v5090_v16, %v5091_v17  ;;  %v6428_v63 = vld [vmem:[%s7264_s29 + $0xac] sm:$0xf]  ;;  %v6431_v17 = vld [vmem:[%s7264_s29 + $0xb8] sm:$0xf] }
 0x210   : > { %v2634_v40 = vrot.slane %v2632_v9, 5  ;;  %v5102_v30 = vrot.slane %v6428_v63, 5  ;;  %v2663_v13 = vrot.slane %v2661_v22, 4  ;;  %v2666_v23 = vrot.slane %v2664_v28, 5  ;;  %v6434_v22 = vld [vmem:[%s7264_s29 + $0xc4] sm:$0xf] }
 0x211   : > { %v2643_v55 = vor.u32 %v2642_v20, %v2639_v5  ;;  %v6451_v2 = vrot.slane %v6427_v0, 9  ;;  %v6433_v0 = vld [vmem:[%s7264_s29 + $0xc0] sm:$0xe] }
 0x212   : > { %6057 = vmatmul.mubr.msk.bf16.gmra.mrb[56].mxu1 %vm696_vm3, %v7143_v45  ;;  %v6091_v45 = vld [vmem:[%s7264_s29 + $0x8c] sm:$0x1]  ;;  %v5104_v58 = vrot.slane %v5102_v30, 4 }
 0x213   : > { %2225 = vmatprep.mubr.bf16.mxu1 %v7185_v4  ;;  %v2608_v25 = vshll.u32 %v6091_v45, 16  ;;  %v6450_v45 = vrot.slane %v6424_v21, 9  ;;  %v5103_v21 = vsel %vm7444_vm7, %v6451_v2, %v5102_v30  ;;  %v5116_v30 = vrot.slane %v6434_v22, 5 }
 0x215   : > { %6480 = vmatmul.mubr.msk.bf16.gmra.mrb[24].mxu0 %vm696_vm3, %v6462_v56  ;;  %v6448_v56 = vrot.slane %v6418_v29, 9  ;;  %v2610_v51 = vrot.slane %v2608_v25, 5  ;;  %v8397_v29 = vrot.slane %v2646_v3, 5 }
 0x216   : > { %5343 = vmatprep.mubr.bf16.mxu0 %v7185_v4 }
 0x217   : > { %v5082_v33 = vsel %vm7444_vm7, %v6448_v56, %v5081_v32  ;;  %v2611_v6 = vsel %vm7285_vm4, %v2606_v50, %v2610_v51  ;;  %v2652_v32 = vrot.slane %v2650_v7, 4  ;;  %v6466_v56 = vcombine.low %v5089_v34, %v5092_v36  ;;  %v6100_v51 = vld [vmem:[%s7264_s29 + $0xb0] sm:$0x1]  ;;  %v6432_v34 = vld [vmem:[%s7264_s29 + $0xbc] sm:$0x1] }
 0x218   : > { %v6465_v8 = vcombine.low %v5082_v33, %v5085_v37  ;;  %v6118_v38 = vcombine.low %v2601_v18, %v2611_v6  ;;  %v2644_v33 = vrot.slane %v2643_v55, 4  ;;  %v2680_v16 = vshll.u32 %v6100_v51, 16 }
 0x219   : > { %v2653_v12 = vor.u32 %v2652_v32, %v8397_v29  ;;  %v2694_v18 = vshll.u32 %v6102_v54, 16  ;;  %v2698_v6 = vshrl.u32 %v6102_v54, 16  ;;  %v5109_v32 = vrot.slane %v6431_v17, 5 }
 0x21a   : > { %6058 = vmatmul.mubr.msk.bf16.gmra.mrb[60].mxu1 %vm696_vm3, %v7144_v48  ;;  %v2618_v48 = vrot.slane %v2616_v52, 5  ;;  %v2670_v52 = vshll.u32 %v6099_v43, 16  ;;  %v2682_v20 = vrot.slane %v2680_v16, 5  ;;  %v6104_v43 = vld [vmem:[%s7264_s29 + $0xc0] sm:$0xf]  ;;  %v5118_v54 = vrot.slane %v5116_v30, 4 }
 0x21b   : > { %2957 = vmatprep.mubr.bf16.mxu1 %v7185_v4  ;;  %v2654_v37 = vrot.slane %v2653_v12, 4  ;;  %v2709_v28 = vshrl.u32 %v6104_v43, 16 }
 0x21c   : > { %v2619_v62 = vor.u32 %v2618_v48, %v2615_v11  ;;  %v2672_v11 = vrot.slane %v2670_v52, 5  ;;  %v2676_v48 = vrot.slane %v2674_v60, 4  ;;  %v2712_v52 = vshll.u32 %v6104_v43, 16 }
 0x21d   : > { %6481 = vmatmul.mubr.msk.bf16.gmra.mrb[28].mxu0 %vm696_vm3, %v6463_v27  ;;  %v6425_v27 = vld [vmem:[%s7264_s29 + $0xa0] sm:$0xf]  ;;  %v2659_v7 = vsel %vm7285_vm4, %v2654_v37, %v2658_v53 }
 0x21e   : > { %5353 = vmatprep.mubr.bf16.mxu0 %v7185_v4  ;;  %v5095_v24 = vrot.slane %v6425_v27, 5  ;;  %v2620_v39 = vrot.slane %v2619_v62, 4  ;;  %v2649_v27 = vsel %vm7285_vm4, %v2644_v33, %v8397_v29  ;;  %v2677_v10 = vor.u32 %v2676_v48, %v2672_v11  ;;  %v6430_v29 = vld [vmem:[%s7264_s29 + $0xb4] sm:$0xe] }
 0x220   : > { %v5097_v46 = vrot.slane %v5095_v24, 4  ;;  %v2625_v25 = vsel %vm7285_vm4, %v2620_v39, %v8384_v19  ;;  %v5096_v59 = vsel %vm7444_vm7, %v6450_v45, %v5095_v24  ;;  %v6101_v19 = vld [vmem:[%s7264_s29 + $0xb4] sm:$0xf]  ;;  %v2678_v5 = vrot.slane %v2677_v10, 4 }
 0x221   : > { %v2685_v62 = vshrl.u32 %v6101_v19, 16  ;;  %v2688_v9 = vshll.u32 %v6101_v19, 16  ;;  %v2700_v39 = vrot.slane %v2698_v6, 4  ;;  %v6453_v19 = vrot.slane %v6433_v0, 9 }
 0x222   : > { %6134 = vmatmul.mubr.msk.bf16.vlgmr.msra.gmra.mrb[32].mxu1 %vm696_vm3, %v6116_v26  ;;  %v6426_v26 = vld [vmem:[%s7264_s29 + $0xa4] sm:$0x1]  ;;  %v2683_v55 = vsel %vm7285_vm4, %v2678_v5, %v2682_v20 }
 0x223   : > { %2967 = vmatprep.mubr.bf16.mxu1 %v7185_v4  ;;  %v5098_v49 = vrot.slane %v6426_v26, 5  ;;  %v2687_v36 = vrot.slane %v2685_v62, 4  ;;  %v2690_v35 = vrot.slane %v2688_v9, 5  ;;  %v5117_v16 = vsel %vm7444_vm7, %v6453_v19, %v5116_v30  ;;  %v6436_v62 = vld [vmem:[%s7264_s29 + $0xcc] sm:$0xe] }
 0x224   : > { %v5500_v30 = vlaneseq }
 0x225   : > { %6482 = vmatmul.mubr.msk.bf16.gmra.mrb[32].mxu0 %vm696_vm3, %v6464_v44  ;;  %v2630_v44 = vrot.slane %v2629_v14, 4  ;;  %v5099_v1 = vsel %vm7444_vm7, %v5097_v46, %v5098_v49  ;;  %v6120_v14 = vcombine.low %v2649_v27, %v2659_v7  ;;  %v6452_v46 = vrot.slane %v6430_v29, 9 }
 0x226   : > { %5363 = vmatprep.mubr.bf16.mxu0 %v7185_v4  ;;  %v6467_v15 = vcombine.low %v5096_v59, %v5099_v1  ;;  %v5111_v49 = vrot.slane %v5109_v32, 4  ;;  %v2691_v12 = vor.u32 %v2690_v35, %v2687_v36 }
 0x227   : > { %v2635_v31 = vsel %vm7285_vm4, %v2630_v44, %v2634_v40  ;;  %v6103_v40 = vld [vmem:[%s7264_s29 + $0xbc] sm:$0x1]  ;;  %v6105_v44 = vld [vmem:[%s7264_s29 + $0xc4] sm:$0xf]  ;;  %v5110_v59 = vsel %vm7444_vm7, %v6452_v46, %v5109_v32 }
 0x228   : > { %v6119_v50 = vcombine.low %v2625_v25, %v2635_v31  ;;  %v2704_v63 = vshll.u32 %v6103_v40, 16  ;;  %v2718_v60 = vshll.u32 %v6105_v44, 16  ;;  %v2722_v25 = vshrl.u32 %v6105_v44, 16 }
 0x229   : > { %v2692_v33 = vrot.slane %v2691_v12, 4 }
 0x22a   : > { %6135 = vmatmul.mubr.msk.bf16.gmra.mrb[36].mxu1 %vm696_vm3, %v6117_v47  ;;  %v6429_v47 = vld [vmem:[%s7264_s29 + $0xb0] sm:$0x1]  ;;  %v2706_v53 = vrot.slane %v2704_v63, 5  ;;  %v2724_v48 = vrot.slane %v2722_v25, 4 }
 0x22b   : > { %2977 = vmatprep.mubr.bf16.mxu1 %v7185_v4  ;;  %v5105_v3 = vrot.slane %v6429_v47, 5  ;;  %v6435_v47 = vld [vmem:[%s7264_s29 + $0xc8] sm:$0x1] }
 0x22c   : > { %v5119_v27 = vrot.slane %v6435_v47, 5 }
 0x22d   : > { %6483 = vmatmul.mubr.msk.bf16.gmra.mrb[36].mxu0 %vm696_vm3, %v6465_v8  ;;  %v2667_v8 = vor.u32 %v2666_v23, %v2663_v13  ;;  %v5106_v24 = vsel %vm7444_vm7, %v5104_v58, %v5105_v3  ;;  %v2711_v13 = vrot.slane %v2709_v28, 4  ;;  %v2714_v23 = vrot.slane %v2712_v52, 5 }
 0x22e   : > { %5373 = vmatprep.mubr.bf16.mxu0 %v7185_v4  ;;  %v6468_v41 = vcombine.low %v5103_v21, %v5106_v24  ;;  %v5120_v17 = vsel %vm7444_vm7, %v5118_v54, %v5119_v27  ;;  %v6438_v21 = vld [vmem:[%s7264_s29 + $0xd4] sm:$0x1] }
 0x22f   : > { %v2668_v26 = vrot.slane %v2667_v8, 4  ;;  %v2715_v58 = vor.u32 %v2714_v23, %v2711_v13  ;;  %v6437_v8 = vld [vmem:[%s7264_s29 + $0xd0] sm:$0xf]  ;;  %v6470_v24 = vcombine.low %v5117_v16, %v5120_v17  ;;  %v5126_v20 = vrot.slane %v6438_v21, 5 }
 0x230   : > { %v5123_v9 = vrot.slane %v6437_v8, 5 }
 0x231   : > { %v2673_v45 = vsel %vm7285_vm4, %v2668_v26, %v2672_v11  ;;  %v2720_v11 = vrot.slane %v2718_v60, 5  ;;  %v6454_v26 = vrot.slane %v6436_v62, 9 }
 0x232   : > { %6136 = vmatmul.mubr.msk.bf16.gmra.mrb[40].mxu1 %vm696_vm3, %v6118_v38  ;;  %v2696_v38 = vrot.slane %v2694_v18, 5  ;;  %v6121_v31 = vcombine.low %v2673_v45, %v2683_v55  ;;  %v2716_v18 = vrot.slane %v2715_v58, 4  ;;  %v5125_v5 = vrot.slane %v5123_v9, 4 }
 0x233   : > { %2987 = vmatprep.mubr.bf16.mxu1 %v7185_v4  ;;  %v2725_v3 = vor.u32 %v2724_v48, %v2720_v11  ;;  %v5124_v36 = vsel %vm7444_vm7, %v6454_v26, %v5123_v9 }
 0x234   : > { %v2701_v61 = vor.u32 %v2700_v39, %v2696_v38  ;;  %v2721_v29 = vsel %vm7285_vm4, %v2716_v18, %v2720_v11  ;;  %v5127_v35 = vsel %vm7444_vm7, %v5125_v5, %v5126_v20  ;;  %v5501_v11 = vshrl.u32 %v5500_v30, 7 }
 0x235   : > { %6484 = vmatmul.mubr.msk.bf16.gmra.mrb[40].mxu0 %vm696_vm3, %v6466_v56  ;;  %v5112_v56 = vrot.slane %v6432_v34, 5  ;;  %v2726_v6 = vrot.slane %v2725_v3, 4 }
 0x236   : > { %5383 = vmatprep.mubr.bf16.mxu0 %v7185_v4  ;;  %v2702_v37 = vrot.slane %v2701_v61, 4 }
 0x237   : > { %v5113_v1 = vsel %vm7444_vm7, %v5111_v49, %v5112_v56 }
 0x238   : > { %v6469_v51 = vcombine.low %v5110_v59, %v5113_v1  ;;  %v2707_v2 = vsel %vm7285_vm4, %v2702_v37, %v2706_v53 }
 0x23a   : > { %6137 = vmatmul.mubr.msk.bf16.gmra.mrb[44].mxu1 %vm696_vm3, %v6119_v50  ;;  %v6106_v50 = vld [vmem:[%s7264_s29 + $0xc8] sm:$0x1] }
 0x23b   : > { %2997 = vmatprep.mubr.bf16.mxu1 %v7185_v4  ;;  %v2728_v7 = vshll.u32 %v6106_v50, 16  ;;  %v5502_v50 = vsub.s32 0, %v5501_v11 }
 0x23d   : > { %6485 = vmatmul.mubr.msk.bf16.gmra.mrb[44].mxu0 %vm696_vm3, %v6467_v15  ;;  %v2697_v15 = vsel %vm7285_vm4, %v2692_v33, %v2696_v38  ;;  %v6471_v38 = vcombine.low %v5124_v36, %v5127_v35 }
 0x23e   : > { %5393 = vmatprep.mubr.bf16.mxu0 %v7185_v4  ;;  %v6122_v10 = vcombine.low %v2697_v15, %v2707_v2  ;;  %v5506_v15 = vsub.s32 1, %v5501_v11 }
 0x242   : > { %6138 = vmatmul.mubr.msk.bf16.gmra.mrb[48].mxu1 %vm696_vm3, %v6120_v14  ;;  %v2730_v14 = vrot.slane %v2728_v7, 5 }
 0x243   : > { %3007 = vmatprep.mubr.bf16.mxu1 %v7185_v4 }
 0x244   : > { %v2731_v32 = vsel %vm7285_vm4, %v2726_v6, %v2730_v14 }
 0x245   : > { %6486 = vmatmul.mubr.msk.bf16.gmra.mrb[48].mxu0 %vm696_vm3, %v6468_v41  ;;  %v6123_v34 = vcombine.low %v2721_v29, %v2731_v32 }
 0x246   : > { %5403 = vmatprep.mubr.bf16.mxu0 %v7185_v4 }
 0x24a   : > { %6139 = vmatmul.mubr.msk.bf16.gmra.mrb[52].mxu1 %vm696_vm3, %v6121_v31 }
 0x24b   : > { %3017 = vmatprep.mubr.bf16.mxu1 %v7185_v4 }
 0x24d   : > { %6487 = vmatmul.mubr.msk.bf16.gmra.mrb[52].mxu0 %vm696_vm3, %v6469_v51  ;;  %v5498_v51 = vld [vmem:[%s8716_s2] sm:$0x3] }
 0x24e   : > { %5413 = vmatprep.mubr.bf16.mxu0 %v7185_v4  ;;  %v8543_v19 = vrot.slane %v5498_v51, %v5502_v50  ;;  %v8545_v27 = vrot.slane %v5498_v51, %v5506_v15 }
 0x252   : > { %6140 = vmatmul.mubr.msk.bf16.gmra.mrb[56].mxu1 %vm696_vm3, %v6122_v10 }
 0x253   : > { %3027 = vmatprep.mubr.bf16.mxu1 %v7185_v4 }
 0x255   : > { %6488 = vmatmul.mubr.msk.bf16.gmra.mrb[56].mxu0 %vm696_vm3, %v6470_v24 }
 0x256   : > { %5423 = vmatprep.mubr.bf16.mxu0 %v7185_v4 }
 0x25a   : > { %6141 = vmatmul.mubr.msk.bf16.gmra.mrb[60].mxu1 %vm696_vm3, %v6123_v34 }
 0x25d   : > { %6489 = vmatmul.mubr.msk.bf16.gmra.mrb[60].mxu0 %vm696_vm3, %v6471_v38 }
 0x275   : > { %v2077_v39 = vpop.f32.mrb[0].mxu1 }
 0x276   : > { %v2079_v40 = vpop.f32.mrb[1].mxu1 }
 0x277   : > { %v2081_v42 = vpop.f32.mrb[2].mxu1 }
 0x278   : > { %v2083_v41 = vpop.f32.mrb[3].mxu1 }
 0x27d   : > { %v2087_v43 = vpop.f32.mrb[4].mxu1 }
 0x27e   : > { %v2089_v44 = vpop.f32.mrb[5].mxu1 }
 0x27f   : > { %v2091_v45 = vpop.f32.mrb[6].mxu1 }
 0x280   : > { %v2093_v4 = vpop.f32.mrb[7].mxu1 }
 0x285   : > { %v8492_v46 = vpop.f32.mrb[8].mxu1 }
 0x286   : > { %v8494_v49 = vpop.f32.mrb[9].mxu1 }
 0x287   : > { %v8496_v56 = vpop.f32.mrb[10].mxu1 }
 0x288   : > { %v8498_v57 = vpop.f32.mrb[11].mxu1 }
 0x28d   : > { %v8500_v55 = vpop.f32.mrb[12].mxu1 }
 0x28e   : > { %v8502_v12 = vpop.f32.mrb[13].mxu1 }
 0x28f   : > { %v8504_v61 = vpop.f32.mrb[14].mxu1 }
 0x290   : > { %v8506_v63 = vpop.f32.mrb[15].mxu1 }
 0x295   : > { %v8508_v22 = vpop.f32.mrb[16].mxu1 }
 0x296   : > { %v8510_v28 = vpop.f32.mrb[17].mxu1 }
 0x297   : > { %v8512_v52 = vpop.f32.mrb[18].mxu1 }
 0x298   : > { %v8514_v60 = vpop.f32.mrb[19].mxu1 }
 0x29d   : > { %v8516_v25 = vpop.f32.mrb[20].mxu1 }
 0x29e   : > { %v8518_v31 = vpop.f32.mrb[21].mxu1 }
 0x29f   : > { %v8520_v59 = vpop.f32.mrb[22].mxu1 }
 0x2a0   : > { %v8522_v1 = vpop.f32.mrb[23].mxu1 }
 0x2a5   : > { %v8524_v33 = vpop.f32.mrb[24].mxu1 }
 0x2a6   : > { %v8526_v37 = vpop.f32.mrb[25].mxu1 }
 0x2a7   : > { %v8528_v53 = vpop.f32.mrb[26].mxu1 }
 0x2a8   : > { %v8530_v0 = vpop.f32.mrb[27].mxu1 }
 0x2ad   : > { %v8532_v47 = vpop.f32.mrb[28].mxu1 }
 0x2ae   : > { %v8534_v13 = vpop.f32.mrb[29].mxu1 }
 0x2af   : > { %v8536_v23 = vpop.f32.mrb[30].mxu1 }
 0x2b0   : > { %v8538_v48 = vpop.f32.mrb[31].mxu1 }
 0x2b8   : > { %v5275_v54 = vpop.f32.mrb[0].mxu0 }
 0x2b9   : > { %v6559_v2 = vadd.f32 %v5275_v54, %v2077_v39  ;;  %v5277_v58 = vpop.f32.mrb[1].mxu0 }
 0x2ba   : > { %v6560_v3 = vadd.f32 %v5277_v58, %v2079_v40  ;;  %v5279_v7 = vpop.f32.mrb[2].mxu0 }
 0x2bb   : > { %v5510_v8 = vadd.f32 %v6559_v2, %v8543_v19  ;;  %v6561_v10 = vadd.f32 %v5279_v7, %v2081_v42  ;;  %v5281_v16 = vpop.f32.mrb[3].mxu0 }
 0x2bc   : > { %v5511_v17 = vadd.f32 %v6560_v3, %v8545_v27  ;;  %v6562_v62 = vadd.f32 %v5281_v16, %v2083_v41 }
 0x2bd   : > { %v5512_v9 = vadd.f32 %v6561_v10, %v8543_v19 }
 0x2be   : > { %v5574_v18 = vmax.f32 %v5510_v8, %v5511_v17  ;;  %v5513_v6 = vadd.f32 %v6562_v62, %v8545_v27 }
 0x2c0   : > { %v6525_v14 = vpack.c.bf16 %v5574_v18, %v5574_v18  ;;  %v5575_v21 = vmax.f32 %v5512_v9, %v5513_v6  ;;  %v5285_v24 = vpop.f32.mrb[4].mxu0 }
 0x2c1   : > { %v6563_v26 = vadd.f32 %v5285_v24, %v2087_v43  ;;  %v5287_v5 = vpop.f32.mrb[5].mxu0 }
 0x2c2   : > { %5735 = vst.msk [vmem:[%s8555_s20] sm:$0xf] %vm5734_vm8, %v6525_v14  ;;  %v6526_v20 = vpack.c.bf16 %v5575_v21, %v5575_v21  ;;  %v6564_v29 = vadd.f32 %v5287_v5, %v2089_v44  ;;  %v5289_v32 = vpop.f32.mrb[6].mxu0 }
 0x2c3   : > { %v5514_v34 = vadd.f32 %v6563_v26, %v8543_v19  ;;  %v6565_v36 = vadd.f32 %v5289_v32, %v2091_v45  ;;  %v5291_v35 = vpop.f32.mrb[7].mxu0 }
 0x2c4   : > { %5736 = vst.msk [vmem:[%s8555_s20 + $0x4] sm:$0xf] %vm5734_vm8, %v6526_v20  ;;  %v5515_v38 = vadd.f32 %v6564_v29, %v8545_v27  ;;  %v6566_v39 = vadd.f32 %v5291_v35, %v2093_v4 }
 0x2c5   : > { %v5516_v40 = vadd.f32 %v6565_v36, %v8543_v19 }
 0x2c6   : > { %v5576_v42 = vmax.f32 %v5514_v34, %v5515_v38  ;;  %v5517_v41 = vadd.f32 %v6566_v39, %v8545_v27 }
 0x2c8   : > { %v6527_v43 = vpack.c.bf16 %v5576_v42, %v5576_v42  ;;  %v5577_v30 = vmax.f32 %v5516_v40, %v5517_v41  ;;  %v5295_v44 = vpop.f32.mrb[8].mxu0 }
 0x2c9   : > { %v6567_v11 = vadd.f32 %v5295_v44, %v8492_v46  ;;  %v5297_v50 = vpop.f32.mrb[9].mxu0 }
 0x2ca   : > { %5737 = vst.msk [vmem:[%s8555_s20 + $0x8] sm:$0xf] %vm5734_vm8, %v6527_v43  ;;  %v6528_v45 = vpack.c.bf16 %v5577_v30, %v5577_v30  ;;  %v6568_v51 = vadd.f32 %v5297_v50, %v8494_v49  ;;  %v5299_v15 = vpop.f32.mrb[10].mxu0 }
 0x2cb   : > { %v5518_v4 = vadd.f32 %v6567_v11, %v8543_v19  ;;  %v6569_v54 = vadd.f32 %v5299_v15, %v8496_v56  ;;  %v5301_v2 = vpop.f32.mrb[11].mxu0 }
 0x2cc   : > { %5738 = vst.msk [vmem:[%s8555_s20 + $0xc] sm:$0xf] %vm5734_vm8, %v6528_v45  ;;  %v5519_v58 = vadd.f32 %v6568_v51, %v8545_v27  ;;  %v6570_v3 = vadd.f32 %v5301_v2, %v8498_v57 }
 0x2cd   : > { %v5520_v46 = vadd.f32 %v6569_v54, %v8543_v19 }
 0x2ce   : > { %v5578_v7 = vmax.f32 %v5518_v4, %v5519_v58  ;;  %v5521_v8 = vadd.f32 %v6570_v3, %v8545_v27 }
 0x2d0   : > { %v6529_v49 = vpack.c.bf16 %v5578_v7, %v5578_v7  ;;  %v5579_v10 = vmax.f32 %v5520_v46, %v5521_v8  ;;  %v5305_v16 = vpop.f32.mrb[12].mxu0 }
 0x2d1   : > { %v6571_v17 = vadd.f32 %v5305_v16, %v8500_v55  ;;  %v5307_v62 = vpop.f32.mrb[13].mxu0 }
 0x2d2   : > { %5739 = vst.msk [vmem:[%s8555_s20 + $0x10] sm:$0xf] %vm5734_vm8, %v6529_v49  ;;  %v6530_v56 = vpack.c.bf16 %v5579_v10, %v5579_v10  ;;  %v6572_v9 = vadd.f32 %v5307_v62, %v8502_v12  ;;  %v5309_v18 = vpop.f32.mrb[14].mxu0 }
 0x2d3   : > { %v5522_v57 = vadd.f32 %v6571_v17, %v8543_v19  ;;  %v6573_v6 = vadd.f32 %v5309_v18, %v8504_v61  ;;  %v5311_v14 = vpop.f32.mrb[15].mxu0 }
 0x2d4   : > { %5740 = vst.msk [vmem:[%s8555_s20 + $0x14] sm:$0xf] %vm5734_vm8, %v6530_v56  ;;  %v5523_v21 = vadd.f32 %v6572_v9, %v8545_v27  ;;  %v6574_v24 = vadd.f32 %v5311_v14, %v8506_v63 }
 0x2d5   : > { %v5524_v55 = vadd.f32 %v6573_v6, %v8543_v19 }
 0x2d6   : > { %v5580_v26 = vmax.f32 %v5522_v57, %v5523_v21  ;;  %v5525_v5 = vadd.f32 %v6574_v24, %v8545_v27 }
 0x2d8   : > { %v6531_v12 = vpack.c.bf16 %v5580_v26, %v5580_v26  ;;  %v5581_v20 = vmax.f32 %v5524_v55, %v5525_v5  ;;  %v5315_v29 = vpop.f32.mrb[16].mxu0 }
 0x2d9   : > { %v6575_v32 = vadd.f32 %v5315_v29, %v8508_v22  ;;  %v5317_v34 = vpop.f32.mrb[17].mxu0 }
 0x2da   : > { %5741 = vst.msk [vmem:[%s8555_s20 + $0x18] sm:$0xf] %vm5734_vm8, %v6531_v12  ;;  %v6532_v61 = vpack.c.bf16 %v5581_v20, %v5581_v20  ;;  %v6576_v36 = vadd.f32 %v5317_v34, %v8510_v28  ;;  %v5319_v35 = vpop.f32.mrb[18].mxu0 }
 0x2db   : > { %v5526_v63 = vadd.f32 %v6575_v32, %v8543_v19  ;;  %v6577_v38 = vadd.f32 %v5319_v35, %v8512_v52  ;;  %v5321_v39 = vpop.f32.mrb[19].mxu0 }
 0x2dc   : > { %5742 = vst.msk [vmem:[%s8555_s20 + $0x1c] sm:$0xf] %vm5734_vm8, %v6532_v61  ;;  %v5527_v40 = vadd.f32 %v6576_v36, %v8545_v27  ;;  %v6578_v42 = vadd.f32 %v5321_v39, %v8514_v60 }
 0x2dd   : > { %v5528_v22 = vadd.f32 %v6577_v38, %v8543_v19 }
 0x2de   : > { %v5582_v41 = vmax.f32 %v5526_v63, %v5527_v40  ;;  %v5529_v43 = vadd.f32 %v6578_v42, %v8545_v27 }
 0x2e0   : > { %v6533_v28 = vpack.c.bf16 %v5582_v41, %v5582_v41  ;;  %v5583_v30 = vmax.f32 %v5528_v22, %v5529_v43  ;;  %v5325_v44 = vpop.f32.mrb[20].mxu0 }
 0x2e1   : > { %v6579_v11 = vadd.f32 %v5325_v44, %v8516_v25  ;;  %v5327_v50 = vpop.f32.mrb[21].mxu0 }
 0x2e2   : > { %5743 = vst.msk [vmem:[%s8555_s20 + $0x20] sm:$0xf] %vm5734_vm8, %v6533_v28  ;;  %v6534_v52 = vpack.c.bf16 %v5583_v30, %v5583_v30  ;;  %v6580_v45 = vadd.f32 %v5327_v50, %v8518_v31  ;;  %v5329_v51 = vpop.f32.mrb[22].mxu0 }
 0x2e3   : > { %v5530_v60 = vadd.f32 %v6579_v11, %v8543_v19  ;;  %v6581_v15 = vadd.f32 %v5329_v51, %v8520_v59  ;;  %v5331_v4 = vpop.f32.mrb[23].mxu0 }
 0x2e4   : > { %5744 = vst.msk [vmem:[%s8555_s20 + $0x24] sm:$0xf] %vm5734_vm8, %v6534_v52  ;;  %v5531_v54 = vadd.f32 %v6580_v45, %v8545_v27  ;;  %v6582_v2 = vadd.f32 %v5331_v4, %v8522_v1 }
 0x2e5   : > { %v5532_v25 = vadd.f32 %v6581_v15, %v8543_v19 }
 0x2e6   : > { %v5584_v58 = vmax.f32 %v5530_v60, %v5531_v54  ;;  %v5533_v3 = vadd.f32 %v6582_v2, %v8545_v27 }
 0x2e8   : > { %v6535_v31 = vpack.c.bf16 %v5584_v58, %v5584_v58  ;;  %v5585_v46 = vmax.f32 %v5532_v25, %v5533_v3  ;;  %v5335_v7 = vpop.f32.mrb[24].mxu0 }
 0x2e9   : > { %v6583_v8 = vadd.f32 %v5335_v7, %v8524_v33  ;;  %v5337_v49 = vpop.f32.mrb[25].mxu0 }
 0x2ea   : > { %5745 = vst.msk [vmem:[%s8555_s20 + $0x28] sm:$0xf] %vm5734_vm8, %v6535_v31  ;;  %v6536_v59 = vpack.c.bf16 %v5585_v46, %v5585_v46  ;;  %v6584_v10 = vadd.f32 %v5337_v49, %v8526_v37  ;;  %v5339_v16 = vpop.f32.mrb[26].mxu0 }
 0x2eb   : > { %v5534_v1 = vadd.f32 %v6583_v8, %v8543_v19  ;;  %v6585_v17 = vadd.f32 %v5339_v16, %v8528_v53  ;;  %v5341_v62 = vpop.f32.mrb[27].mxu0 }
 0x2ec   : > { %5746 = vst.msk [vmem:[%s8555_s20 + $0x2c] sm:$0xf] %vm5734_vm8, %v6536_v59  ;;  %v5535_v56 = vadd.f32 %v6584_v10, %v8545_v27  ;;  %v6586_v9 = vadd.f32 %v5341_v62, %v8530_v0 }
 0x2ed   : > { %v5536_v33 = vadd.f32 %v6585_v17, %v8543_v19 }
 0x2ee   : > { %v5586_v18 = vmax.f32 %v5534_v1, %v5535_v56  ;;  %v5537_v57 = vadd.f32 %v6586_v9, %v8545_v27 }
 0x2f0   : > { %v6537_v37 = vpack.c.bf16 %v5586_v18, %v5586_v18  ;;  %v5587_v6 = vmax.f32 %v5536_v33, %v5537_v57  ;;  %v5345_v14 = vpop.f32.mrb[28].mxu0 }
 0x2f1   : > { %v6587_v21 = vadd.f32 %v5345_v14, %v8532_v47  ;;  %v5347_v24 = vpop.f32.mrb[29].mxu0 }
 0x2f2   : > { %5747 = vst.msk [vmem:[%s8555_s20 + $0x30] sm:$0xf] %vm5734_vm8, %v6537_v37  ;;  %v6538_v53 = vpack.c.bf16 %v5587_v6, %v5587_v6  ;;  %v6588_v55 = vadd.f32 %v5347_v24, %v8534_v13  ;;  %v5349_v26 = vpop.f32.mrb[30].mxu0 }
 0x2f3   : > { %v5538_v0 = vadd.f32 %v6587_v21, %v8543_v19  ;;  %v6589_v5 = vadd.f32 %v5349_v26, %v8536_v23  ;;  %v5351_v12 = vpop.f32.mrb[31].mxu0 }
 0x2f4   : > { %5748 = vst.msk [vmem:[%s8555_s20 + $0x34] sm:$0xf] %vm5734_vm8, %v6538_v53  ;;  %v5539_v20 = vadd.f32 %v6588_v55, %v8545_v27  ;;  %v6590_v29 = vadd.f32 %v5351_v12, %v8538_v48 }
 0x2f5   : > { %v5540_v47 = vadd.f32 %v6589_v5, %v8543_v19  ;;  %v2959_v32 = vpop.f32.mrb[32].mxu1 }
 0x2f6   : > { %v5588_v34 = vmax.f32 %v5538_v0, %v5539_v20  ;;  %v5541_v61 = vadd.f32 %v6590_v29, %v8545_v27  ;;  %v2961_v13 = vpop.f32.mrb[33].mxu1 }
 0x2f7   : > { %v2963_v36 = vpop.f32.mrb[34].mxu1 }
 0x2f8   : > { %v6539_v35 = vpack.c.bf16 %v5588_v34, %v5588_v34  ;;  %v5589_v63 = vmax.f32 %v5540_v47, %v5541_v61  ;;  %v5355_v23 = vpop.f32.mrb[32].mxu0  ;;  %v2965_v38 = vpop.f32.mrb[35].mxu1 }
 0x2f9   : > { %v6591_v39 = vadd.f32 %v5355_v23, %v2959_v32  ;;  %v5357_v40 = vpop.f32.mrb[33].mxu0 }
 0x2fa   : > { %5749 = vst.msk [vmem:[%s8555_s20 + $0x38] sm:$0xf] %vm5734_vm8, %v6539_v35  ;;  %v6540_v42 = vpack.c.bf16 %v5589_v63, %v5589_v63  ;;  %v6592_v22 = vadd.f32 %v5357_v40, %v2961_v13  ;;  %v5359_v48 = vpop.f32.mrb[34].mxu0 }
 0x2fb   : > { %v5542_v41 = vadd.f32 %v6591_v39, %v8543_v19  ;;  %v6593_v43 = vadd.f32 %v5359_v48, %v2963_v36  ;;  %v5361_v28 = vpop.f32.mrb[35].mxu0 }
 0x2fc   : > { %5750 = vst.msk [vmem:[%s8555_s20 + $0x3c] sm:$0xf] %vm5734_vm8, %v6540_v42  ;;  %v5543_v30 = vadd.f32 %v6592_v22, %v8545_v27  ;;  %v6594_v44 = vadd.f32 %v5361_v28, %v2965_v38 }
 0x2fd   : > { %v5544_v11 = vadd.f32 %v6593_v43, %v8543_v19  ;;  %v2969_v50 = vpop.f32.mrb[36].mxu1 }
 0x2fe   : > { %v5590_v52 = vmax.f32 %v5542_v41, %v5543_v30  ;;  %v5545_v45 = vadd.f32 %v6594_v44, %v8545_v27  ;;  %v2971_v51 = vpop.f32.mrb[37].mxu1 }
 0x2ff   : > { %v2973_v60 = vpop.f32.mrb[38].mxu1 }
 0x300   : > { %v6541_v15 = vpack.c.bf16 %v5590_v52, %v5590_v52  ;;  %v5591_v4 = vmax.f32 %v5544_v11, %v5545_v45  ;;  %v5365_v54 = vpop.f32.mrb[36].mxu0  ;;  %v2975_v2 = vpop.f32.mrb[39].mxu1 }
 0x301   : > { %v6595_v25 = vadd.f32 %v5365_v54, %v2969_v50  ;;  %v5367_v58 = vpop.f32.mrb[37].mxu0 }
 0x302   : > { %5751 = vst.msk [vmem:[%s8555_s20 + $0x40] sm:$0xf] %vm5734_vm8, %v6541_v15  ;;  %v6542_v3 = vpack.c.bf16 %v5591_v4, %v5591_v4  ;;  %v6596_v31 = vadd.f32 %v5367_v58, %v2971_v51  ;;  %v5369_v46 = vpop.f32.mrb[38].mxu0 }
 0x303   : > { %v5546_v7 = vadd.f32 %v6595_v25, %v8543_v19  ;;  %v6597_v8 = vadd.f32 %v5369_v46, %v2973_v60  ;;  %v5371_v49 = vpop.f32.mrb[39].mxu0 }
 0x304   : > { %5752 = vst.msk [vmem:[%s8555_s20 + $0x44] sm:$0xf] %vm5734_vm8, %v6542_v3  ;;  %v5547_v59 = vadd.f32 %v6596_v31, %v8545_v27  ;;  %v6598_v10 = vadd.f32 %v5371_v49, %v2975_v2 }
 0x305   : > { %v5548_v16 = vadd.f32 %v6597_v8, %v8543_v19  ;;  %v2979_v1 = vpop.f32.mrb[40].mxu1 }
 0x306   : > { %v5592_v17 = vmax.f32 %v5546_v7, %v5547_v59  ;;  %v5549_v62 = vadd.f32 %v6598_v10, %v8545_v27  ;;  %v2981_v56 = vpop.f32.mrb[41].mxu1 }
 0x307   : > { %v2983_v9 = vpop.f32.mrb[42].mxu1 }
 0x308   : > { %v6543_v33 = vpack.c.bf16 %v5592_v17, %v5592_v17  ;;  %v5593_v18 = vmax.f32 %v5548_v16, %v5549_v62  ;;  %v5375_v57 = vpop.f32.mrb[40].mxu0  ;;  %v2985_v37 = vpop.f32.mrb[43].mxu1 }
 0x309   : > { %v6599_v6 = vadd.f32 %v5375_v57, %v2979_v1  ;;  %v5377_v14 = vpop.f32.mrb[41].mxu0 }
 0x30a   : > { %5753 = vst.msk [vmem:[%s8555_s20 + $0x48] sm:$0xf] %vm5734_vm8, %v6543_v33  ;;  %v6544_v21 = vpack.c.bf16 %v5593_v18, %v5593_v18  ;;  %v6600_v24 = vadd.f32 %v5377_v14, %v2981_v56  ;;  %v5379_v53 = vpop.f32.mrb[42].mxu0 }
 0x30b   : > { %v5550_v55 = vadd.f32 %v6599_v6, %v8543_v19  ;;  %v6601_v26 = vadd.f32 %v5379_v53, %v2983_v9  ;;  %v5381_v0 = vpop.f32.mrb[43].mxu0 }
 0x30c   : > { %5754 = vst.msk [vmem:[%s8555_s20 + $0x4c] sm:$0xf] %vm5734_vm8, %v6544_v21  ;;  %v5551_v5 = vadd.f32 %v6600_v24, %v8545_v27  ;;  %v6602_v12 = vadd.f32 %v5381_v0, %v2985_v37 }
 0x30d   : > { %v5552_v20 = vadd.f32 %v6601_v26, %v8543_v19  ;;  %v2989_v29 = vpop.f32.mrb[44].mxu1 }
 0x30e   : > { %v5594_v47 = vmax.f32 %v5550_v55, %v5551_v5  ;;  %v5553_v32 = vadd.f32 %v6602_v12, %v8545_v27  ;;  %v2991_v34 = vpop.f32.mrb[45].mxu1 }
 0x30f   : > { %v2993_v61 = vpop.f32.mrb[46].mxu1 }
 0x310   : > { %v6545_v13 = vpack.c.bf16 %v5594_v47, %v5594_v47  ;;  %v5595_v36 = vmax.f32 %v5552_v20, %v5553_v32  ;;  %v5385_v35 = vpop.f32.mrb[44].mxu0  ;;  %v2995_v63 = vpop.f32.mrb[47].mxu1 }
 0x311   : > { %v6603_v23 = vadd.f32 %v5385_v35, %v2989_v29  ;;  %v5387_v38 = vpop.f32.mrb[45].mxu0 }
 0x312   : > { %5755 = vst.msk [vmem:[%s8555_s20 + $0x50] sm:$0xf] %vm5734_vm8, %v6545_v13  ;;  %v6546_v39 = vpack.c.bf16 %v5595_v36, %v5595_v36  ;;  %v6604_v40 = vadd.f32 %v5387_v38, %v2991_v34  ;;  %v5389_v42 = vpop.f32.mrb[46].mxu0 }
 0x313   : > { %v5554_v22 = vadd.f32 %v6603_v23, %v8543_v19  ;;  %v6605_v48 = vadd.f32 %v5389_v42, %v2993_v61  ;;  %v5391_v41 = vpop.f32.mrb[47].mxu0 }
 0x314   : > { %5756 = vst.msk [vmem:[%s8555_s20 + $0x54] sm:$0xf] %vm5734_vm8, %v6546_v39  ;;  %v5555_v43 = vadd.f32 %v6604_v40, %v8545_v27  ;;  %v6606_v28 = vadd.f32 %v5391_v41, %v2995_v63 }
 0x315   : > { %v5556_v30 = vadd.f32 %v6605_v48, %v8543_v19  ;;  %v2999_v44 = vpop.f32.mrb[48].mxu1 }
 0x316   : > { %v5596_v11 = vmax.f32 %v5554_v22, %v5555_v43  ;;  %v5557_v50 = vadd.f32 %v6606_v28, %v8545_v27  ;;  %v3001_v52 = vpop.f32.mrb[49].mxu1 }
 0x317   : > { %v3003_v45 = vpop.f32.mrb[50].mxu1 }
 0x318   : > { %v6547_v51 = vpack.c.bf16 %v5596_v11, %v5596_v11  ;;  %v5597_v60 = vmax.f32 %v5556_v30, %v5557_v50  ;;  %v5395_v15 = vpop.f32.mrb[48].mxu0  ;;  %v3005_v4 = vpop.f32.mrb[51].mxu1 }
 0x319   : > { %v6607_v54 = vadd.f32 %v5395_v15, %v2999_v44  ;;  %v5397_v2 = vpop.f32.mrb[49].mxu0 }
 0x31a   : > { %5757 = vst.msk [vmem:[%s8555_s20 + $0x58] sm:$0xf] %vm5734_vm8, %v6547_v51  ;;  %v6548_v25 = vpack.c.bf16 %v5597_v60, %v5597_v60  ;;  %v6608_v58 = vadd.f32 %v5397_v2, %v3001_v52  ;;  %v5399_v3 = vpop.f32.mrb[50].mxu0 }
 0x31b   : > { %v5558_v31 = vadd.f32 %v6607_v54, %v8543_v19  ;;  %v6609_v46 = vadd.f32 %v5399_v3, %v3003_v45  ;;  %v5401_v7 = vpop.f32.mrb[51].mxu0 }
 0x31c   : > { %5758 = vst.msk [vmem:[%s8555_s20 + $0x5c] sm:$0xf] %vm5734_vm8, %v6548_v25  ;;  %v5559_v8 = vadd.f32 %v6608_v58, %v8545_v27  ;;  %v6610_v49 = vadd.f32 %v5401_v7, %v3005_v4 }
 0x31d   : > { %v5560_v59 = vadd.f32 %v6609_v46, %v8543_v19  ;;  %v3009_v10 = vpop.f32.mrb[52].mxu1 }
 0x31e   : > { %v5598_v16 = vmax.f32 %v5558_v31, %v5559_v8  ;;  %v5561_v1 = vadd.f32 %v6610_v49, %v8545_v27  ;;  %v3011_v17 = vpop.f32.mrb[53].mxu1 }
 0x31f   : > { %v3013_v62 = vpop.f32.mrb[54].mxu1 }
 0x320   : > { %v6549_v56 = vpack.c.bf16 %v5598_v16, %v5598_v16  ;;  %v5599_v9 = vmax.f32 %v5560_v59, %v5561_v1  ;;  %v5405_v33 = vpop.f32.mrb[52].mxu0  ;;  %v3015_v18 = vpop.f32.mrb[55].mxu1 }
 0x321   : > { %v6611_v57 = vadd.f32 %v5405_v33, %v3009_v10  ;;  %v5407_v37 = vpop.f32.mrb[53].mxu0 }
 0x322   : > { %5759 = vst.msk [vmem:[%s8555_s20 + $0x60] sm:$0xf] %vm5734_vm8, %v6549_v56  ;;  %v6550_v6 = vpack.c.bf16 %v5599_v9, %v5599_v9  ;;  %v6612_v14 = vadd.f32 %v5407_v37, %v3011_v17  ;;  %v5409_v21 = vpop.f32.mrb[54].mxu0 }
 0x323   : > { %v5562_v24 = vadd.f32 %v6611_v57, %v8543_v19  ;;  %v6613_v53 = vadd.f32 %v5409_v21, %v3013_v62  ;;  %v5411_v55 = vpop.f32.mrb[55].mxu0 }
 0x324   : > { %5760 = vst.msk [vmem:[%s8555_s20 + $0x64] sm:$0xf] %vm5734_vm8, %v6550_v6  ;;  %v5563_v26 = vadd.f32 %v6612_v14, %v8545_v27  ;;  %v6614_v0 = vadd.f32 %v5411_v55, %v3015_v18 }
 0x325   : > { %v5564_v5 = vadd.f32 %v6613_v53, %v8543_v19  ;;  %v3019_v12 = vpop.f32.mrb[56].mxu1 }
 0x326   : > { %v5600_v20 = vmax.f32 %v5562_v24, %v5563_v26  ;;  %v5565_v29 = vadd.f32 %v6614_v0, %v8545_v27  ;;  %v3021_v47 = vpop.f32.mrb[57].mxu1 }
 0x327   : > { %v3023_v32 = vpop.f32.mrb[58].mxu1 }
 0x328   : > { %v6551_v34 = vpack.c.bf16 %v5600_v20, %v5600_v20  ;;  %v5601_v61 = vmax.f32 %v5564_v5, %v5565_v29  ;;  %v5415_v13 = vpop.f32.mrb[56].mxu0  ;;  %v3025_v36 = vpop.f32.mrb[59].mxu1 }
 0x329   : > { %v6615_v35 = vadd.f32 %v5415_v13, %v3019_v12  ;;  %v5417_v63 = vpop.f32.mrb[57].mxu0 }
 0x32a   : > { %5761 = vst.msk [vmem:[%s8555_s20 + $0x68] sm:$0xf] %vm5734_vm8, %v6551_v34  ;;  %v6552_v23 = vpack.c.bf16 %v5601_v61, %v5601_v61  ;;  %v6616_v38 = vadd.f32 %v5417_v63, %v3021_v47  ;;  %v5419_v39 = vpop.f32.mrb[58].mxu0 }
 0x32b   : > { %v5566_v40 = vadd.f32 %v6615_v35, %v8543_v19  ;;  %v6617_v42 = vadd.f32 %v5419_v39, %v3023_v32  ;;  %v5421_v22 = vpop.f32.mrb[59].mxu0 }
 0x32c   : > { %5762 = vst.msk [vmem:[%s8555_s20 + $0x6c] sm:$0xf] %vm5734_vm8, %v6552_v23  ;;  %v5567_v48 = vadd.f32 %v6616_v38, %v8545_v27  ;;  %v6618_v41 = vadd.f32 %v5421_v22, %v3025_v36 }
 0x32d   : > { %v5568_v43 = vadd.f32 %v6617_v42, %v8543_v19  ;;  %v3029_v28 = vpop.f32.mrb[60].mxu1 }
 0x32e   : > { %v5602_v30 = vmax.f32 %v5566_v40, %v5567_v48  ;;  %v5569_v44 = vadd.f32 %v6618_v41, %v8545_v27  ;;  %v3031_v11 = vpop.f32.mrb[61].mxu1 }
 0x32f   : > { %v3033_v50 = vpop.f32.mrb[62].mxu1 }
 0x330   : > { %v6553_v52 = vpack.c.bf16 %v5602_v30, %v5602_v30  ;;  %v5603_v45 = vmax.f32 %v5568_v43, %v5569_v44  ;;  %v5425_v51 = vpop.f32.mrb[60].mxu0  ;;  %v3035_v60 = vpop.f32.mrb[63].mxu1 }
 0x331   : > { %v6619_v15 = vadd.f32 %v5425_v51, %v3029_v28  ;;  %v5427_v4 = vpop.f32.mrb[61].mxu0 }
 0x332   : > { %5763 = vst.msk [vmem:[%s8555_s20 + $0x70] sm:$0xf] %vm5734_vm8, %v6553_v52  ;;  %v6554_v54 = vpack.c.bf16 %v5603_v45, %v5603_v45  ;;  %v6620_v2 = vadd.f32 %v5427_v4, %v3031_v11  ;;  %v5429_v25 = vpop.f32.mrb[62].mxu0 }
 0x333   : > { %v5570_v58 = vadd.f32 %v6619_v15, %v8543_v19  ;;  %v6621_v3 = vadd.f32 %v5429_v25, %v3033_v50  ;;  %v5431_v31 = vpop.f32.mrb[63].mxu0 }
 0x334   : > { %5764 = vst.msk [vmem:[%s8555_s20 + $0x74] sm:$0xf] %vm5734_vm8, %v6554_v54  ;;  %v5571_v46 = vadd.f32 %v6620_v2, %v8545_v27  ;;  %v6622_v7 = vadd.f32 %v5431_v31, %v3035_v60 }
 0x335   : > { %v5572_v8 = vadd.f32 %v6621_v3, %v8543_v19 }
 0x336   : > { %v5604_v49 = vmax.f32 %v5570_v58, %v5571_v46  ;;  %v5573_v59 = vadd.f32 %v6622_v7, %v8545_v27 }
 0x338   : > { %v6555_v10 = vpack.c.bf16 %v5604_v49, %v5604_v49  ;;  %v5605_v16 = vmax.f32 %v5572_v8, %v5573_v59 }
 0x33a   : > { %5765 = vst.msk [vmem:[%s8555_s20 + $0x78] sm:$0xf] %vm5734_vm8, %v6555_v10  ;;  %v6556_v1 = vpack.c.bf16 %v5605_v16, %v5605_v16 }
 0x33c   : > { %5766 = vst.msk [vmem:[%s8555_s20 + $0x7c] sm:$0xf] %vm5734_vm8, %v6556_v1 }
 0x33d PF: > { %s13_s14 = sadd.s32 1, %s7183_s14   ;;  %s8722_s12 = smov %s7179_s13 }
 0x33e   : > { %p10_p5 = scmp.ge.s32.totalorder %s13_s14, 4   ;;  %s8723_s13 = smov %s8725_s15 }
 0x340   :  { %12 = sbr.rel (!%p10_p5) target bundleno = 2 (0x2), region = 73 }

</bundles_post_ra>
